<compile_context>
chip_gen: v5e
topology: v5e:2x2
jax: 0.10.0
libtpu: 0.0.40
codegen_flags: <defaults>
</compile_context>

<pallas_src>
import functools

import jax
import jax.numpy as jnp
from jax.experimental import pallas as pl
from jax.experimental.pallas import tpu as pltpu

M_FEAT = 32        # m in the PyTorch module
N_CLASSES = 20
N_OFFSET = 3

# Packed, lane-dense output slab layout: [ fv1 (32) | y (20) | offset (3) | 0 pad ] = 64 lanes
SLAB_W = 64
COL_FV1 = 0
COL_Y = M_FEAT                   # 32
COL_OFF = M_FEAT + N_CLASSES     # 52

# Packed weight layout along the lane axis (two 128-lane-aligned segments):
#   [0:128)   stage-1 fused weight  [w1 (32) | w_lin (20) | 0 (12) | w1@wc0 (32) | 0 (32)]
#             (linear1 folded into cen_pred[0]: h_pre = fv @ (w1@wc0) + (b1@wc0 + bc0))
#   [128:192) cen_pred[2] weight embedded at slab cols COL_OFF:COL_OFF+3 of a 64-wide zero
#             block, so the offset matmul lands directly in the slab's offset columns.
SEG1 = 128
SEG2 = SLAB_W                    # 64
W_PACK = SEG1 + SEG2             # 192
HPRE_COL = SLAB_W                # 64: where h_pre starts inside the stage-1 result


def _scn_heads_kernel(fv_ref, w_ref, b_ref, out_ref):
    """Fused SCN head for one row tile: 2 MXU matmuls, one dense packed store."""
    f32 = jnp.float32
    fv = fv_ref[...]                              # (T, 32)   compute dtype (bf16 or f32)

    # 128-lane-aligned ref slices -> plain aligned loads (no lane-carving of a wide value).
    w_a = w_ref[:, 0:SEG1]                        # (32, 128)
    w_o = w_ref[:, SEG1:W_PACK]                   # (32, 64)
    b_a = b_ref[:, 0:SEG1]                        # (1, 128)  f32
    b_o = b_ref[:, SEG1:W_PACK]                   # (1, 64)   f32

    # Stage 1 (single fused matmul): [ fv1 | y | 0 | h_pre | 0 ]
    s1 = jnp.dot(fv, w_a, preferred_element_type=f32) + b_a          # (T, 128) f32

    slab = s1[:, 0:SLAB_W]                                            # (T, 64): fv1 | y | 0
    h = jnp.maximum(s1[:, HPRE_COL:HPRE_COL + M_FEAT], 0.0)           # (T, 32): ReLU(h_pre)

    # Stage 2: offset matmul lands directly in slab columns COL_OFF:COL_OFF+3.
    off = jnp.dot(h.astype(w_a.dtype), w_o, preferred_element_type=f32) + b_o   # (T, 64)

    # slab is exactly zero in the offset columns, off is exactly zero elsewhere
    # -> one dense lane-packed store, cast once to the (bf16) output dtype.
    out_ref[...] = (slab + off).astype(out_ref.dtype)


def _choose_tile(n):
    """Pick (tile_rows, grid_steps).

    Rough per-call cost model (ns): HBM traffic ~192 B/row (bf16 fv read + bf16 slab
    write) at ~1 TB/s plus ~0.35 us per grid step.  The grid is forced even so v7x's two
    TensorCores split the "parallel" axis cleanly (free on single-TC v5e/v6e); the model
    keeps zero-row padding bounded instead of always taking the biggest tile.
    """
    best = None
    for t in (4096, 2048, 1024, 512):
        steps = -(-n // t)
        if steps % 2:
            steps += 1                              # even grid -> clean 2-TC split on v7x
        cost = (steps * t) * 0.192 + steps * 350.0  # traffic + per-step pipeline overhead
        if best is None or cost < best[1]:
            best = ((t, steps), cost)
    return best[0]


@functools.partial(jax.jit, static_argnames=("compute_dtype", "out_dtype"))
def scn_heads_slab(fv, w_lin, b_lin, w1, b1, wc0, bc0, wc1, bc1,
                   compute_dtype=jnp.bfloat16, out_dtype=jnp.bfloat16):
    """Dense SCN head.  Weights are [in, out] (transposed vs torch); biases are [1, out].

    Returns the packed (n_pad, 64) slab [fv1 | y | offset | 0] in `out_dtype`.  Rows >= n
    are padding.  Downstream consumers should read the slab directly (or fuse it into the
    next kernel); use `split_slab` only at the final consumption point.
    """
    f32 = jnp.float32
    n, c = fv.shape
    assert c == M_FEAT
    tile, steps = _choose_tile(n)
    n_pad = tile * steps

    fv_p = fv if n_pad == n else jnp.pad(fv, ((0, n_pad - n), (0, 0)))
    fv_p = fv_p.astype(compute_dtype)

    # Fold linear1 into cen_pred[0] at pack time (done in f32, cast once to compute dtype).
    w_c0_eff = w1 @ wc0                            # (32, 32)
    b_c0_eff = b1 @ wc0 + bc0                      # (1, 32)

    # Stage-1 fused segment (128 lanes): [w1 | w_lin | 0 | w_c0_eff | 0]
    w_seg1 = jnp.concatenate(
        [w1, w_lin,
         jnp.zeros((M_FEAT, SLAB_W - COL_OFF), f32),          # slab cols 52:64 stay zero
         w_c0_eff,
         jnp.zeros((M_FEAT, SEG1 - (SLAB_W + M_FEAT)), f32)], axis=1)       # (32, 128)
    b_seg1 = jnp.concatenate(
        [b1, b_lin,
         jnp.zeros((1, SLAB_W - COL_OFF), f32),
         b_c0_eff,
         jnp.zeros((1, SEG1 - (SLAB_W + M_FEAT)), f32)], axis=1)            # (1, 128)

    # Stage-2 segment (64 lanes): cen_pred[2] embedded at the slab's offset columns.
    w_seg2 = jnp.zeros((M_FEAT, SEG2), f32).at[:, COL_OFF:COL_OFF + N_OFFSET].set(wc1)
    b_seg2 = jnp.zeros((1, SEG2), f32).at[:, COL_OFF:COL_OFF + N_OFFSET].set(bc1)

    w_pack = jnp.concatenate([w_seg1, w_seg2], axis=1).astype(compute_dtype)  # (32, 192)
    b_pack = jnp.concatenate([b_seg1, b_seg2], axis=1).astype(f32)            # (1, 192)

    in_itemsize = jnp.dtype(compute_dtype).itemsize
    out_itemsize = jnp.dtype(out_dtype).itemsize
    cost = pl.CostEstimate(
        flops=2 * n_pad * M_FEAT * W_PACK,
        transcendentals=0,
        bytes_accessed=(n_pad * M_FEAT * in_itemsize          # fv read
                        + n_pad * SLAB_W * out_itemsize        # packed slab write
                        + M_FEAT * W_PACK * in_itemsize + W_PACK * 4),
    )

    slab = pl.pallas_call(
        _scn_heads_kernel,
        out_shape=jax.ShapeDtypeStruct((n_pad, SLAB_W), out_dtype),
        grid_spec=pltpu.PrefetchScalarGridSpec(
            num_scalar_prefetch=0,
            grid=(steps,),
            in_specs=[
                pl.BlockSpec((tile, M_FEAT), lambda i: (i, 0)),     # fv row tile
                pl.BlockSpec((M_FEAT, W_PACK), lambda i: (0, 0)),   # packed weights
                pl.BlockSpec((1, W_PACK), lambda i: (0, 0)),        # packed biases (f32)
            ],
            out_specs=pl.BlockSpec((tile, SLAB_W), lambda i: (i, 0)),
        ),
        compiler_params=pltpu.CompilerParams(
            dimension_semantics=("parallel",)),
        cost_estimate=cost,
    )(fv_p, w_pack, b_pack)
    return slab


def split_slab(slab, n):
    """Final-consumption split into (y, fv1, offset).

    These minor-dim slices force XLA to materialize three new arrays (a full slab
    re-read + rewrite); call this only where the three tensors are actually needed —
    prefer consuming/fusing the packed slab directly.
    """
    y = slab[:n, COL_Y:COL_Y + N_CLASSES]
    fv1 = slab[:n, COL_FV1:COL_FV1 + M_FEAT]
    offset = slab[:n, COL_OFF:COL_OFF + N_OFFSET]
    return y, fv1, offset


def scn_heads(fv, w_lin, b_lin, w1, b1, wc0, bc0, wc1, bc1,
              compute_dtype=jnp.bfloat16, out_dtype=jnp.bfloat16):
    """Module-parity convenience returning (y, fv, offset) like SCN.forward's head.
    Prefer scn_heads_slab + downstream fusion; this pays the slab-split cost."""
    slab = scn_heads_slab(fv, w_lin, b_lin, w1, b1, wc0, bc0, wc1, bc1,
                          compute_dtype=compute_dtype, out_dtype=out_dtype)
    return split_slab(slab, fv.shape[0])


def _torch_linear_init(key, fan_in, fan_out):
    """Deterministic init mimicking torch.nn.Linear (uniform +-1/sqrt(fan_in)).
    Returns W as [fan_in, fan_out] (transposed vs torch) and b as [1, fan_out]."""
    kw, kb = jax.random.split(key)
    bound = 1.0 / jnp.sqrt(jnp.float32(fan_in))
    w = jax.random.uniform(kw, (fan_in, fan_out), jnp.float32, -bound, bound)
    b = jax.random.uniform(kb, (1, fan_out), jnp.float32, -bound, bound)
    return w, b


if __name__ == "__main__":
    key = jax.random.PRNGKey(0)
    k_fv, k_lin, k_lin1, k_c0, k_c1 = jax.random.split(key, 5)

    # Per-point features the sparse backbone would have produced (see TODO(synk) above).
    # Deliberately not a tile multiple to exercise the ragged-N padding path.
    n_points = 3000
    fv = jax.random.normal(k_fv, (n_points, M_FEAT), jnp.float32)

    w_lin, b_lin = _torch_linear_init(k_lin, M_FEAT, N_CLASSES)   # self.linear
    w1, b1 = _torch_linear_init(k_lin1, M_FEAT, M_FEAT)           # self.linear1
    wc0, bc0 = _torch_linear_init(k_c0, M_FEAT, M_FEAT)           # cen_pred[0]
    wc1, bc1 = _torch_linear_init(k_c1, M_FEAT, N_OFFSET)         # cen_pred[2]

    # Primary API: packed slab out of the jit; split only at the final consumption point.
    slab = scn_heads_slab(fv, w_lin, b_lin, w1, b1, wc0, bc0, wc1, bc1)
    jax.block_until_ready(slab)
    y, fv_out, offset = split_slab(slab, n_points)
    jax.block_until_ready((y, fv_out, offset))

    # Reference with the same recipe as the kernel: bf16 inputs, f32 accumulation,
    # linear1 folded into cen_pred[0].  Kernel output is bf16 -> modest tolerances.
    cd = jnp.bfloat16
    f32 = jnp.float32
    w_c0_eff = w1 @ wc0
    b_c0_eff = b1 @ wc0 + bc0
    fvc = fv.astype(cd)
    y_ref = jnp.dot(fvc, w_lin.astype(cd), preferred_element_type=f32) + b_lin
    fv1_ref = jnp.dot(fvc, w1.astype(cd), preferred_element_type=f32) + b1
    h_ref = jnp.maximum(
        jnp.dot(fvc, w_c0_eff.astype(cd), preferred_element_type=f32) + b_c0_eff, 0.0)
    off_ref = jnp.dot(h_ref.astype(cd), wc1.astype(cd), preferred_element_type=f32) + bc1

    assert y.shape == (n_points, N_CLASSES)
    assert fv_out.shape == (n_points, M_FEAT)
    assert offset.shape == (n_points, N_OFFSET)
    assert jnp.allclose(y.astype(f32), y_ref, atol=2e-2, rtol=2e-2)
    assert jnp.allclose(fv_out.astype(f32), fv1_ref, atol=2e-2, rtol=2e-2)
    assert jnp.allclose(offset.astype(f32), off_ref, atol=2e-2, rtol=2e-2)

    print("KERNEL_OK")
</pallas_src>

<mosaic_0001>
module attributes {stable_mosaic.version = 11 : i64} {
  func.func @_scn_heads_kernel(%arg0: i32, %arg1: memref<2048x32xbf16, #tpu.memory_space<vmem>>, %arg2: memref<32x192xbf16, #tpu.memory_space<vmem>>, %arg3: memref<1x192xf32, #tpu.memory_space<vmem>>, %arg4: memref<2048x64xbf16, #tpu.memory_space<vmem>>) attributes {dimension_semantics = [#tpu.dimension_semantics<parallel>], iteration_bounds = array<i64: 2>, scalar_prefetch = 0 : i64, scratch_operands = 0 : i64, tpu.core_type = #tpu.core_type<tc>, window_params = [{transform_indices = @transform_0, window_bounds = array<i64: 2048, 32>}, {pipeline_mode = #tpu.pipeline_mode<synchronous>, transform_indices = @transform_1, window_bounds = array<i64: 32, 192>}, {pipeline_mode = #tpu.pipeline_mode<synchronous>, transform_indices = @transform_2, window_bounds = array<i64: 1, 192>}, {transform_indices = @transform_3, window_bounds = array<i64: 2048, 64>}]} {
    %c0 = arith.constant 0 : index
    %c0_0 = arith.constant 0 : index
    %0 = vector.load %arg1[%c0, %c0_0] : memref<2048x32xbf16, #tpu.memory_space<vmem>>, vector<2048x32xbf16>
    %c0_1 = arith.constant 0 : index
    %c0_2 = arith.constant 0 : index
    %1 = vector.load %arg2[%c0_1, %c0_2] : memref<32x192xbf16, #tpu.memory_space<vmem>>, vector<32x128xbf16>
    %c0_3 = arith.constant 0 : index
    %c128 = arith.constant 128 : index
    %2 = vector.load %arg2[%c0_3, %c128] : memref<32x192xbf16, #tpu.memory_space<vmem>>, vector<32x64xbf16>
    %c0_4 = arith.constant 0 : index
    %c0_5 = arith.constant 0 : index
    %3 = vector.load %arg3[%c0_4, %c0_5] : memref<1x192xf32, #tpu.memory_space<vmem>>, vector<1x128xf32>
    %c0_6 = arith.constant 0 : index
    %c128_7 = arith.constant 128 : index
    %4 = vector.load %arg3[%c0_6, %c128_7] : memref<1x192xf32, #tpu.memory_space<vmem>>, vector<1x64xf32>
    %cst = arith.constant dense<0.000000e+00> : vector<2048x128xf32>
    %5 = tpu.matmul %0, %1, %cst {dimension_numbers = #tpu.dot_dimension_numbers<[1], [0], [0], [1], [0, 0, 1, 1], [], []>} : vector<2048x32xbf16>, vector<32x128xbf16>, vector<2048x128xf32> -> vector<2048x128xf32>
    %6 = vector.broadcast %3 : vector<1x128xf32> to vector<2048x128xf32>
    %7 = arith.addf %5, %6 : vector<2048x128xf32>
    %8 = vector.extract_strided_slice %7 {offsets = [0, 0], sizes = [2048, 64], strides = [1, 1]} : vector<2048x128xf32> to vector<2048x64xf32>
    %9 = vector.extract_strided_slice %7 {offsets = [0, 64], sizes = [2048, 32], strides = [1, 1]} : vector<2048x128xf32> to vector<2048x32xf32>
    %cst_8 = arith.constant 0.000000e+00 : f32
    %10 = vector.broadcast %cst_8 : f32 to vector<2048x32xf32>
    %11 = arith.maximumf %9, %10 : vector<2048x32xf32>
    %12 = arith.truncf %11 : vector<2048x32xf32> to vector<2048x32xbf16>
    %cst_9 = arith.constant dense<0.000000e+00> : vector<2048x64xf32>
    %13 = tpu.matmul %12, %2, %cst_9 {dimension_numbers = #tpu.dot_dimension_numbers<[1], [0], [0], [1], [0, 0, 1, 1], [], []>} : vector<2048x32xbf16>, vector<32x64xbf16>, vector<2048x64xf32> -> vector<2048x64xf32>
    %14 = vector.broadcast %4 : vector<1x64xf32> to vector<2048x64xf32>
    %15 = arith.addf %13, %14 : vector<2048x64xf32>
    %16 = arith.addf %8, %15 : vector<2048x64xf32>
    %17 = arith.truncf %16 : vector<2048x64xf32> to vector<2048x64xbf16>
    %c0_10 = arith.constant 0 : index
    %c0_11 = arith.constant 0 : index
    %18 = vector.load %arg4[%c0_10, %c0_11] : memref<2048x64xbf16, #tpu.memory_space<vmem>>, vector<2048x64xbf16>
    tpu.vector_store %arg4[%c0_10, %c0_11], %17 {strides = array<i32>} : memref<2048x64xbf16, #tpu.memory_space<vmem>>, vector<2048x64xbf16>,
    return
  }
  func.func @transform_0(%arg0: i32) -> (i32, i32) {
    %c0_i32 = arith.constant 0 : i32
    %c0_i32_0 = arith.constant 0 : i32
    return %arg0, %c0_i32 : i32, i32
  }
  func.func @transform_1(%arg0: i32) -> (i32, i32) {
    %c0_i32 = arith.constant 0 : i32
    %c0_i32_0 = arith.constant 0 : i32
    %c0_i32_1 = arith.constant 0 : i32
    return %c0_i32, %c0_i32_0 : i32, i32
  }
  func.func @transform_2(%arg0: i32) -> (i32, i32) {
    %c0_i32 = arith.constant 0 : i32
    %c0_i32_0 = arith.constant 0 : i32
    %c0_i32_1 = arith.constant 0 : i32
    return %c0_i32, %c0_i32_0 : i32, i32
  }
  func.func @transform_3(%arg0: i32) -> (i32, i32) {
    %c0_i32 = arith.constant 0 : i32
    %c0_i32_0 = arith.constant 0 : i32
    return %arg0, %c0_i32 : i32, i32
  }
}

</mosaic_0001>

<bundles_post_ra>
// kernel: scn_heads_slab.1
= control target key start
LH: loop header
LB: loop body
LE: loop exit
PB: predicated region body
PF: predicated region fallthrough
CT: control target
= control target key end

     0   :  { %s5750_s12 = smov 0   ;;  %s8412_s0 = inlined_call_operand.vmem [shape: bf16[4096,32], index: 0, kind: input, shape index: {}]   ;;  %s8413_s1 = inlined_call_operand.vmem [shape: bf16[32,192], index: 1, kind: input, shape index: {}]   ;;  %s8414_s2 = inlined_call_operand.vmem [shape: f32[1,192], index: 2, kind: input, shape index: {}]   ;;  %s8415_s3 = inlined_call_operand.vmem [shape: bf16[4096,64], index: 3, kind: output, shape index: {}]  }
   0x1 LB: > { %s4771_s13 = sadd.s32 4294967295, %s5727_s12   ;;  %p4775_p0 = scmp.ge.s32.totalorder %s5727_s12, 1  ;;  %s5727_s12 = sphi %s5750_s12, %s13_s12  }
   0x2   : > { %p138_p1 = scmp.lt.s32.totalorder %s5727_s12, 3 }
   0x4   : > { %p139_p2 = pnand %p4775_p0, %p138_p1 }
   0x6   : > { %142 = sbr.rel (%p139_p2) target bundleno = 1439 (0x59f), region = 32 }
   0xb   : > { %v5298_v0 = vld [vmem:[%s8413_s1 + $0x10] sm:$0xf]  ;;  %v5695_v1 = vld [vmem:[%s8413_s1 + $0x14] sm:$0xf0]  ;;  %v5294_v2 = vld [vmem:[%s8413_s1] sm:$0xf] }
   0xc   : > { %v5299_v3 = vor.u32 %v5695_v1, %v5298_v0  ;;  %v5694_v4 = vld [vmem:[%s8413_s1 + $0x4] sm:$0xf0]  ;;  %s4776_s22 = sshll.u32 %s4771_s13, 8  ;;  %vm1096_vm0 = vcmask 261120   ;;  %v5819_v27 = vld [vmem:[%s8414_s2] ss:$0 sm:$0xff] }
   0xd   : > { %p163_p3 = scmp.lt.s32.totalorder %s4776_s22, 511  ;;  %v5295_v5 = vor.u32 %v5694_v4, %v5294_v2  ;;  %s5729_s29 = smov 64   ;;  %vm4458_vm1 = vcmask 519168  }
   0xe   : > { %5698 = vmatpush.bf16.msra.mxu2 %v5299_v3  ;;  %1487 = vmatpush.bf16.msra.mxu0 %v5299_v3 }
   0xf   : > { %s8624_s22 = smov (!%p163_p3, %s4776_s22), 511 }
  0x10   : > { %s4777_s23 = sshll.u32 %s8624_s22, 2 }
  0x11   : > { %s5778_s26 = scalar_lea.vmem %s8412_s0, %s4777_s23  ;;  %s6226_s16 = scalar_lea.vmem %s8415_s3, %s4777_s23 }
  0x12   : > { %5699 = vmatpush.bf16.msra.mxu2 %v5295_v5  ;;  %1488 = vmatpush.bf16.msra.mxu0 %v5295_v5  ;;  %v5630_v6 = vld [vmem:[%s5778_s26 + $0x200] sm:$0xff]  ;;  %v5631_v8 = vld [vmem:[%s5778_s26 + $0x208] sm:$0xff]  ;;  %v5632_v10 = vld [vmem:[%s5778_s26 + $0x210] sm:$0xff] }
  0x13   : > { %v5566_v7 = vld [vmem:[%s5778_s26] sm:$0xff]  ;;  %v5567_v9 = vld [vmem:[%s5778_s26 + $0x8] sm:$0xff]  ;;  %v5568_v11 = vld [vmem:[%s5778_s26 + $0x10] sm:$0xff] }
  0x14   : > { %v5633_v12 = vld [vmem:[%s5778_s26 + $0x218] sm:$0xff]  ;;  %v5634_v14 = vld [vmem:[%s5778_s26 + $0x220] sm:$0xff]  ;;  %v5635_v16 = vld [vmem:[%s5778_s26 + $0x228] sm:$0xff] }
  0x15   : > { %5364 = vmatmul.msk.bf16.vlgmr.msra.gmra.mxu2 %vm1096_vm0, %v5630_v6  ;;  %5300 = vmatmul.msk.bf16.vlgmr.msra.gmra.mxu0 %vm1096_vm0, %v5566_v7  ;;  %v5569_v13 = vld [vmem:[%s5778_s26 + $0x18] sm:$0xff]  ;;  %v5570_v15 = vld [vmem:[%s5778_s26 + $0x20] sm:$0xff]  ;;  %v5571_v17 = vld [vmem:[%s5778_s26 + $0x28] sm:$0xff] }
  0x16   : > { %v5636_v18 = vld [vmem:[%s5778_s26 + $0x230] sm:$0xff]  ;;  %v5637_v20 = vld [vmem:[%s5778_s26 + $0x238] sm:$0xff]  ;;  %v5638_v22 = vld [vmem:[%s5778_s26 + $0x240] sm:$0xff] }
  0x17   : > { %v5572_v19 = vld [vmem:[%s5778_s26 + $0x30] sm:$0xff]  ;;  %v5573_v21 = vld [vmem:[%s5778_s26 + $0x38] sm:$0xff]  ;;  %v5574_v23 = vld [vmem:[%s5778_s26 + $0x40] sm:$0xff] }
  0x18   : > { %v5639_v31 = vld [vmem:[%s5778_s26 + $0x248] sm:$0xff]  ;;  %v5640_v47 = vld [vmem:[%s5778_s26 + $0x250] sm:$0xff]  ;;  %v5641_v63 = vld [vmem:[%s5778_s26 + $0x258] sm:$0xff] }
  0x19   : > { %v5575_v32 = vld [vmem:[%s5778_s26 + $0x48] sm:$0xff]  ;;  %v5576_v48 = vld [vmem:[%s5778_s26 + $0x50] sm:$0xff]  ;;  %v5577_v0 = vld [vmem:[%s5778_s26 + $0x58] sm:$0xff] }
  0x25   : > { %5365 = vmatmul.msk.bf16.gmra.mxu2 %vm1096_vm0, %v5631_v8  ;;  %5301 = vmatmul.msk.bf16.gmra.mxu0 %vm1096_vm0, %v5567_v9 }
  0x35   : > { %5366 = vmatmul.msk.bf16.gmra.mxu2 %vm1096_vm0, %v5632_v10  ;;  %5302 = vmatmul.msk.bf16.gmra.mxu0 %vm1096_vm0, %v5568_v11 }
  0x45   : > { %5367 = vmatmul.msk.bf16.gmra.mxu2 %vm1096_vm0, %v5633_v12  ;;  %5303 = vmatmul.msk.bf16.gmra.mxu0 %vm1096_vm0, %v5569_v13 }
  0x55   : > { %5368 = vmatmul.msk.bf16.gmra.mxu2 %vm1096_vm0, %v5634_v14  ;;  %5304 = vmatmul.msk.bf16.gmra.mxu0 %vm1096_vm0, %v5570_v15 }
  0x65   : > { %5369 = vmatmul.msk.bf16.gmra.mxu2 %vm1096_vm0, %v5635_v16  ;;  %5305 = vmatmul.msk.bf16.gmra.mxu0 %vm1096_vm0, %v5571_v17 }
  0x75   : > { %5370 = vmatmul.msk.bf16.gmra.mxu2 %vm1096_vm0, %v5636_v18  ;;  %5306 = vmatmul.msk.bf16.gmra.mxu0 %vm1096_vm0, %v5572_v19 }
  0x85   : > { %5371 = vmatmul.msk.bf16.gmra.mxu2 %vm1096_vm0, %v5637_v20  ;;  %5307 = vmatmul.msk.bf16.gmra.mxu0 %vm1096_vm0, %v5573_v21  ;;  %v5642_v20 = vld [vmem:[%s5778_s26 + $0x260] sm:$0xff] }
  0x86   : > { %v5578_v21 = vld [vmem:[%s5778_s26 + $0x60] sm:$0xff] }
  0x92   : > { %v1490_v24 = vpop.f32.mrf.mxu0 }
  0x93   : > { %v5832_v36 = vadd.f32 %v5819_v27, %v1490_v24 }
  0x95   : > { %5372 = vmatmul.msk.bf16.gmra.mxu2 %vm1096_vm0, %v5638_v22  ;;  %5308 = vmatmul.msk.bf16.gmra.mxu0 %vm1096_vm0, %v5574_v23  ;;  %v2130_v40 = vmax.f32 %v5832_v36, 0.0 }
  0x98   : > { %v1810_v25 = vpop.f32.mrf.mxu2 }
  0x99   : > { %v5822_v28 = vadd.f32 %v5819_v27, %v1810_v25 }
  0x9a   : > { %v1492_v26 = vpop.f32.mrf.mxu0 }
  0x9b   : > { %v2258_v34 = vmax.f32 %v5822_v28, 0.0  ;;  %v5835_v37 = vadd.f32 %v5819_v27, %v1492_v26 }
  0x9d   : > { %v2131_v41 = vmax.f32 %v5835_v37, 0.0 }
  0x9f   : > { %v2386_v43 = vpack.c.bf16 %v2131_v41, %v2130_v40  ;;  %v5643_v41 = vld [vmem:[%s5778_s26 + $0x268] sm:$0xff] }
  0xa0   : > { %v1812_v29 = vpop.f32.mrf.mxu2 }
  0xa1   : > { %v5825_v30 = vadd.f32 %v5819_v27, %v1812_v29 }
  0xa2   : > { %v1495_v33 = vpop.f32.mrf.mxu0 }
  0xa3   : > { %v2259_v35 = vmax.f32 %v5825_v30, 0.0  ;;  %v5854_v52 = vadd.f32 %v5819_v27, %v1495_v33 }
  0xa5   : > { %5373 = vmatmul.msk.bf16.gmra.mxu2 %vm1096_vm0, %v5639_v31  ;;  %v2450_v38 = vpack.c.bf16 %v2259_v35, %v2258_v34  ;;  %5309 = vmatmul.msk.bf16.gmra.mxu0 %vm1096_vm0, %v5575_v32  ;;  %v2132_v56 = vmax.f32 %v5854_v52, 0.0 }
  0xa7   : > { %2773 = vrot.lane.b32.xlu0 %v2450_v38, %s5729_s29 }
  0xa8   : > { %v1815_v39 = vpop.f32.mrf.mxu2 }
  0xa9   : > { %v5843_v44 = vadd.f32 %v5819_v27, %v1815_v39 }
  0xaa   : > { %v1497_v42 = vpop.f32.mrf.mxu0 }
  0xab   : > { %v2260_v50 = vmax.f32 %v5843_v44, 0.0  ;;  %v5857_v53 = vadd.f32 %v5819_v27, %v1497_v42  ;;  %v5579_v42 = vld [vmem:[%s5778_s26 + $0x68] sm:$0xff] }
  0xad   : > { %v2133_v57 = vmax.f32 %v5857_v53, 0.0 }
  0xaf   : > { %2645 = vrot.lane.b32.xlu0 %v2386_v43, %s5729_s29  ;;  %v2387_v59 = vpack.c.bf16 %v2133_v57, %v2132_v56 }
  0xb0   : > { %v1817_v45 = vpop.f32.mrf.mxu2 }
  0xb1   : > { %v5847_v46 = vadd.f32 %v5819_v27, %v1817_v45 }
  0xb2   : > { %v1500_v49 = vpop.f32.mrf.mxu0 }
  0xb3   : > { %v2261_v51 = vmax.f32 %v5847_v46, 0.0  ;;  %v5876_v4 = vadd.f32 %v5819_v27, %v1500_v49 }
  0xb5   : > { %5374 = vmatmul.msk.bf16.gmra.mxu2 %vm1096_vm0, %v5640_v47  ;;  %v2451_v54 = vpack.c.bf16 %v2261_v51, %v2260_v50  ;;  %5310 = vmatmul.msk.bf16.gmra.mxu0 %vm1096_vm0, %v5576_v48  ;;  %v2134_v9 = vmax.f32 %v5876_v4, 0.0 }
  0xb7   : > { %2775 = vrot.lane.b32.xlu1 %v2451_v54, %s5729_s29 }
  0xb8   : > { %v1820_v55 = vpop.f32.mrf.mxu2 }
  0xb9   : > { %v5865_v60 = vadd.f32 %v5819_v27, %v1820_v55 }
  0xba   : > { %v1502_v58 = vpop.f32.mrf.mxu0 }
  0xbb   : > { %v2262_v2 = vmax.f32 %v5865_v60, 0.0  ;;  %v5879_v5 = vadd.f32 %v5819_v27, %v1502_v58 }
  0xbd   : > { %v2135_v10 = vmax.f32 %v5879_v5, 0.0 }
  0xbf   : > { %2647 = vrot.lane.b32.xlu1 %v2387_v59, %s5729_s29  ;;  %v2388_v14 = vpack.c.bf16 %v2135_v10, %v2134_v9  ;;  %v5430_v10 = vld [vmem:[%s8413_s1 + $0x4] sm:$0xf] }
  0xc0   : > { %v1822_v61 = vpop.f32.mrf.mxu2 }
  0xc1   : > { %v5869_v62 = vadd.f32 %v5819_v27, %v1822_v61  ;;  %v5434_v61 = vld [vmem:[%s8413_s1 + $0x14] sm:$0xf] }
  0xc2   : > { %v1505_v1 = vpop.f32.mrf.mxu0 }
  0xc3   : > { %v2263_v3 = vmax.f32 %v5869_v62, 0.0  ;;  %v5885_v7 = vadd.f32 %v5819_v27, %v1505_v1  ;;  %v5644_v1 = vld [vmem:[%s5778_s26 + $0x270] sm:$0xff] }
  0xc5   : > { %5375 = vmatmul.msk.bf16.gmra.mxu2 %vm1096_vm0, %v5641_v63  ;;  %v2452_v6 = vpack.c.bf16 %v2263_v3, %v2262_v2  ;;  %5311 = vmatmul.msk.bf16.gmra.mxu0 %vm1096_vm0, %v5577_v0  ;;  %v2136_v12 = vmax.f32 %v5885_v7, 0.0  ;;  %v5697_v63 = vld [vmem:[%s8413_s1 + $0x18] sm:$0xf0]  ;;  %v5580_v2 = vld [vmem:[%s5778_s26 + $0x70] sm:$0xff] }
  0xc6   : > { %v5435_v3 = vor.u32 %v5697_v63, %v5434_v61  ;;  %v5582_v61 = vld [vmem:[%s5778_s26 + $0x80] sm:$0xff] }
  0xc7   : > { %2777 = vrot.lane.b32.xlu2 %v2452_v6, %s5729_s29 }
  0xc8   : > { %v1825_v8 = vpop.f32.mrf.mxu2  ;;  %5700 = vmatpush.bf16.msra.mxu3 %v5435_v3  ;;  %3303 = vmatpush.bf16.msra.mxu1 %v5435_v3 }
  0xc9   : > { %v5895_v16 = vadd.f32 %v5819_v27, %v1825_v8 }
  0xca   : > { %v1507_v11 = vpop.f32.mrf.mxu0 }
  0xcb   : > { %v5891_v13 = vadd.f32 %v5819_v27, %v1507_v11  ;;  %v2264_v23 = vmax.f32 %v5895_v16, 0.0  ;;  %v5696_v11 = vld [vmem:[%s8413_s1 + $0x8] sm:$0xf0] }
  0xcd   : > { %v2137_v15 = vmax.f32 %v5891_v13, 0.0 }
  0xcf   : > { %2649 = vrot.lane.b32.xlu2 %v2388_v14, %s5729_s29  ;;  %v2389_v17 = vpack.c.bf16 %v2137_v15, %v2136_v12  ;;  %v5431_v14 = vor.u32 %v5696_v11, %v5430_v10 }
  0xd0   : > { %v1827_v18 = vpop.f32.mrf.mxu2 }
  0xd1   : > { %v5899_v19 = vadd.f32 %v5819_v27, %v1827_v18  ;;  %2651 = vrot.lane.b32.xlu1 %v2389_v17, %s5729_s29  ;;  %5701 = vmatpush.bf16.msra.mxu3 %v5431_v14 }
  0xd2   : > { %v1510_v22 = vpop.f32.mrf.mxu0  ;;  %3304 = vmatpush.bf16.msra.mxu1 %v5431_v14 }
  0xd3   : > { %v2265_v24 = vmax.f32 %v5899_v19, 0.0  ;;  %v5910_v26 = vadd.f32 %v5819_v27, %v1510_v22 }
  0xd5   : > { %5376 = vmatmul.msk.bf16.gmra.mxu2 %vm1096_vm0, %v5642_v20  ;;  %v2453_v25 = vpack.c.bf16 %v2265_v24, %v2264_v23  ;;  %5312 = vmatmul.msk.bf16.gmra.mxu0 %vm1096_vm0, %v5578_v21  ;;  %v2138_v32 = vmax.f32 %v5910_v26, 0.0 }
  0xd7   : > { %2779 = vrot.lane.b32.xlu0 %v2453_v25, %s5729_s29 }
  0xd8   : > { %v1830_v29 = vpop.f32.mrf.mxu2 }
  0xd9   : > { %v5918_v35 = vadd.f32 %v5819_v27, %v1830_v29 }
  0xda   : > { %v1512_v31 = vpop.f32.mrf.mxu0 }
  0xdb   : > { %v5914_v33 = vadd.f32 %v5819_v27, %v1512_v31  ;;  %v2266_v45 = vmax.f32 %v5918_v35, 0.0  ;;  %v5645_v31 = vld [vmem:[%s5778_s26 + $0x278] sm:$0xff] }
  0xdd   : > { %v2139_v34 = vmax.f32 %v5914_v33, 0.0 }
  0xdf   : > { %v2390_v38 = vpack.c.bf16 %v2139_v34, %v2138_v32  ;;  %v5581_v32 = vld [vmem:[%s5778_s26 + $0x78] sm:$0xff] }
  0xe0   : > { %v1832_v39 = vpop.f32.mrf.mxu2 }
  0xe1   : > { %v5921_v40 = vadd.f32 %v5819_v27, %v1832_v39  ;;  %2653 = vrot.lane.b32.xlu0 %v2390_v38, %s5729_s29 }
  0xe2   : > { %v1515_v43 = vpop.f32.mrf.mxu0 }
  0xe3   : > { %v2267_v47 = vmax.f32 %v5921_v40, 0.0  ;;  %v5932_v49 = vadd.f32 %v5819_v27, %v1515_v43 }
  0xe5   : > { %5377 = vmatmul.msk.bf16.gmra.mxu2 %vm1096_vm0, %v5643_v41  ;;  %v2454_v48 = vpack.c.bf16 %v2267_v47, %v2266_v45  ;;  %5313 = vmatmul.msk.bf16.gmra.mxu0 %vm1096_vm0, %v5579_v42  ;;  %v2140_v54 = vmax.f32 %v5932_v49, 0.0 }
  0xe7   : > { %2781 = vrot.lane.b32.xlu2 %v2454_v48, %s5729_s29 }
  0xe8   : > { %v1835_v50 = vpop.f32.mrf.mxu2 }
  0xe9   : > { %v5940_v57 = vadd.f32 %v5819_v27, %v1835_v50 }
  0xea   : > { %v1517_v51 = vpop.f32.mrf.mxu0 }
  0xeb   : > { %v5936_v55 = vadd.f32 %v5819_v27, %v1517_v51  ;;  %v2268_v8 = vmax.f32 %v5940_v57, 0.0 }
  0xed   : > { %v2141_v56 = vmax.f32 %v5936_v55, 0.0 }
  0xef   : > { %v2391_v58 = vpack.c.bf16 %v2141_v56, %v2140_v54 }
  0xf0   : > { %v1837_v59 = vpop.f32.mrf.mxu2 }
  0xf1   : > { %v5949_v0 = vadd.f32 %v5819_v27, %v1837_v59  ;;  %2655 = vrot.lane.b32.xlu2 %v2391_v58, %s5729_s29  ;;  %v5646_v59 = vld [vmem:[%s5778_s26 + $0x280] sm:$0xff] }
  0xf2   : > { %v1520_v6 = vpop.f32.mrf.mxu0 }
  0xf3   : > { %v2269_v9 = vmax.f32 %v5949_v0, 0.0  ;;  %v5966_v15 = vadd.f32 %v5819_v27, %v1520_v6 }
  0xf5   : > { %5378 = vmatmul.msk.bf16.gmra.mxu2 %vm1096_vm0, %v5644_v1  ;;  %v2455_v12 = vpack.c.bf16 %v2269_v9, %v2268_v8  ;;  %5314 = vmatmul.msk.bf16.gmra.mxu0 %vm1096_vm0, %v5580_v2  ;;  %v2142_v20 = vmax.f32 %v5966_v15, 0.0 }
  0xf7   : > { %2783 = vrot.lane.b32.xlu1 %v2455_v12, %s5729_s29 }
  0xf8   : > { %v1840_v17 = vpop.f32.mrf.mxu2 }
  0xf9   : > { %v5974_v23 = vadd.f32 %v5819_v27, %v1840_v17 }
  0xfa   : > { %v1522_v18 = vpop.f32.mrf.mxu0 }
  0xfb   : > { %v5970_v21 = vadd.f32 %v5819_v27, %v1522_v18  ;;  %v2270_v38 = vmax.f32 %v5974_v23, 0.0 }
  0xfd   : > { %v2143_v22 = vmax.f32 %v5970_v21, 0.0 }
  0xff   : > { %v2392_v24 = vpack.c.bf16 %v2143_v22, %v2142_v20 }
 0x100   : > { %v1842_v25 = vpop.f32.mrf.mxu2 }
 0x101   : > { %v5977_v29 = vadd.f32 %v5819_v27, %v1842_v25  ;;  %2657 = vrot.lane.b32.xlu1 %v2392_v24, %s5729_s29  ;;  %v5647_v25 = vld [vmem:[%s5778_s26 + $0x288] sm:$0xff] }
 0x102   : > { %v1525_v34 = vpop.f32.mrf.mxu0 }
 0x103   : > { %v2271_v39 = vmax.f32 %v5977_v29, 0.0  ;;  %v5988_v42 = vadd.f32 %v5819_v27, %v1525_v34 }
 0x105   : > { %5379 = vmatmul.msk.bf16.gmra.mxu2 %vm1096_vm0, %v5645_v31  ;;  %v2456_v41 = vpack.c.bf16 %v2271_v39, %v2270_v38  ;;  %5315 = vmatmul.msk.bf16.gmra.mxu0 %vm1096_vm0, %v5581_v32  ;;  %v2144_v47 = vmax.f32 %v5988_v42, 0.0  ;;  %v5583_v31 = vld [vmem:[%s5778_s26 + $0x88] sm:$0xff] }
 0x107   : > { %2785 = vrot.lane.b32.xlu0 %v2456_v41, %s5729_s29 }
 0x108   : > { %v1845_v43 = vpop.f32.mrf.mxu2 }
 0x109   : > { %v5996_v51 = vadd.f32 %v5819_v27, %v1845_v43 }
 0x10a   : > { %v1527_v45 = vpop.f32.mrf.mxu0 }
 0x10b   : > { %v5992_v48 = vadd.f32 %v5819_v27, %v1527_v45  ;;  %v2272_v1 = vmax.f32 %v5996_v51, 0.0 }
 0x10d   : > { %v2145_v50 = vmax.f32 %v5992_v48, 0.0 }
 0x10f   : > { %v2393_v54 = vpack.c.bf16 %v2145_v50, %v2144_v47 }
 0x110   : > { %v1847_v56 = vpop.f32.mrf.mxu2 }
 0x111   : > { %v5999_v58 = vadd.f32 %v5819_v27, %v1847_v56  ;;  %2659 = vrot.lane.b32.xlu0 %v2393_v54, %s5729_s29 }
 0x112   : > { %v1530_v63 = vpop.f32.mrf.mxu0 }
 0x113   : > { %v2273_v2 = vmax.f32 %v5999_v58, 0.0  ;;  %v6010_v6 = vadd.f32 %v5819_v27, %v1530_v63 }
 0x115   : > { %5380 = vmatmul.msk.bf16.gmra.mxu2 %vm1096_vm0, %v5646_v59  ;;  %v2457_v3 = vpack.c.bf16 %v2273_v2, %v2272_v1  ;;  %5316 = vmatmul.msk.bf16.gmra.mxu0 %vm1096_vm0, %v5582_v61  ;;  %v2146_v11 = vmax.f32 %v6010_v6, 0.0 }
 0x117   : > { %2787 = vrot.lane.b32.xlu2 %v2457_v3, %s5729_s29  ;;  %v5648_v3 = vld [vmem:[%s5778_s26 + $0x290] sm:$0xff] }
 0x118   : > { %v1850_v8 = vpop.f32.mrf.mxu2 }
 0x119   : > { %v2774_v9 = vpop.permute.xlu0 %2773  ;;  %v6019_v17 = vadd.f32 %v5819_v27, %v1850_v8  ;;  %v5584_v8 = vld [vmem:[%s5778_s26 + $0x90] sm:$0xff] }
 0x11a   : > { %5500 = vmatmul.msk.bf16.vlgmr.msra.gmra.mxu3 %vm1096_vm0, %v2774_v9  ;;  %v1532_v10 = vpop.f32.mrf.mxu0 }
 0x11b   : > { %v6015_v12 = vadd.f32 %v5819_v27, %v1532_v10  ;;  %v2274_v34 = vmax.f32 %v6019_v17, 0.0 }
 0x11d   : > { %v2147_v14 = vmax.f32 %v6015_v12, 0.0 }
 0x11f   : > { %v2394_v18 = vpack.c.bf16 %v2147_v14, %v2146_v11 }
 0x120   : > { %v1852_v20 = vpop.f32.mrf.mxu2 }
 0x121   : > { %v6022_v22 = vadd.f32 %v5819_v27, %v1852_v20  ;;  %v2646_v24 = vpop.permute.xlu0 %2645  ;;  %2661 = vrot.lane.b32.xlu2 %v2394_v18, %s5729_s29  ;;  %v2778_v18 = vpop.permute.xlu2 %2777 }
 0x122   : > { %5436 = vmatmul.msk.bf16.vlgmr.msra.gmra.mxu1 %vm1096_vm0, %v2646_v24  ;;  %v1535_v32 = vpop.f32.mrf.mxu0 }
 0x123   : > { %v2275_v38 = vmax.f32 %v6022_v22, 0.0  ;;  %v6034_v41 = vadd.f32 %v5819_v27, %v1535_v32 }
 0x125   : > { %5381 = vmatmul.msk.bf16.gmra.mxu2 %vm1096_vm0, %v5647_v25  ;;  %v2458_v39 = vpack.c.bf16 %v2275_v38, %v2274_v34  ;;  %5317 = vmatmul.msk.bf16.gmra.mxu0 %vm1096_vm0, %v5583_v31  ;;  %v2148_v50 = vmax.f32 %v6034_v41, 0.0 }
 0x127   : > { %2789 = vrot.lane.b32.xlu1 %v2458_v39, %s5729_s29 }
 0x128   : > { %v1855_v43 = vpop.f32.mrf.mxu2 }
 0x129   : > { %v2776_v45 = vpop.permute.xlu1 %2775  ;;  %v6043_v59 = vadd.f32 %v5819_v27, %v1855_v43 }
 0x12a   : > { %5501 = vmatmul.msk.bf16.gmra.mxu3 %vm1096_vm0, %v2776_v45  ;;  %v1537_v47 = vpop.f32.mrf.mxu0  ;;  %v2650_v45 = vpop.permute.xlu2 %2649 }
 0x12b   : > { %v6039_v54 = vadd.f32 %v5819_v27, %v1537_v47  ;;  %v2276_v10 = vmax.f32 %v6043_v59, 0.0 }
 0x12d   : > { %v2149_v56 = vmax.f32 %v6039_v54, 0.0 }
 0x12f   : > { %v2395_v61 = vpack.c.bf16 %v2149_v56, %v2148_v50  ;;  %v5649_v50 = vld [vmem:[%s5778_s26 + $0x298] sm:$0xff] }
 0x130   : > { %v1857_v63 = vpop.f32.mrf.mxu2  ;;  %v5585_v56 = vld [vmem:[%s5778_s26 + $0x98] sm:$0xff] }
 0x131   : > { %v6046_v1 = vadd.f32 %v5819_v27, %v1857_v63  ;;  %v2648_v2 = vpop.permute.xlu1 %2647  ;;  %2663 = vrot.lane.b32.xlu1 %v2395_v61, %s5729_s29 }
 0x132   : > { %5437 = vmatmul.msk.bf16.gmra.mxu1 %vm1096_vm0, %v2648_v2  ;;  %v1540_v9 = vpop.f32.mrf.mxu0 }
 0x133   : > { %v2277_v11 = vmax.f32 %v6046_v1, 0.0  ;;  %v6058_v20 = vadd.f32 %v5819_v27, %v1540_v9 }
 0x135   : > { %5382 = vmatmul.msk.bf16.gmra.mxu2 %vm1096_vm0, %v5648_v3  ;;  %v2459_v14 = vpack.c.bf16 %v2277_v11, %v2276_v10  ;;  %5318 = vmatmul.msk.bf16.gmra.mxu0 %vm1096_vm0, %v5584_v8  ;;  %v2150_v31 = vmax.f32 %v6058_v20, 0.0 }
 0x137   : > { %2791 = vrot.lane.b32.xlu0 %v2459_v14, %s5729_s29 }
 0x138   : > { %v1860_v24 = vpop.f32.mrf.mxu2 }
 0x139   : > { %v6067_v38 = vadd.f32 %v5819_v27, %v1860_v24 }
 0x13a   : > { %5502 = vmatmul.msk.bf16.gmra.mxu3 %vm1096_vm0, %v2778_v18  ;;  %v1542_v25 = vpop.f32.mrf.mxu0 }
 0x13b   : > { %v6063_v32 = vadd.f32 %v5819_v27, %v1542_v25  ;;  %v2278_v63 = vmax.f32 %v6067_v38, 0.0 }
 0x13d   : > { %v2151_v34 = vmax.f32 %v6063_v32, 0.0 }
 0x13f   : > { %v2396_v39 = vpack.c.bf16 %v2151_v34, %v2150_v31 }
 0x140   : > { %v1862_v43 = vpop.f32.mrf.mxu2 }
 0x141   : > { %v6070_v47 = vadd.f32 %v5819_v27, %v1862_v43  ;;  %2665 = vrot.lane.b32.xlu0 %v2396_v39, %s5729_s29 }
 0x142   : > { %5438 = vmatmul.msk.bf16.gmra.mxu1 %vm1096_vm0, %v2650_v45  ;;  %v1545_v61 = vpop.f32.mrf.mxu0  ;;  %v5650_v45 = vld [vmem:[%s5778_s26 + $0x2a0] sm:$0xff] }
 0x143   : > { %v2279_v2 = vmax.f32 %v6070_v47, 0.0  ;;  %v6082_v8 = vadd.f32 %v5819_v27, %v1545_v61  ;;  %v2652_v39 = vpop.permute.xlu1 %2651 }
 0x145   : > { %5383 = vmatmul.msk.bf16.gmra.mxu2 %vm1096_vm0, %v5649_v50  ;;  %v2460_v3 = vpack.c.bf16 %v2279_v2, %v2278_v63  ;;  %5319 = vmatmul.msk.bf16.gmra.mxu0 %vm1096_vm0, %v5585_v56  ;;  %v2152_v14 = vmax.f32 %v6082_v8, 0.0  ;;  %v5586_v50 = vld [vmem:[%s5778_s26 + $0xa0] sm:$0xff] }
 0x147   : > { %2793 = vrot.lane.b32.xlu2 %v2460_v3, %s5729_s29 }
 0x148   : > { %v1865_v9 = vpop.f32.mrf.mxu2 }
 0x149   : > { %v2780_v10 = vpop.permute.xlu0 %2779  ;;  %v6091_v25 = vadd.f32 %v5819_v27, %v1865_v9 }
 0x14a   : > { %5503 = vmatmul.msk.bf16.gmra.mxu3 %vm1096_vm0, %v2780_v10  ;;  %v1547_v11 = vpop.f32.mrf.mxu0  ;;  %v2782_v10 = vpop.permute.xlu2 %2781 }
 0x14b   : > { %v6087_v18 = vadd.f32 %v5819_v27, %v1547_v11  ;;  %v2280_v61 = vmax.f32 %v6091_v25, 0.0 }
 0x14d   : > { %8485 = vst [vmem:[#allocation2_spill] sm:$0xff] %v6087_v18  ;;  %v2153_v24 = vmax.f32 %v6087_v18, 0.0 }
 0x14f   : > { %v2397_v31 = vpack.c.bf16 %v2153_v24, %v2152_v14 }
 0x150   : > { %v1867_v34 = vpop.f32.mrf.mxu2 }
 0x151   : > { %v6094_v43 = vadd.f32 %v5819_v27, %v1867_v34  ;;  %2667 = vrot.lane.b32.xlu2 %v2397_v31, %s5729_s29 }
 0x152   : > { %5439 = vmatmul.msk.bf16.gmra.mxu1 %vm1096_vm0, %v2652_v39  ;;  %v1550_v56 = vpop.f32.mrf.mxu0 }
 0x153   : > { %v2281_v63 = vmax.f32 %v6094_v43, 0.0  ;;  %v6106_v3 = vadd.f32 %v5819_v27, %v1550_v56 }
 0x155   : > { %5384 = vmatmul.msk.bf16.gmra.mxu2 %vm1096_vm0, %v5650_v45  ;;  %v2461_v2 = vpack.c.bf16 %v2281_v63, %v2280_v61  ;;  %5320 = vmatmul.msk.bf16.gmra.mxu0 %vm1096_vm0, %v5586_v50  ;;  %8486 = vst [vmem:[#allocation3_spill] sm:$0xff] %v6106_v3  ;;  %v2154_v14 = vmax.f32 %v6106_v3, 0.0  ;;  %v2654_v50 = vpop.permute.xlu0 %2653  ;;  %v5651_v61 = vld [vmem:[%s5778_s26 + $0x2a8] sm:$0xff] }
 0x156   : > { %v5587_v63 = vld [vmem:[%s5778_s26 + $0xa8] sm:$0xff] }
 0x157   : > { %2795 = vrot.lane.b32.xlu1 %v2461_v2, %s5729_s29 }
 0x158   : > { %v1870_v9 = vpop.f32.mrf.mxu2 }
 0x159   : > { %v6115_v34 = vadd.f32 %v5819_v27, %v1870_v9 }
 0x15a   : > { %5504 = vmatmul.msk.bf16.gmra.mxu3 %vm1096_vm0, %v2782_v10  ;;  %v1552_v11 = vpop.f32.mrf.mxu0 }
 0x15b   : > { %v6111_v24 = vadd.f32 %v5819_v27, %v1552_v11  ;;  %8488 = vst [vmem:[#allocation5_spill] sm:$0xff] %v6115_v34  ;;  %v2282_v10 = vmax.f32 %v6115_v34, 0.0 }
 0x15d   : > { %8487 = vst [vmem:[#allocation4_spill] sm:$0xff] %v6111_v24  ;;  %v2155_v31 = vmax.f32 %v6111_v24, 0.0 }
 0x15f   : > { %v2398_v39 = vpack.c.bf16 %v2155_v31, %v2154_v14 }
 0x160   : > { %v1872_v45 = vpop.f32.mrf.mxu2 }
 0x161   : > { %v6118_v56 = vadd.f32 %v5819_v27, %v1872_v45  ;;  %2669 = vrot.lane.b32.xlu1 %v2398_v39, %s5729_s29 }
 0x162   : > { %5440 = vmatmul.msk.bf16.gmra.mxu1 %vm1096_vm0, %v2654_v50  ;;  %v1555_v2 = vpop.f32.mrf.mxu0 }
 0x163   : > { %8489 = vst [vmem:[#allocation6_spill] sm:$0xff] %v6118_v56  ;;  %v2283_v11 = vmax.f32 %v6118_v56, 0.0  ;;  %v6130_v14 = vadd.f32 %v5819_v27, %v1555_v2  ;;  %v5652_v56 = vld [vmem:[%s5778_s26 + $0x2b0] sm:$0xff] }
 0x165   : > { %5385 = vmatmul.msk.bf16.gmra.mxu2 %vm1096_vm0, %v5651_v61  ;;  %v2462_v9 = vpack.c.bf16 %v2283_v11, %v2282_v10  ;;  %5321 = vmatmul.msk.bf16.gmra.mxu0 %vm1096_vm0, %v5587_v63  ;;  %8490 = vst [vmem:[#allocation7_spill] sm:$0xff] %v6130_v14  ;;  %v2156_v50 = vmax.f32 %v6130_v14, 0.0 }
 0x167   : > { %2797 = vrot.lane.b32.xlu0 %v2462_v9, %s5729_s29  ;;  %v2656_v9 = vpop.permute.xlu2 %2655 }
 0x168   : > { %v1875_v31 = vpop.f32.mrf.mxu2 }
 0x169   : > { %v2784_v39 = vpop.permute.xlu1 %2783  ;;  %v6139_v63 = vadd.f32 %v5819_v27, %v1875_v31 }
 0x16a   : > { %5505 = vmatmul.msk.bf16.gmra.mxu3 %vm1096_vm0, %v2784_v39  ;;  %v1557_v45 = vpop.f32.mrf.mxu0  ;;  %v5588_v39 = vld [vmem:[%s5778_s26 + $0xb0] sm:$0xff] }
 0x16b   : > { %v6135_v24 = vadd.f32 %v5819_v27, %v1557_v45  ;;  %8492 = vst [vmem:[#allocation9_spill] sm:$0xff] %v6139_v63  ;;  %v2284_v45 = vmax.f32 %v6139_v63, 0.0  ;;  %v5653_v63 = vld [vmem:[%s5778_s26 + $0x2b8] sm:$0xff] }
 0x16d   : > { %8491 = vst [vmem:[#allocation8_spill] sm:$0xff] %v6135_v24  ;;  %v2157_v61 = vmax.f32 %v6135_v24, 0.0 }
 0x16f   : > { %v2399_v10 = vpack.c.bf16 %v2157_v61, %v2156_v50 }
 0x170   : > { %v1877_v11 = vpop.f32.mrf.mxu2 }
 0x171   : > { %v6142_v2 = vadd.f32 %v5819_v27, %v1877_v11  ;;  %2671 = vrot.lane.b32.xlu0 %v2399_v10, %s5729_s29 }
 0x172   : > { %5441 = vmatmul.msk.bf16.gmra.mxu1 %vm1096_vm0, %v2656_v9  ;;  %v1560_v14 = vpop.f32.mrf.mxu0 }
 0x173   : > { %8493 = vst [vmem:[#allocation10_spill] sm:$0xff] %v6142_v2  ;;  %v2285_v24 = vmax.f32 %v6142_v2, 0.0  ;;  %v6154_v50 = vadd.f32 %v5819_v27, %v1560_v14 }
 0x175   : > { %5386 = vmatmul.msk.bf16.gmra.mxu2 %vm1096_vm0, %v5652_v56  ;;  %v2463_v31 = vpack.c.bf16 %v2285_v24, %v2284_v45  ;;  %5322 = vmatmul.msk.bf16.gmra.mxu0 %vm1096_vm0, %v5588_v39  ;;  %8494 = vst [vmem:[#allocation11_spill] sm:$0xff] %v6154_v50  ;;  %v2158_v9 = vmax.f32 %v6154_v50, 0.0 }
 0x177   : > { %2799 = vrot.lane.b32.xlu2 %v2463_v31, %s5729_s29  ;;  %v2658_v31 = vpop.permute.xlu1 %2657 }
 0x178   : > { %v1880_v61 = vpop.f32.mrf.mxu2 }
 0x179   : > { %v2786_v10 = vpop.permute.xlu0 %2785  ;;  %v6163_v56 = vadd.f32 %v5819_v27, %v1880_v61 }
 0x17a   : > { %5506 = vmatmul.msk.bf16.gmra.mxu3 %vm1096_vm0, %v2786_v10  ;;  %v1562_v11 = vpop.f32.mrf.mxu0  ;;  %v5589_v10 = vld [vmem:[%s5778_s26 + $0xb8] sm:$0xff] }
 0x17b   : > { %v6159_v2 = vadd.f32 %v5819_v27, %v1562_v11  ;;  %8496 = vst [vmem:[#allocation13_spill] sm:$0xff] %v6163_v56  ;;  %v2286_v11 = vmax.f32 %v6163_v56, 0.0  ;;  %v5654_v56 = vld [vmem:[%s5778_s26 + $0x2c0] sm:$0xff] }
 0x17d   : > { %8495 = vst [vmem:[#allocation12_spill] sm:$0xff] %v6159_v2  ;;  %v2159_v24 = vmax.f32 %v6159_v2, 0.0 }
 0x17f   : > { %v2400_v39 = vpack.c.bf16 %v2159_v24, %v2158_v9 }
 0x180   : > { %v1882_v45 = vpop.f32.mrf.mxu2 }
 0x181   : > { %v6166_v14 = vadd.f32 %v5819_v27, %v1882_v45  ;;  %2673 = vrot.lane.b32.xlu2 %v2400_v39, %s5729_s29  ;;  %v2788_v39 = vpop.permute.xlu2 %2787 }
 0x182   : > { %5442 = vmatmul.msk.bf16.gmra.mxu1 %vm1096_vm0, %v2658_v31  ;;  %v1565_v50 = vpop.f32.mrf.mxu0 }
 0x183   : > { %8497 = vst [vmem:[#allocation14_spill] sm:$0xff] %v6166_v14  ;;  %v2287_v2 = vmax.f32 %v6166_v14, 0.0  ;;  %v6178_v9 = vadd.f32 %v5819_v27, %v1565_v50 }
 0x185   : > { %5387 = vmatmul.msk.bf16.gmra.mxu2 %vm1096_vm0, %v5653_v63  ;;  %v2464_v61 = vpack.c.bf16 %v2287_v2, %v2286_v11  ;;  %5323 = vmatmul.msk.bf16.gmra.mxu0 %vm1096_vm0, %v5589_v10  ;;  %8498 = vst [vmem:[#allocation15_spill] sm:$0xff] %v6178_v9  ;;  %v2160_v31 = vmax.f32 %v6178_v9, 0.0 }
 0x187   : > { %2801 = vrot.lane.b32.xlu1 %v2464_v61, %s5729_s29  ;;  %v2660_v61 = vpop.permute.xlu0 %2659 }
 0x188   : > { %v1885_v24 = vpop.f32.mrf.mxu2 }
 0x189   : > { %v6187_v2 = vadd.f32 %v5819_v27, %v1885_v24 }
 0x18a   : > { %5507 = vmatmul.msk.bf16.gmra.mxu3 %vm1096_vm0, %v2788_v39  ;;  %v1567_v45 = vpop.f32.mrf.mxu0  ;;  %v5590_v39 = vld [vmem:[%s5778_s26 + $0xc0] sm:$0xff] }
 0x18b   : > { %v6183_v14 = vadd.f32 %v5819_v27, %v1567_v45  ;;  %8500 = vst [vmem:[#allocation17_spill] sm:$0xff] %v6187_v2  ;;  %v2288_v45 = vmax.f32 %v6187_v2, 0.0 }
 0x18d   : > { %8499 = vst [vmem:[#allocation16_spill] sm:$0xff] %v6183_v14  ;;  %v2161_v63 = vmax.f32 %v6183_v14, 0.0 }
 0x18f   : > { %v2401_v10 = vpack.c.bf16 %v2161_v63, %v2160_v31 }
 0x190   : > { %v1887_v11 = vpop.f32.mrf.mxu2 }
 0x191   : > { %v6190_v50 = vadd.f32 %v5819_v27, %v1887_v11  ;;  %2675 = vrot.lane.b32.xlu1 %v2401_v10, %s5729_s29  ;;  %v6208_v11 = vld [vmem:[%s8414_s2 + $0x1] ss:$0 sm:$0xff] }
 0x192   : > { %5443 = vmatmul.msk.bf16.gmra.mxu1 %vm1096_vm0, %v2660_v61  ;;  %v1570_v9 = vpop.f32.mrf.mxu0 }
 0x193   : > { %8501 = vst [vmem:[#allocation18_spill] sm:$0xff] %v6190_v50  ;;  %v2289_v14 = vmax.f32 %v6190_v50, 0.0  ;;  %v6202_v31 = vadd.f32 %v5819_v27, %v1570_v9 }
 0x195   : > { %5388 = vmatmul.msk.bf16.gmra.mxu2 %vm1096_vm0, %v5654_v56  ;;  %v2465_v24 = vpack.c.bf16 %v2289_v14, %v2288_v45  ;;  %5324 = vmatmul.msk.bf16.gmra.mxu0 %vm1096_vm0, %v5590_v39  ;;  %8502 = vst [vmem:[#allocation19_spill] sm:$0xff] %v6202_v31  ;;  %v2162_v56 = vmax.f32 %v6202_v31, 0.0  ;;  %v2662_v31 = vpop.permute.xlu2 %2661 }
 0x197   : > { %2803 = vrot.lane.b32.xlu0 %v2465_v24, %s5729_s29 }
 0x198   : > { %v1890_v63 = vpop.f32.mrf.mxu2 }
 0x199   : > { %v2790_v10 = vpop.permute.xlu1 %2789  ;;  %v6217_v24 = vadd.f32 %v5819_v27, %v1890_v63  ;;  %v5655_v63 = vld [vmem:[%s5778_s26 + $0x2c8] sm:$0xff] }
 0x19a   : > { %5508 = vmatmul.msk.bf16.gmra.mxu3 %vm1096_vm0, %v2790_v10  ;;  %v1572_v61 = vpop.f32.mrf.mxu0 }
 0x19b   : > { %v6212_v14 = vadd.f32 %v5819_v27, %v1572_v61 }
 0x19d   : > { %8503 = vst [vmem:[#allocation20_spill] sm:$0xff] %v6212_v14  ;;  %v3626_v9 = vpop.f32.mrf.mxu3  ;;  %v2163_v39 = vmax.f32 %v6212_v14, 0.0 }
 0x19e   : > { %v3627_v45 = vadd.f32 %v6208_v11, %v3626_v9 }
 0x19f   : > { %v3306_v10 = vpop.f32.mrf.mxu1  ;;  %v2402_v50 = vpack.c.bf16 %v2163_v39, %v2162_v56 }
 0x1a0   : > { %v4074_v2 = vadd.f32 %v3627_v45, %v5822_v28  ;;  %v3307_v3 = vadd.f32 %v6208_v11, %v3306_v10  ;;  %v1892_v34 = vpop.f32.mrf.mxu2  ;;  %v5591_v28 = vld [vmem:[%s5778_s26 + $0xc8] sm:$0xff]  ;;  %v2290_v45 = vmax.f32 %v6217_v24, 0.0 }
 0x1a1   : > { %v6229_v61 = vadd.f32 %v5819_v27, %v1892_v34  ;;  %2677 = vrot.lane.b32.xlu0 %v2402_v50, %s5729_s29 }
 0x1a2   : > { %v4330_v56 = vpack.c.bf16 %v4074_v2, %v4074_v2  ;;  %v3946_v9 = vadd.f32 %v3307_v3, %v5832_v36  ;;  %5444 = vmatmul.msk.bf16.gmra.mxu1 %vm1096_vm0, %v2662_v31  ;;  %v1575_v39 = vpop.f32.mrf.mxu0 }
 0x1a3   : > { %v2291_v10 = vmax.f32 %v6229_v61, 0.0  ;;  %v6247_v2 = vadd.f32 %v5819_v27, %v1575_v39 }
 0x1a4   : > { %4587 = vst.msk [vmem:[%s6226_s16 + $0x200] sm:$0xf] %vm4458_vm1, %v4330_v56  ;;  %v4202_v14 = vpack.c.bf16 %v3946_v9, %v3946_v9 }
 0x1a5   : > { %5389 = vmatmul.msk.bf16.gmra.mxu2 %vm1096_vm0, %v5655_v63  ;;  %v3628_v34 = vpop.f32.mrf.mxu3  ;;  %v2466_v18 = vpack.c.bf16 %v2291_v10, %v2290_v45  ;;  %5325 = vmatmul.msk.bf16.gmra.mxu0 %vm1096_vm0, %v5591_v28  ;;  %v2164_v45 = vmax.f32 %v6247_v2, 0.0 }
 0x1a6   : > { %4459 = vst.msk [vmem:[%s6226_s16] sm:$0xf] %vm4458_vm1, %v4202_v14  ;;  %v3629_v36 = vadd.f32 %v6208_v11, %v3628_v34 }
 0x1a7   : > { %2805 = vrot.lane.b32.xlu2 %v2466_v18, %s5729_s29  ;;  %v3308_v3 = vpop.f32.mrf.mxu1 }
 0x1a8   : > { %v4075_v50 = vadd.f32 %v3629_v36, %v5825_v30  ;;  %v3309_v31 = vadd.f32 %v6208_v11, %v3308_v3  ;;  %v1895_v63 = vpop.f32.mrf.mxu2 }
 0x1a9   : > { %v2792_v56 = vpop.permute.xlu0 %2791  ;;  %v6264_v34 = vadd.f32 %v5819_v27, %v1895_v63 }
 0x1aa   : > { %v4331_v9 = vpack.c.bf16 %v4075_v50, %v4075_v50  ;;  %v3947_v28 = vadd.f32 %v3309_v31, %v5835_v37  ;;  %5509 = vmatmul.msk.bf16.gmra.mxu3 %vm1096_vm0, %v2792_v56  ;;  %v1577_v14 = vpop.f32.mrf.mxu0 }
 0x1ab   : > { %v6255_v18 = vadd.f32 %v5819_v27, %v1577_v14  ;;  %v5656_v14 = vld [vmem:[%s5778_s26 + $0x2d0] sm:$0xff] }
 0x1ac   : > { %4588 = vst.msk [vmem:[%s6226_s16 + $0x204] sm:$0xf] %vm4458_vm1, %v4331_v9  ;;  %v4203_v30 = vpack.c.bf16 %v3947_v28, %v3947_v28  ;;  %v2664_v9 = vpop.permute.xlu1 %2663 }
 0x1ad   : > { %v3631_v39 = vpop.f32.mrf.mxu3  ;;  %v2165_v10 = vmax.f32 %v6255_v18, 0.0 }
 0x1ae   : > { %4460 = vst.msk [vmem:[%s6226_s16 + $0x4] sm:$0xf] %vm4458_vm1, %v4203_v30  ;;  %v3632_v37 = vadd.f32 %v6208_v11, %v3631_v39  ;;  %v5592_v30 = vld [vmem:[%s5778_s26 + $0xd0] sm:$0xff] }
 0x1af   : > { %v3311_v36 = vpop.f32.mrf.mxu1  ;;  %v2403_v3 = vpack.c.bf16 %v2165_v10, %v2164_v45 }
 0x1b0   : > { %v4076_v50 = vadd.f32 %v3632_v37, %v5843_v44  ;;  %v3312_v31 = vadd.f32 %v6208_v11, %v3311_v36  ;;  %v1897_v56 = vpop.f32.mrf.mxu2  ;;  %v2292_v44 = vmax.f32 %v6264_v34, 0.0 }
 0x1b1   : > { %v6269_v28 = vadd.f32 %v5819_v27, %v1897_v56  ;;  %2679 = vrot.lane.b32.xlu2 %v2403_v3, %s5729_s29 }
 0x1b2   : > { %v4332_v39 = vpack.c.bf16 %v4076_v50, %v4076_v50  ;;  %v3948_v63 = vadd.f32 %v3312_v31, %v5854_v52  ;;  %5445 = vmatmul.msk.bf16.gmra.mxu1 %vm1096_vm0, %v2664_v9  ;;  %v1580_v45 = vpop.f32.mrf.mxu0 }
 0x1b3   : > { %v2293_v10 = vmax.f32 %v6269_v28, 0.0  ;;  %v6287_v50 = vadd.f32 %v5819_v27, %v1580_v45 }
 0x1b4   : > { %4589 = vst.msk [vmem:[%s6226_s16 + $0x208] sm:$0xf] %vm4458_vm1, %v4332_v39  ;;  %v4204_v37 = vpack.c.bf16 %v3948_v63, %v3948_v63  ;;  %v2794_v39 = vpop.permute.xlu2 %2793 }
 0x1b5   : > { %5390 = vmatmul.msk.bf16.gmra.mxu2 %vm1096_vm0, %v5656_v14  ;;  %v3633_v36 = vpop.f32.mrf.mxu3  ;;  %v2467_v56 = vpack.c.bf16 %v2293_v10, %v2292_v44  ;;  %5326 = vmatmul.msk.bf16.gmra.mxu0 %vm1096_vm0, %v5592_v30  ;;  %v2166_v10 = vmax.f32 %v6287_v50, 0.0 }
 0x1b6   : > { %4461 = vst.msk [vmem:[%s6226_s16 + $0x8] sm:$0xf] %vm4458_vm1, %v4204_v37  ;;  %v3634_v52 = vadd.f32 %v6208_v11, %v3633_v36 }
 0x1b7   : > { %2807 = vrot.lane.b32.xlu1 %v2467_v56, %s5729_s29  ;;  %v3313_v3 = vpop.f32.mrf.mxu1 }
 0x1b8   : > { %v4077_v31 = vadd.f32 %v3634_v52, %v5847_v46  ;;  %v3314_v9 = vadd.f32 %v6208_v11, %v3313_v3  ;;  %v1900_v14 = vpop.f32.mrf.mxu2 }
 0x1b9   : > { %v6304_v56 = vadd.f32 %v5819_v27, %v1900_v14 }
 0x1ba   : > { %v4333_v63 = vpack.c.bf16 %v4077_v31, %v4077_v31  ;;  %v3949_v30 = vadd.f32 %v3314_v9, %v5857_v53  ;;  %5510 = vmatmul.msk.bf16.gmra.mxu3 %vm1096_vm0, %v2794_v39  ;;  %v1582_v44 = vpop.f32.mrf.mxu0 }
 0x1bb   : > { %v6295_v37 = vadd.f32 %v5819_v27, %v1582_v44  ;;  %v5657_v44 = vld [vmem:[%s5778_s26 + $0x2d8] sm:$0xff] }
 0x1bc   : > { %4590 = vst.msk [vmem:[%s6226_s16 + $0x20c] sm:$0xf] %vm4458_vm1, %v4333_v63  ;;  %v4205_v46 = vpack.c.bf16 %v3949_v30, %v3949_v30  ;;  %v2666_v63 = vpop.permute.xlu0 %2665 }
 0x1bd   : > { %v3636_v45 = vpop.f32.mrf.mxu3  ;;  %v2167_v36 = vmax.f32 %v6295_v37, 0.0 }
 0x1be   : > { %4462 = vst.msk [vmem:[%s6226_s16 + $0xc] sm:$0xf] %vm4458_vm1, %v4205_v46  ;;  %v3637_v53 = vadd.f32 %v6208_v11, %v3636_v45  ;;  %v5593_v46 = vld [vmem:[%s5778_s26 + $0xd8] sm:$0xff] }
 0x1bf   : > { %v3316_v52 = vpop.f32.mrf.mxu1  ;;  %v2404_v3 = vpack.c.bf16 %v2167_v36, %v2166_v10 }
 0x1c0   : > { %v4078_v31 = vadd.f32 %v3637_v53, %v5865_v60  ;;  %v3317_v9 = vadd.f32 %v6208_v11, %v3316_v52  ;;  %v1902_v39 = vpop.f32.mrf.mxu2  ;;  %v2294_v60 = vmax.f32 %v6304_v56, 0.0 }
 0x1c1   : > { %v6309_v30 = vadd.f32 %v5819_v27, %v1902_v39  ;;  %2681 = vrot.lane.b32.xlu1 %v2404_v3, %s5729_s29 }
 0x1c2   : > { %v4334_v45 = vpack.c.bf16 %v4078_v31, %v4078_v31  ;;  %v3950_v14 = vadd.f32 %v3317_v9, %v5876_v4  ;;  %5446 = vmatmul.msk.bf16.gmra.mxu1 %vm1096_vm0, %v2666_v63  ;;  %v1585_v10 = vpop.f32.mrf.mxu0 }
 0x1c3   : > { %v2295_v36 = vmax.f32 %v6309_v30, 0.0  ;;  %v6327_v31 = vadd.f32 %v5819_v27, %v1585_v10 }
 0x1c4   : > { %4591 = vst.msk [vmem:[%s6226_s16 + $0x210] sm:$0xf] %vm4458_vm1, %v4334_v45  ;;  %v4206_v53 = vpack.c.bf16 %v3950_v14, %v3950_v14 }
 0x1c5   : > { %5391 = vmatmul.msk.bf16.gmra.mxu2 %vm1096_vm0, %v5657_v44  ;;  %v3638_v52 = vpop.f32.mrf.mxu3  ;;  %v2468_v39 = vpack.c.bf16 %v2295_v36, %v2294_v60  ;;  %5327 = vmatmul.msk.bf16.gmra.mxu0 %vm1096_vm0, %v5593_v46  ;;  %v2168_v36 = vmax.f32 %v6327_v31, 0.0 }
 0x1c6   : > { %4463 = vst.msk [vmem:[%s6226_s16 + $0x10] sm:$0xf] %vm4458_vm1, %v4206_v53  ;;  %v3639_v4 = vadd.f32 %v6208_v11, %v3638_v52 }
 0x1c7   : > { %2809 = vrot.lane.b32.xlu0 %v2468_v39, %s5729_s29  ;;  %v3318_v3 = vpop.f32.mrf.mxu1 }
 0x1c8   : > { %v4079_v9 = vadd.f32 %v3639_v4, %v5869_v62  ;;  %v3319_v63 = vadd.f32 %v6208_v11, %v3318_v3  ;;  %v1905_v44 = vpop.f32.mrf.mxu2 }
 0x1c9   : > { %v2796_v45 = vpop.permute.xlu1 %2795  ;;  %v6344_v39 = vadd.f32 %v5819_v27, %v1905_v44  ;;  %v5594_v44 = vld [vmem:[%s5778_s26 + $0xe0] sm:$0xff] }
 0x1ca   : > { %v4335_v14 = vpack.c.bf16 %v4079_v9, %v4079_v9  ;;  %v3951_v46 = vadd.f32 %v3319_v63, %v5879_v5  ;;  %5511 = vmatmul.msk.bf16.gmra.mxu3 %vm1096_vm0, %v2796_v45  ;;  %v1587_v60 = vpop.f32.mrf.mxu0 }
 0x1cb   : > { %v6335_v53 = vadd.f32 %v5819_v27, %v1587_v60  ;;  %v5658_v27 = vld [vmem:[%s5778_s26 + $0x2e0] sm:$0xff] }
 0x1cc   : > { %4592 = vst.msk [vmem:[%s6226_s16 + $0x214] sm:$0xf] %vm4458_vm1, %v4335_v14  ;;  %v4207_v10 = vpack.c.bf16 %v3951_v46, %v3951_v46  ;;  %v2668_v14 = vpop.permute.xlu2 %2667  ;;  %v6351_v46 = vld [vmem:[%s8414_s2] ss:$0 sm:$0xff] }
 0x1cd   : > { %v3641_v62 = vpop.f32.mrf.mxu3  ;;  %v2169_v52 = vmax.f32 %v6335_v53, 0.0 }
 0x1ce   : > { %4464 = vst.msk [vmem:[%s6226_s16 + $0x14] sm:$0xf] %vm4458_vm1, %v4207_v10  ;;  %v3642_v5 = vadd.f32 %v6208_v11, %v3641_v62  ;;  %v2296_v62 = vmax.f32 %v6344_v39, 0.0 }
 0x1cf   : > { %v3321_v4 = vpop.f32.mrf.mxu1  ;;  %v2405_v3 = vpack.c.bf16 %v2169_v52, %v2168_v36 }
 0x1d0   : > { %v4080_v9 = vadd.f32 %v3642_v5, %v5895_v16  ;;  %v3322_v63 = vadd.f32 %v6208_v11, %v3321_v4  ;;  %v1907_v45 = vpop.f32.mrf.mxu2 }
 0x1d1   : > { %v6354_v60 = vadd.f32 %v6351_v46, %v1907_v45  ;;  %2683 = vrot.lane.b32.xlu0 %v2405_v3, %s5729_s29 }
 0x1d2   : > { %v4336_v36 = vpack.c.bf16 %v4080_v9, %v4080_v9  ;;  %v3952_v16 = vadd.f32 %v3322_v63, %v5885_v7  ;;  %5447 = vmatmul.msk.bf16.gmra.mxu1 %vm1096_vm0, %v2668_v14  ;;  %v1590_v10 = vpop.f32.mrf.mxu0 }
 0x1d3   : > { %v2297_v52 = vmax.f32 %v6354_v60, 0.0  ;;  %v6372_v9 = vadd.f32 %v6351_v46, %v1590_v10 }
 0x1d4   : > { %4593 = vst.msk [vmem:[%s6226_s16 + $0x218] sm:$0xf] %vm4458_vm1, %v4336_v36  ;;  %v4208_v5 = vpack.c.bf16 %v3952_v16, %v3952_v16 }
 0x1d5   : > { %5392 = vmatmul.msk.bf16.gmra.mxu2 %vm1096_vm0, %v5658_v27  ;;  %v3643_v4 = vpop.f32.mrf.mxu3  ;;  %v2469_v45 = vpack.c.bf16 %v2297_v52, %v2296_v62  ;;  %5328 = vmatmul.msk.bf16.gmra.mxu0 %vm1096_vm0, %v5594_v44  ;;  %v2170_v52 = vmax.f32 %v6372_v9, 0.0 }
 0x1d6   : > { %4465 = vst.msk [vmem:[%s6226_s16 + $0x18] sm:$0xf] %vm4458_vm1, %v4208_v5  ;;  %v3644_v7 = vadd.f32 %v6208_v11, %v3643_v4 }
 0x1d7   : > { %2811 = vrot.lane.b32.xlu2 %v2469_v45, %s5729_s29  ;;  %v3323_v3 = vpop.f32.mrf.mxu1 }
 0x1d8   : > { %v4081_v63 = vadd.f32 %v3644_v7, %v5899_v19  ;;  %v3324_v14 = vadd.f32 %v6208_v11, %v3323_v3  ;;  %v1910_v27 = vpop.f32.mrf.mxu2 }
 0x1d9   : > { %v2798_v36 = vpop.permute.xlu0 %2797  ;;  %v6389_v45 = vadd.f32 %v6351_v46, %v1910_v27 }
 0x1da   : > { %v4337_v16 = vpack.c.bf16 %v4081_v63, %v4081_v63  ;;  %v3953_v44 = vadd.f32 %v3324_v14, %v5891_v13  ;;  %5512 = vmatmul.msk.bf16.gmra.mxu3 %vm1096_vm0, %v2798_v36  ;;  %v1592_v62 = vpop.f32.mrf.mxu0 }
 0x1db   : > { %v6380_v5 = vadd.f32 %v6351_v46, %v1592_v62  ;;  %v5659_v62 = vld [vmem:[%s5778_s26 + $0x2e8] sm:$0xff] }
 0x1dc   : > { %4594 = vst.msk [vmem:[%s6226_s16 + $0x21c] sm:$0xf] %vm4458_vm1, %v4337_v16  ;;  %v4209_v19 = vpack.c.bf16 %v3953_v44, %v3953_v44  ;;  %v2670_v16 = vpop.permute.xlu1 %2669 }
 0x1dd   : > { %v3646_v10 = vpop.f32.mrf.mxu3  ;;  %v2171_v4 = vmax.f32 %v6380_v5, 0.0 }
 0x1de   : > { %4466 = vst.msk [vmem:[%s6226_s16 + $0x1c] sm:$0xf] %vm4458_vm1, %v4209_v19  ;;  %v3647_v13 = vadd.f32 %v6208_v11, %v3646_v10  ;;  %v5595_v19 = vld [vmem:[%s5778_s26 + $0xe8] sm:$0xff] }
 0x1df   : > { %v3326_v7 = vpop.f32.mrf.mxu1  ;;  %v2406_v3 = vpack.c.bf16 %v2171_v4, %v2170_v52 }
 0x1e0   : > { %v4082_v63 = vadd.f32 %v3647_v13, %v5918_v35  ;;  %v3327_v14 = vadd.f32 %v6208_v11, %v3326_v7  ;;  %v1912_v36 = vpop.f32.mrf.mxu2  ;;  %v2298_v35 = vmax.f32 %v6389_v45, 0.0 }
 0x1e1   : > { %v6394_v44 = vadd.f32 %v6351_v46, %v1912_v36  ;;  %2685 = vrot.lane.b32.xlu2 %v2406_v3, %s5729_s29 }
 0x1e2   : > { %v4338_v10 = vpack.c.bf16 %v4082_v63, %v4082_v63  ;;  %v3954_v27 = vadd.f32 %v3327_v14, %v5910_v26  ;;  %5448 = vmatmul.msk.bf16.gmra.mxu1 %vm1096_vm0, %v2670_v16  ;;  %v1595_v52 = vpop.f32.mrf.mxu0 }
 0x1e3   : > { %v2299_v4 = vmax.f32 %v6394_v44, 0.0  ;;  %v6412_v63 = vadd.f32 %v6351_v46, %v1595_v52 }
 0x1e4   : > { %4595 = vst.msk [vmem:[%s6226_s16 + $0x220] sm:$0xf] %vm4458_vm1, %v4338_v10  ;;  %v4210_v13 = vpack.c.bf16 %v3954_v27, %v3954_v27  ;;  %v2800_v10 = vpop.permute.xlu2 %2799 }
 0x1e5   : > { %5393 = vmatmul.msk.bf16.gmra.mxu2 %vm1096_vm0, %v5659_v62  ;;  %v3648_v7 = vpop.f32.mrf.mxu3  ;;  %v2470_v36 = vpack.c.bf16 %v2299_v4, %v2298_v35  ;;  %5329 = vmatmul.msk.bf16.gmra.mxu0 %vm1096_vm0, %v5595_v19  ;;  %v2172_v4 = vmax.f32 %v6412_v63, 0.0 }
 0x1e6   : > { %4467 = vst.msk [vmem:[%s6226_s16 + $0x20] sm:$0xf] %vm4458_vm1, %v4210_v13  ;;  %v3649_v26 = vadd.f32 %v6208_v11, %v3648_v7 }
 0x1e7   : > { %2813 = vrot.lane.b32.xlu1 %v2470_v36, %s5729_s29  ;;  %v3328_v3 = vpop.f32.mrf.mxu1 }
 0x1e8   : > { %v4083_v14 = vadd.f32 %v3649_v26, %v5921_v40  ;;  %v3329_v16 = vadd.f32 %v6208_v11, %v3328_v3  ;;  %v1915_v62 = vpop.f32.mrf.mxu2 }
 0x1e9   : > { %v6429_v36 = vadd.f32 %v6351_v46, %v1915_v62 }
 0x1ea   : > { %v4339_v27 = vpack.c.bf16 %v4083_v14, %v4083_v14  ;;  %v3955_v19 = vadd.f32 %v3329_v16, %v5914_v33  ;;  %5513 = vmatmul.msk.bf16.gmra.mxu3 %vm1096_vm0, %v2800_v10  ;;  %v1597_v35 = vpop.f32.mrf.mxu0 }
 0x1eb   : > { %v6420_v13 = vadd.f32 %v6351_v46, %v1597_v35  ;;  %v5660_v35 = vld [vmem:[%s5778_s26 + $0x2f0] sm:$0xff] }
 0x1ec   : > { %4596 = vst.msk [vmem:[%s6226_s16 + $0x224] sm:$0xf] %vm4458_vm1, %v4339_v27  ;;  %v4211_v40 = vpack.c.bf16 %v3955_v19, %v3955_v19  ;;  %v2672_v27 = vpop.permute.xlu0 %2671 }
 0x1ed   : > { %v3651_v52 = vpop.f32.mrf.mxu3  ;;  %v2173_v7 = vmax.f32 %v6420_v13, 0.0 }
 0x1ee   : > { %4468 = vst.msk [vmem:[%s6226_s16 + $0x24] sm:$0xf] %vm4458_vm1, %v4211_v40  ;;  %v3652_v33 = vadd.f32 %v6208_v11, %v3651_v52  ;;  %v5596_v40 = vld [vmem:[%s5778_s26 + $0xf0] sm:$0xff] }
 0x1ef   : > { %v3331_v26 = vpop.f32.mrf.mxu1  ;;  %v2407_v3 = vpack.c.bf16 %v2173_v7, %v2172_v4 }
 0x1f0   : > { %v4084_v14 = vadd.f32 %v3652_v33, %v5940_v57  ;;  %v3332_v16 = vadd.f32 %v6208_v11, %v3331_v26  ;;  %v1917_v10 = vpop.f32.mrf.mxu2  ;;  %v2300_v57 = vmax.f32 %v6429_v36, 0.0 }
 0x1f1   : > { %v6434_v19 = vadd.f32 %v6351_v46, %v1917_v10  ;;  %2687 = vrot.lane.b32.xlu1 %v2407_v3, %s5729_s29 }
 0x1f2   : > { %v4340_v52 = vpack.c.bf16 %v4084_v14, %v4084_v14  ;;  %v3956_v62 = vadd.f32 %v3332_v16, %v5932_v49  ;;  %5449 = vmatmul.msk.bf16.gmra.mxu1 %vm1096_vm0, %v2672_v27  ;;  %v1600_v4 = vpop.f32.mrf.mxu0 }
 0x1f3   : > { %v2301_v7 = vmax.f32 %v6434_v19, 0.0  ;;  %v6452_v14 = vadd.f32 %v6351_v46, %v1600_v4 }
 0x1f4   : > { %4597 = vst.msk [vmem:[%s6226_s16 + $0x228] sm:$0xf] %vm4458_vm1, %v4340_v52  ;;  %v4212_v33 = vpack.c.bf16 %v3956_v62, %v3956_v62 }
 0x1f5   : > { %5394 = vmatmul.msk.bf16.gmra.mxu2 %vm1096_vm0, %v5660_v35  ;;  %v3653_v26 = vpop.f32.mrf.mxu3  ;;  %v2471_v10 = vpack.c.bf16 %v2301_v7, %v2300_v57  ;;  %5330 = vmatmul.msk.bf16.gmra.mxu0 %vm1096_vm0, %v5596_v40  ;;  %v2174_v7 = vmax.f32 %v6452_v14, 0.0 }
 0x1f6   : > { %4469 = vst.msk [vmem:[%s6226_s16 + $0x28] sm:$0xf] %vm4458_vm1, %v4212_v33  ;;  %v3654_v49 = vadd.f32 %v6208_v11, %v3653_v26 }
 0x1f7   : > { %2815 = vrot.lane.b32.xlu0 %v2471_v10, %s5729_s29  ;;  %v3333_v3 = vpop.f32.mrf.mxu1 }
 0x1f8   : > { %v4085_v16 = vadd.f32 %v3654_v49, %v5949_v0  ;;  %v3334_v27 = vadd.f32 %v6208_v11, %v3333_v3  ;;  %v1920_v35 = vpop.f32.mrf.mxu2 }
 0x1f9   : > { %v2802_v52 = vpop.permute.xlu1 %2801  ;;  %v6469_v10 = vadd.f32 %v6351_v46, %v1920_v35 }
 0x1fa   : > { %v4341_v62 = vpack.c.bf16 %v4085_v16, %v4085_v16  ;;  %v3957_v40 = vadd.f32 %v3334_v27, %v5936_v55  ;;  %5514 = vmatmul.msk.bf16.gmra.mxu3 %vm1096_vm0, %v2802_v52  ;;  %v1602_v57 = vpop.f32.mrf.mxu0 }
 0x1fb   : > { %v6460_v33 = vadd.f32 %v6351_v46, %v1602_v57  ;;  %v5661_v57 = vld [vmem:[%s5778_s26 + $0x2f8] sm:$0xff] }
 0x1fc   : > { %4598 = vst.msk [vmem:[%s6226_s16 + $0x22c] sm:$0xf] %vm4458_vm1, %v4341_v62  ;;  %v4213_v0 = vpack.c.bf16 %v3957_v40, %v3957_v40  ;;  %v2674_v62 = vpop.permute.xlu2 %2673 }
 0x1fd   : > { %v3656_v4 = vpop.f32.mrf.mxu3  ;;  %v2175_v26 = vmax.f32 %v6460_v33, 0.0 }
 0x1fe   : > { %4470 = vst.msk [vmem:[%s6226_s16 + $0x2c] sm:$0xf] %vm4458_vm1, %v4213_v0  ;;  %v3657_v55 = vadd.f32 %v6208_v11, %v3656_v4  ;;  %v5597_v0 = vld [vmem:[%s5778_s26 + $0xf8] sm:$0xff] }
 0x1ff   : > { %v3336_v49 = vpop.f32.mrf.mxu1  ;;  %v2408_v3 = vpack.c.bf16 %v2175_v26, %v2174_v7 }
 0x200   : > { %v4086_v16 = vadd.f32 %v3657_v55, %v5974_v23  ;;  %v3337_v27 = vadd.f32 %v6208_v11, %v3336_v49  ;;  %v1922_v52 = vpop.f32.mrf.mxu2  ;;  %v2302_v23 = vmax.f32 %v6469_v10, 0.0 }
 0x201   : > { %v6474_v40 = vadd.f32 %v6351_v46, %v1922_v52  ;;  %2689 = vrot.lane.b32.xlu0 %v2408_v3, %s5729_s29 }
 0x202   : > { %v4342_v4 = vpack.c.bf16 %v4086_v16, %v4086_v16  ;;  %v3958_v35 = vadd.f32 %v3337_v27, %v5966_v15  ;;  %5450 = vmatmul.msk.bf16.gmra.mxu1 %vm1096_vm0, %v2674_v62  ;;  %v1605_v7 = vpop.f32.mrf.mxu0 }
 0x203   : > { %v2303_v26 = vmax.f32 %v6474_v40, 0.0  ;;  %v6492_v16 = vadd.f32 %v6351_v46, %v1605_v7 }
 0x204   : > { %4599 = vst.msk [vmem:[%s6226_s16 + $0x230] sm:$0xf] %vm4458_vm1, %v4342_v4  ;;  %v4214_v55 = vpack.c.bf16 %v3958_v35, %v3958_v35 }
 0x205   : > { %5395 = vmatmul.msk.bf16.gmra.mxu2 %vm1096_vm0, %v5661_v57  ;;  %v3658_v49 = vpop.f32.mrf.mxu3  ;;  %v2472_v52 = vpack.c.bf16 %v2303_v26, %v2302_v23  ;;  %5331 = vmatmul.msk.bf16.gmra.mxu0 %vm1096_vm0, %v5597_v0  ;;  %v2176_v26 = vmax.f32 %v6492_v16, 0.0 }
 0x206   : > { %4471 = vst.msk [vmem:[%s6226_s16 + $0x30] sm:$0xf] %vm4458_vm1, %v4214_v55  ;;  %v3659_v15 = vadd.f32 %v6208_v11, %v3658_v49 }
 0x207   : > { %2817 = vrot.lane.b32.xlu2 %v2472_v52, %s5729_s29  ;;  %v3338_v3 = vpop.f32.mrf.mxu1 }
 0x208   : > { %v4087_v27 = vadd.f32 %v3659_v15, %v5977_v29  ;;  %v3339_v62 = vadd.f32 %v6208_v11, %v3338_v3  ;;  %v1925_v57 = vpop.f32.mrf.mxu2 }
 0x209   : > { %v2804_v4 = vpop.permute.xlu0 %2803  ;;  %v6509_v52 = vadd.f32 %v6351_v46, %v1925_v57 }
 0x20a   : > { %v4343_v35 = vpack.c.bf16 %v4087_v27, %v4087_v27  ;;  %v3959_v0 = vadd.f32 %v3339_v62, %v5970_v21  ;;  %5515 = vmatmul.msk.bf16.gmra.mxu3 %vm1096_vm0, %v2804_v4  ;;  %v1607_v23 = vpop.f32.mrf.mxu0 }
 0x20b   : > { %v6500_v55 = vadd.f32 %v6351_v46, %v1607_v23  ;;  %v5662_v23 = vld [vmem:[%s5778_s26 + $0x300] sm:$0xff] }
 0x20c   : > { %4600 = vst.msk [vmem:[%s6226_s16 + $0x234] sm:$0xf] %vm4458_vm1, %v4343_v35  ;;  %v4215_v29 = vpack.c.bf16 %v3959_v0, %v3959_v0  ;;  %v2676_v35 = vpop.permute.xlu1 %2675 }
 0x20d   : > { %v3661_v7 = vpop.f32.mrf.mxu3  ;;  %v2177_v49 = vmax.f32 %v6500_v55, 0.0 }
 0x20e   : > { %4472 = vst.msk [vmem:[%s6226_s16 + $0x34] sm:$0xf] %vm4458_vm1, %v4215_v29  ;;  %v3662_v21 = vadd.f32 %v6208_v11, %v3661_v7  ;;  %v5598_v29 = vld [vmem:[%s5778_s26 + $0x100] sm:$0xff] }
 0x20f   : > { %v3341_v15 = vpop.f32.mrf.mxu1  ;;  %v2409_v3 = vpack.c.bf16 %v2177_v49, %v2176_v26 }
 0x210   : > { %v4088_v27 = vadd.f32 %v3662_v21, %v5996_v51  ;;  %v3342_v62 = vadd.f32 %v6208_v11, %v3341_v15  ;;  %v1927_v4 = vpop.f32.mrf.mxu2  ;;  %v2304_v51 = vmax.f32 %v6509_v52, 0.0 }
 0x211   : > { %v6514_v0 = vadd.f32 %v6351_v46, %v1927_v4  ;;  %2691 = vrot.lane.b32.xlu2 %v2409_v3, %s5729_s29 }
 0x212   : > { %v4344_v7 = vpack.c.bf16 %v4088_v27, %v4088_v27  ;;  %v3960_v57 = vadd.f32 %v3342_v62, %v5988_v42  ;;  %5451 = vmatmul.msk.bf16.gmra.mxu1 %vm1096_vm0, %v2676_v35  ;;  %v1610_v26 = vpop.f32.mrf.mxu0 }
 0x213   : > { %v2305_v49 = vmax.f32 %v6514_v0, 0.0  ;;  %v6532_v27 = vadd.f32 %v6351_v46, %v1610_v26 }
 0x214   : > { %4601 = vst.msk [vmem:[%s6226_s16 + $0x238] sm:$0xf] %vm4458_vm1, %v4344_v7  ;;  %v4216_v21 = vpack.c.bf16 %v3960_v57, %v3960_v57  ;;  %v2806_v7 = vpop.permute.xlu2 %2805 }
 0x215   : > { %5396 = vmatmul.msk.bf16.gmra.mxu2 %vm1096_vm0, %v5662_v23  ;;  %v3663_v15 = vpop.f32.mrf.mxu3  ;;  %v2473_v4 = vpack.c.bf16 %v2305_v49, %v2304_v51  ;;  %5332 = vmatmul.msk.bf16.gmra.mxu0 %vm1096_vm0, %v5598_v29  ;;  %v2178_v49 = vmax.f32 %v6532_v27, 0.0 }
 0x216   : > { %4473 = vst.msk [vmem:[%s6226_s16 + $0x38] sm:$0xf] %vm4458_vm1, %v4216_v21  ;;  %v3664_v42 = vadd.f32 %v6208_v11, %v3663_v15 }
 0x217   : > { %2819 = vrot.lane.b32.xlu1 %v2473_v4, %s5729_s29  ;;  %v3343_v3 = vpop.f32.mrf.mxu1 }
 0x218   : > { %v4089_v62 = vadd.f32 %v3664_v42, %v5999_v58  ;;  %v3344_v35 = vadd.f32 %v6208_v11, %v3343_v3  ;;  %v1930_v23 = vpop.f32.mrf.mxu2 }
 0x219   : > { %v6549_v4 = vadd.f32 %v6351_v46, %v1930_v23 }
 0x21a   : > { %v4345_v57 = vpack.c.bf16 %v4089_v62, %v4089_v62  ;;  %v3961_v29 = vadd.f32 %v3344_v35, %v5992_v48  ;;  %5516 = vmatmul.msk.bf16.gmra.mxu3 %vm1096_vm0, %v2806_v7  ;;  %v1612_v51 = vpop.f32.mrf.mxu0 }
 0x21b   : > { %v6540_v21 = vadd.f32 %v6351_v46, %v1612_v51  ;;  %v5663_v51 = vld [vmem:[%s5778_s26 + $0x308] sm:$0xff] }
 0x21c   : > { %4602 = vst.msk [vmem:[%s6226_s16 + $0x23c] sm:$0xf] %vm4458_vm1, %v4345_v57  ;;  %v4217_v58 = vpack.c.bf16 %v3961_v29, %v3961_v29  ;;  %v2678_v57 = vpop.permute.xlu0 %2677 }
 0x21d   : > { %v3666_v26 = vpop.f32.mrf.mxu3  ;;  %v2179_v15 = vmax.f32 %v6540_v21, 0.0 }
 0x21e   : > { %4474 = vst.msk [vmem:[%s6226_s16 + $0x3c] sm:$0xf] %vm4458_vm1, %v4217_v58  ;;  %v3667_v48 = vadd.f32 %v6208_v11, %v3666_v26  ;;  %v5599_v58 = vld [vmem:[%s5778_s26 + $0x108] sm:$0xff] }
 0x21f   : > { %v3346_v42 = vpop.f32.mrf.mxu1  ;;  %v2410_v3 = vpack.c.bf16 %v2179_v15, %v2178_v49 }
 0x220   : > { %v4090_v62 = vadd.f32 %v3667_v48, %v6019_v17  ;;  %v3347_v35 = vadd.f32 %v6208_v11, %v3346_v42  ;;  %v1932_v7 = vpop.f32.mrf.mxu2  ;;  %v2306_v17 = vmax.f32 %v6549_v4, 0.0 }
 0x221   : > { %v6554_v29 = vadd.f32 %v6351_v46, %v1932_v7  ;;  %2693 = vrot.lane.b32.xlu1 %v2410_v3, %s5729_s29 }
 0x222   : > { %v4346_v26 = vpack.c.bf16 %v4090_v62, %v4090_v62  ;;  %v3962_v23 = vadd.f32 %v3347_v35, %v6010_v6  ;;  %5452 = vmatmul.msk.bf16.gmra.mxu1 %vm1096_vm0, %v2678_v57  ;;  %v1615_v49 = vpop.f32.mrf.mxu0 }
 0x223   : > { %v2307_v15 = vmax.f32 %v6554_v29, 0.0  ;;  %v6572_v62 = vadd.f32 %v6351_v46, %v1615_v49 }
 0x224   : > { %4603 = vst.msk [vmem:[%s6226_s16 + $0x240] sm:$0xf] %vm4458_vm1, %v4346_v26  ;;  %v4218_v48 = vpack.c.bf16 %v3962_v23, %v3962_v23 }
 0x225   : > { %5397 = vmatmul.msk.bf16.gmra.mxu2 %vm1096_vm0, %v5663_v51  ;;  %v3668_v42 = vpop.f32.mrf.mxu3  ;;  %v2474_v7 = vpack.c.bf16 %v2307_v15, %v2306_v17  ;;  %5333 = vmatmul.msk.bf16.gmra.mxu0 %vm1096_vm0, %v5599_v58  ;;  %v2180_v15 = vmax.f32 %v6572_v62, 0.0 }
 0x226   : > { %4475 = vst.msk [vmem:[%s6226_s16 + $0x40] sm:$0xf] %vm4458_vm1, %v4218_v48  ;;  %v3669_v6 = vadd.f32 %v6208_v11, %v3668_v42 }
 0x227   : > { %2821 = vrot.lane.b32.xlu0 %v2474_v7, %s5729_s29  ;;  %v3348_v3 = vpop.f32.mrf.mxu1 }
 0x228   : > { %v4091_v35 = vadd.f32 %v3669_v6, %v6022_v22  ;;  %v3349_v57 = vadd.f32 %v6208_v11, %v3348_v3  ;;  %v1935_v51 = vpop.f32.mrf.mxu2 }
 0x229   : > { %v2808_v26 = vpop.permute.xlu1 %2807  ;;  %v6589_v7 = vadd.f32 %v6351_v46, %v1935_v51 }
 0x22a   : > { %v4347_v23 = vpack.c.bf16 %v4091_v35, %v4091_v35  ;;  %v3963_v58 = vadd.f32 %v3349_v57, %v6015_v12  ;;  %5517 = vmatmul.msk.bf16.gmra.mxu3 %vm1096_vm0, %v2808_v26  ;;  %v1617_v17 = vpop.f32.mrf.mxu0 }
 0x22b   : > { %v6580_v48 = vadd.f32 %v6351_v46, %v1617_v17  ;;  %v5664_v17 = vld [vmem:[%s5778_s26 + $0x310] sm:$0xff] }
 0x22c   : > { %4604 = vst.msk [vmem:[%s6226_s16 + $0x244] sm:$0xf] %vm4458_vm1, %v4347_v23  ;;  %v4219_v22 = vpack.c.bf16 %v3963_v58, %v3963_v58  ;;  %v2680_v23 = vpop.permute.xlu2 %2679 }
 0x22d   : > { %v3671_v49 = vpop.f32.mrf.mxu3  ;;  %v2181_v42 = vmax.f32 %v6580_v48, 0.0 }
 0x22e   : > { %4476 = vst.msk [vmem:[%s6226_s16 + $0x44] sm:$0xf] %vm4458_vm1, %v4219_v22  ;;  %v3672_v12 = vadd.f32 %v6208_v11, %v3671_v49  ;;  %v5600_v22 = vld [vmem:[%s5778_s26 + $0x110] sm:$0xff] }
 0x22f   : > { %v3351_v6 = vpop.f32.mrf.mxu1  ;;  %v2411_v3 = vpack.c.bf16 %v2181_v42, %v2180_v15 }
 0x230   : > { %v4092_v35 = vadd.f32 %v3672_v12, %v6043_v59  ;;  %v3352_v57 = vadd.f32 %v6208_v11, %v3351_v6  ;;  %v1937_v26 = vpop.f32.mrf.mxu2  ;;  %v2308_v59 = vmax.f32 %v6589_v7, 0.0 }
 0x231   : > { %v6594_v58 = vadd.f32 %v6351_v46, %v1937_v26  ;;  %2695 = vrot.lane.b32.xlu0 %v2411_v3, %s5729_s29 }
 0x232   : > { %v4348_v49 = vpack.c.bf16 %v4092_v35, %v4092_v35  ;;  %v3964_v51 = vadd.f32 %v3352_v57, %v6034_v41  ;;  %5453 = vmatmul.msk.bf16.gmra.mxu1 %vm1096_vm0, %v2680_v23  ;;  %v1620_v15 = vpop.f32.mrf.mxu0 }
 0x233   : > { %v2309_v42 = vmax.f32 %v6594_v58, 0.0  ;;  %v6612_v35 = vadd.f32 %v6351_v46, %v1620_v15 }
 0x234   : > { %4605 = vst.msk [vmem:[%s6226_s16 + $0x248] sm:$0xf] %vm4458_vm1, %v4348_v49  ;;  %v4220_v12 = vpack.c.bf16 %v3964_v51, %v3964_v51 }
 0x235   : > { %5398 = vmatmul.msk.bf16.gmra.mxu2 %vm1096_vm0, %v5664_v17  ;;  %v3673_v6 = vpop.f32.mrf.mxu3  ;;  %v2475_v26 = vpack.c.bf16 %v2309_v42, %v2308_v59  ;;  %5334 = vmatmul.msk.bf16.gmra.mxu0 %vm1096_vm0, %v5600_v22  ;;  %v2182_v42 = vmax.f32 %v6612_v35, 0.0 }
 0x236   : > { %4477 = vst.msk [vmem:[%s6226_s16 + $0x48] sm:$0xf] %vm4458_vm1, %v4220_v12  ;;  %v3674_v41 = vadd.f32 %v6208_v11, %v3673_v6 }
 0x237   : > { %2823 = vrot.lane.b32.xlu2 %v2475_v26, %s5729_s29  ;;  %v3353_v3 = vpop.f32.mrf.mxu1 }
 0x238   : > { %v4093_v57 = vadd.f32 %v3674_v41, %v6046_v1  ;;  %v3354_v23 = vadd.f32 %v6208_v11, %v3353_v3  ;;  %v1940_v17 = vpop.f32.mrf.mxu2 }
 0x239   : > { %v2810_v49 = vpop.permute.xlu0 %2809  ;;  %v6629_v26 = vadd.f32 %v6351_v46, %v1940_v17 }
 0x23a   : > { %v4349_v51 = vpack.c.bf16 %v4093_v57, %v4093_v57  ;;  %v3965_v22 = vadd.f32 %v3354_v23, %v6039_v54  ;;  %5518 = vmatmul.msk.bf16.gmra.mxu3 %vm1096_vm0, %v2810_v49  ;;  %v1622_v59 = vpop.f32.mrf.mxu0 }
 0x23b   : > { %v6620_v12 = vadd.f32 %v6351_v46, %v1622_v59  ;;  %v5665_v59 = vld [vmem:[%s5778_s26 + $0x318] sm:$0xff] }
 0x23c   : > { %4606 = vst.msk [vmem:[%s6226_s16 + $0x24c] sm:$0xf] %vm4458_vm1, %v4349_v51  ;;  %v4221_v1 = vpack.c.bf16 %v3965_v22, %v3965_v22  ;;  %v2682_v51 = vpop.permute.xlu1 %2681 }
 0x23d   : > { %v3676_v15 = vpop.f32.mrf.mxu3  ;;  %v2183_v6 = vmax.f32 %v6620_v12, 0.0 }
 0x23e   : > { %4478 = vst.msk [vmem:[%s6226_s16 + $0x4c] sm:$0xf] %vm4458_vm1, %v4221_v1  ;;  %v3677_v54 = vadd.f32 %v6208_v11, %v3676_v15  ;;  %v5601_v1 = vld [vmem:[%s5778_s26 + $0x118] sm:$0xff] }
 0x23f   : > { %v3356_v41 = vpop.f32.mrf.mxu1  ;;  %v2412_v3 = vpack.c.bf16 %v2183_v6, %v2182_v42 }
 0x240   : > { %v4094_v57 = vadd.f32 %v3677_v54, %v6067_v38  ;;  %v3357_v23 = vadd.f32 %v6208_v11, %v3356_v41  ;;  %v1942_v49 = vpop.f32.mrf.mxu2  ;;  %v2310_v38 = vmax.f32 %v6629_v26, 0.0 }
 0x241   : > { %v6634_v22 = vadd.f32 %v6351_v46, %v1942_v49  ;;  %2697 = vrot.lane.b32.xlu2 %v2412_v3, %s5729_s29 }
 0x242   : > { %v4350_v15 = vpack.c.bf16 %v4094_v57, %v4094_v57  ;;  %v3966_v17 = vadd.f32 %v3357_v23, %v6058_v20  ;;  %5454 = vmatmul.msk.bf16.gmra.mxu1 %vm1096_vm0, %v2682_v51  ;;  %v1625_v42 = vpop.f32.mrf.mxu0 }
 0x243   : > { %v2311_v6 = vmax.f32 %v6634_v22, 0.0  ;;  %v6652_v57 = vadd.f32 %v6351_v46, %v1625_v42 }
 0x244   : > { %4607 = vst.msk [vmem:[%s6226_s16 + $0x250] sm:$0xf] %vm4458_vm1, %v4350_v15  ;;  %v4222_v54 = vpack.c.bf16 %v3966_v17, %v3966_v17  ;;  %v2812_v15 = vpop.permute.xlu2 %2811 }
 0x245   : > { %5399 = vmatmul.msk.bf16.gmra.mxu2 %vm1096_vm0, %v5665_v59  ;;  %v3678_v41 = vpop.f32.mrf.mxu3  ;;  %v2476_v49 = vpack.c.bf16 %v2311_v6, %v2310_v38  ;;  %5335 = vmatmul.msk.bf16.gmra.mxu0 %vm1096_vm0, %v5601_v1  ;;  %v2184_v6 = vmax.f32 %v6652_v57, 0.0 }
 0x246   : > { %4479 = vst.msk [vmem:[%s6226_s16 + $0x50] sm:$0xf] %vm4458_vm1, %v4222_v54  ;;  %v3679_v20 = vadd.f32 %v6208_v11, %v3678_v41 }
 0x247   : > { %2825 = vrot.lane.b32.xlu1 %v2476_v49, %s5729_s29  ;;  %v3358_v3 = vpop.f32.mrf.mxu1 }
 0x248   : > { %v4095_v23 = vadd.f32 %v3679_v20, %v6070_v47  ;;  %v3359_v51 = vadd.f32 %v6208_v11, %v3358_v3  ;;  %v1945_v59 = vpop.f32.mrf.mxu2 }
 0x249   : > { %v6669_v49 = vadd.f32 %v6351_v46, %v1945_v59 }
 0x24a   : > { %v4351_v17 = vpack.c.bf16 %v4095_v23, %v4095_v23  ;;  %v3967_v1 = vadd.f32 %v3359_v51, %v6063_v32  ;;  %5519 = vmatmul.msk.bf16.gmra.mxu3 %vm1096_vm0, %v2812_v15  ;;  %v1627_v38 = vpop.f32.mrf.mxu0 }
 0x24b   : > { %v6660_v54 = vadd.f32 %v6351_v46, %v1627_v38  ;;  %v5666_v38 = vld [vmem:[%s5778_s26 + $0x320] sm:$0xff] }
 0x24c   : > { %4608 = vst.msk [vmem:[%s6226_s16 + $0x254] sm:$0xf] %vm4458_vm1, %v4351_v17  ;;  %v4223_v47 = vpack.c.bf16 %v3967_v1, %v3967_v1  ;;  %v2684_v17 = vpop.permute.xlu0 %2683 }
 0x24d   : > { %8504 = vst [vmem:[#allocation21_spill] sm:$0xff] %v6660_v54  ;;  %v3681_v42 = vpop.f32.mrf.mxu3  ;;  %v2185_v41 = vmax.f32 %v6660_v54, 0.0 }
 0x24e   : > { %4480 = vst.msk [vmem:[%s6226_s16 + $0x54] sm:$0xf] %vm4458_vm1, %v4223_v47  ;;  %v3682_v32 = vadd.f32 %v6208_v11, %v3681_v42  ;;  %v5602_v47 = vld [vmem:[%s5778_s26 + $0x120] sm:$0xff] }
 0x24f   : > { %v3361_v20 = vpop.f32.mrf.mxu1  ;;  %v2413_v3 = vpack.c.bf16 %v2185_v41, %v2184_v6 }
 0x250   : > { %v4096_v23 = vadd.f32 %v3682_v32, %v6091_v25  ;;  %v3362_v51 = vadd.f32 %v6208_v11, %v3361_v20  ;;  %v1947_v15 = vpop.f32.mrf.mxu2  ;;  %v2312_v25 = vmax.f32 %v6669_v49, 0.0 }
 0x251   : > { %v6674_v1 = vadd.f32 %v6351_v46, %v1947_v15  ;;  %2699 = vrot.lane.b32.xlu1 %v2413_v3, %s5729_s29 }
 0x252   : > { %v4352_v42 = vpack.c.bf16 %v4096_v23, %v4096_v23  ;;  %v3968_v59 = vadd.f32 %v3362_v51, %v6082_v8  ;;  %5455 = vmatmul.msk.bf16.gmra.mxu1 %vm1096_vm0, %v2684_v17  ;;  %v1630_v6 = vpop.f32.mrf.mxu0  ;;  %v6692_v8 = vld [vmem:[%s8414_s2 + $0x1] ss:$0 sm:$0xff] }
 0x253   : > { %v2313_v11 = vmax.f32 %v6674_v1, 0.0  ;;  %v6697_v51 = vadd.f32 %v6351_v46, %v1630_v6 }
 0x254   : > { %4609 = vst.msk [vmem:[%s6226_s16 + $0x258] sm:$0xf] %vm4458_vm1, %v4352_v42  ;;  %v4224_v41 = vpack.c.bf16 %v3968_v59, %v3968_v59  ;;  %v8506_v59 = vld [vmem:[#allocation2_spill] sm:$0xff] }
 0x255   : > { %5400 = vmatmul.msk.bf16.gmra.mxu2 %vm1096_vm0, %v5666_v38  ;;  %v3683_v32 = vpop.f32.mrf.mxu3  ;;  %v2477_v20 = vpack.c.bf16 %v2313_v11, %v2312_v25  ;;  %5336 = vmatmul.msk.bf16.gmra.mxu0 %vm1096_vm0, %v5602_v47  ;;  %8505 = vst [vmem:[#allocation22_spill] sm:$0xff] %v6697_v51 }
 0x256   : > { %4481 = vst.msk [vmem:[%s6226_s16 + $0x58] sm:$0xf] %vm4458_vm1, %v4224_v41  ;;  %v3684_v3 = vadd.f32 %v6692_v8, %v3683_v32  ;;  %v2186_v41 = vmax.f32 %v6697_v51, 0.0  ;;  %v2686_v51 = vpop.permute.xlu2 %2685 }
 0x257   : > { %2827 = vrot.lane.b32.xlu0 %v2477_v20, %s5729_s29  ;;  %v3363_v23 = vpop.f32.mrf.mxu1 }
 0x258   : > { %v4097_v15 = vadd.f32 %v3684_v3, %v6094_v43  ;;  %v3364_v17 = vadd.f32 %v6692_v8, %v3363_v23  ;;  %v1950_v38 = vpop.f32.mrf.mxu2 }
 0x259   : > { %v2814_v47 = vpop.permute.xlu1 %2813  ;;  %v6714_v23 = vadd.f32 %v6351_v46, %v1950_v38  ;;  %v8511_v38 = vld [vmem:[#allocation3_spill] sm:$0xff] }
 0x25a   : > { %v4353_v42 = vpack.c.bf16 %v4097_v15, %v4097_v15  ;;  %v3969_v25 = vadd.f32 %v3364_v17, %v8506_v59  ;;  %5520 = vmatmul.msk.bf16.gmra.mxu3 %vm1096_vm0, %v2814_v47  ;;  %v1632_v11 = vpop.f32.mrf.mxu0  ;;  %v8509_v47 = vld [vmem:[#allocation5_spill] sm:$0xff] }
 0x25b   : > { %v6705_v32 = vadd.f32 %v6351_v46, %v1632_v11  ;;  %8508 = vst [vmem:[#allocation23_spill] sm:$0xff] %v6714_v23 }
 0x25c   : > { %4610 = vst.msk [vmem:[%s6226_s16 + $0x25c] sm:$0xf] %vm4458_vm1, %v4353_v42  ;;  %v4225_v43 = vpack.c.bf16 %v3969_v25, %v3969_v25 }
 0x25d   : > { %8507 = vst [vmem:[#allocation2_spill] sm:$0xff] %v6705_v32  ;;  %v3686_v6 = vpop.f32.mrf.mxu3  ;;  %v2187_v20 = vmax.f32 %v6705_v32, 0.0  ;;  %v5667_v32 = vld [vmem:[%s5778_s26 + $0x328] sm:$0xff] }
 0x25e   : > { %4482 = vst.msk [vmem:[%s6226_s16 + $0x5c] sm:$0xf] %vm4458_vm1, %v4225_v43  ;;  %v3687_v3 = vadd.f32 %v6692_v8, %v3686_v6  ;;  %v5603_v43 = vld [vmem:[%s5778_s26 + $0x128] sm:$0xff] }
 0x25f   : > { %v3366_v15 = vpop.f32.mrf.mxu1  ;;  %v2414_v17 = vpack.c.bf16 %v2187_v20, %v2186_v41  ;;  %v2314_v20 = vmax.f32 %v6714_v23, 0.0 }
 0x260   : > { %v4098_v59 = vadd.f32 %v3687_v3, %v8509_v47  ;;  %v3367_v11 = vadd.f32 %v6692_v8, %v3366_v15  ;;  %v1952_v42 = vpop.f32.mrf.mxu2 }
 0x261   : > { %v6719_v25 = vadd.f32 %v6351_v46, %v1952_v42  ;;  %2701 = vrot.lane.b32.xlu0 %v2414_v17, %s5729_s29 }
 0x262   : > { %v4354_v6 = vpack.c.bf16 %v4098_v59, %v4098_v59  ;;  %v3970_v54 = vadd.f32 %v3367_v11, %v8511_v38  ;;  %5456 = vmatmul.msk.bf16.gmra.mxu1 %vm1096_vm0, %v2686_v51  ;;  %v1635_v41 = vpop.f32.mrf.mxu0  ;;  %v8513_v11 = vld [vmem:[#allocation6_spill] sm:$0xff] }
 0x263   : > { %8510 = vst [vmem:[#allocation5_spill] sm:$0xff] %v6719_v25  ;;  %v2315_v3 = vmax.f32 %v6719_v25, 0.0  ;;  %v6737_v59 = vadd.f32 %v6351_v46, %v1635_v41  ;;  %v2688_v25 = vpop.permute.xlu1 %2687 }
 0x264   : > { %4611 = vst.msk [vmem:[%s6226_s16 + $0x260] sm:$0xf] %vm4458_vm1, %v4354_v6  ;;  %v4226_v15 = vpack.c.bf16 %v3970_v54, %v3970_v54 }
 0x265   : > { %5401 = vmatmul.msk.bf16.gmra.mxu2 %vm1096_vm0, %v5667_v32  ;;  %v3688_v47 = vpop.f32.mrf.mxu3  ;;  %v2478_v42 = vpack.c.bf16 %v2315_v3, %v2314_v20  ;;  %5337 = vmatmul.msk.bf16.gmra.mxu0 %vm1096_vm0, %v5603_v43  ;;  %8512 = vst [vmem:[#allocation3_spill] sm:$0xff] %v6737_v59  ;;  %v8514_v43 = vld [vmem:[#allocation4_spill] sm:$0xff] }
 0x266   : > { %4483 = vst.msk [vmem:[%s6226_s16 + $0x60] sm:$0xf] %vm4458_vm1, %v4226_v15  ;;  %v3689_v17 = vadd.f32 %v6692_v8, %v3688_v47  ;;  %v2188_v47 = vmax.f32 %v6737_v59, 0.0 }
 0x267   : > { %2829 = vrot.lane.b32.xlu2 %v2478_v42, %s5729_s29  ;;  %v3368_v51 = vpop.f32.mrf.mxu1 }
 0x268   : > { %v4099_v54 = vadd.f32 %v3689_v17, %v8513_v11  ;;  %v3369_v32 = vadd.f32 %v6692_v8, %v3368_v51  ;;  %v1955_v6 = vpop.f32.mrf.mxu2 }
 0x269   : > { %v2816_v38 = vpop.permute.xlu0 %2815 }
 0x26a   : > { %v4355_v20 = vpack.c.bf16 %v4099_v54, %v4099_v54  ;;  %v3971_v3 = vadd.f32 %v3369_v32, %v8514_v43  ;;  %5521 = vmatmul.msk.bf16.gmra.mxu3 %vm1096_vm0, %v2816_v38  ;;  %v1637_v15 = vpop.f32.mrf.mxu0  ;;  %v6754_v54 = vadd.f32 %v6351_v46, %v1955_v6  ;;  %v8517_v43 = vld [vmem:[#allocation9_spill] sm:$0xff]  ;;  %v8519_v6 = vld [vmem:[#allocation7_spill] sm:$0xff] }
 0x26b   : > { %v6745_v42 = vadd.f32 %v6351_v46, %v1637_v15 }
 0x26c   : > { %4612 = vst.msk [vmem:[%s6226_s16 + $0x264] sm:$0xf] %vm4458_vm1, %v4355_v20  ;;  %v4227_v41 = vpack.c.bf16 %v3971_v3, %v3971_v3 }
 0x26d   : > { %8515 = vst [vmem:[#allocation6_spill] sm:$0xff] %v6745_v42  ;;  %v3691_v17 = vpop.f32.mrf.mxu3  ;;  %v2189_v51 = vmax.f32 %v6745_v42, 0.0  ;;  %v5668_v42 = vld [vmem:[%s5778_s26 + $0x330] sm:$0xff] }
 0x26e   : > { %4484 = vst.msk [vmem:[%s6226_s16 + $0x64] sm:$0xf] %vm4458_vm1, %v4227_v41  ;;  %v3692_v11 = vadd.f32 %v6692_v8, %v3691_v17  ;;  %v5604_v41 = vld [vmem:[%s5778_s26 + $0x130] sm:$0xff] }
 0x26f   : > { %8516 = vst [vmem:[#allocation4_spill] sm:$0xff] %v6754_v54  ;;  %v3371_v32 = vpop.f32.mrf.mxu1  ;;  %v2415_v38 = vpack.c.bf16 %v2189_v51, %v2188_v47  ;;  %v2316_v51 = vmax.f32 %v6754_v54, 0.0 }
 0x270   : > { %v4100_v15 = vadd.f32 %v3692_v11, %v8517_v43  ;;  %v3372_v59 = vadd.f32 %v6692_v8, %v3371_v32  ;;  %v1957_v20 = vpop.f32.mrf.mxu2 }
 0x271   : > { %v6759_v3 = vadd.f32 %v6351_v46, %v1957_v20  ;;  %2703 = vrot.lane.b32.xlu2 %v2415_v38, %s5729_s29 }
 0x272   : > { %v4356_v17 = vpack.c.bf16 %v4100_v15, %v4100_v15  ;;  %v3972_v23 = vadd.f32 %v3372_v59, %v8519_v6  ;;  %5457 = vmatmul.msk.bf16.gmra.mxu1 %vm1096_vm0, %v2688_v25  ;;  %v1640_v47 = vpop.f32.mrf.mxu0  ;;  %v8521_v15 = vld [vmem:[#allocation10_spill] sm:$0xff]  ;;  %v2818_v6 = vpop.permute.xlu2 %2817 }
 0x273   : > { %8518 = vst [vmem:[#allocation9_spill] sm:$0xff] %v6759_v3  ;;  %v2317_v11 = vmax.f32 %v6759_v3, 0.0  ;;  %v6777_v38 = vadd.f32 %v6351_v46, %v1640_v47  ;;  %v2690_v3 = vpop.permute.xlu0 %2689 }
 0x274   : > { %4613 = vst.msk [vmem:[%s6226_s16 + $0x268] sm:$0xf] %vm4458_vm1, %v4356_v17  ;;  %v4228_v32 = vpack.c.bf16 %v3972_v23, %v3972_v23 }
 0x275   : > { %5402 = vmatmul.msk.bf16.gmra.mxu2 %vm1096_vm0, %v5668_v42  ;;  %v3693_v43 = vpop.f32.mrf.mxu3  ;;  %v2479_v20 = vpack.c.bf16 %v2317_v11, %v2316_v51  ;;  %5338 = vmatmul.msk.bf16.gmra.mxu0 %vm1096_vm0, %v5604_v41  ;;  %8520 = vst [vmem:[#allocation7_spill] sm:$0xff] %v6777_v38  ;;  %v8522_v41 = vld [vmem:[#allocation8_spill] sm:$0xff] }
 0x276   : > { %4485 = vst.msk [vmem:[%s6226_s16 + $0x68] sm:$0xf] %vm4458_vm1, %v4228_v32  ;;  %v3694_v59 = vadd.f32 %v6692_v8, %v3693_v43  ;;  %v2190_v43 = vmax.f32 %v6777_v38, 0.0 }
 0x277   : > { %2831 = vrot.lane.b32.xlu1 %v2479_v20, %s5729_s29  ;;  %v3373_v25 = vpop.f32.mrf.mxu1 }
 0x278   : > { %v4101_v23 = vadd.f32 %v3694_v59, %v8521_v15  ;;  %v3374_v42 = vadd.f32 %v6692_v8, %v3373_v25  ;;  %v1960_v17 = vpop.f32.mrf.mxu2 }
 0x27a   : > { %v4357_v51 = vpack.c.bf16 %v4101_v23, %v4101_v23  ;;  %v3973_v11 = vadd.f32 %v3374_v42, %v8522_v41  ;;  %5522 = vmatmul.msk.bf16.gmra.mxu3 %vm1096_vm0, %v2818_v6  ;;  %v1642_v32 = vpop.f32.mrf.mxu0  ;;  %v6794_v23 = vadd.f32 %v6351_v46, %v1960_v17  ;;  %v8525_v41 = vld [vmem:[#allocation13_spill] sm:$0xff]  ;;  %v8527_v17 = vld [vmem:[#allocation11_spill] sm:$0xff] }
 0x27b   : > { %v6785_v20 = vadd.f32 %v6351_v46, %v1642_v32 }
 0x27c   : > { %4614 = vst.msk [vmem:[%s6226_s16 + $0x26c] sm:$0xf] %vm4458_vm1, %v4357_v51  ;;  %v4229_v47 = vpack.c.bf16 %v3973_v11, %v3973_v11 }
 0x27d   : > { %8523 = vst [vmem:[#allocation10_spill] sm:$0xff] %v6785_v20  ;;  %v3696_v59 = vpop.f32.mrf.mxu3  ;;  %v2191_v25 = vmax.f32 %v6785_v20, 0.0  ;;  %v5669_v20 = vld [vmem:[%s5778_s26 + $0x338] sm:$0xff] }
 0x27e   : > { %4486 = vst.msk [vmem:[%s6226_s16 + $0x6c] sm:$0xf] %vm4458_vm1, %v4229_v47  ;;  %v3697_v15 = vadd.f32 %v6692_v8, %v3696_v59  ;;  %v5605_v47 = vld [vmem:[%s5778_s26 + $0x138] sm:$0xff] }
 0x27f   : > { %8524 = vst [vmem:[#allocation8_spill] sm:$0xff] %v6794_v23  ;;  %v3376_v42 = vpop.f32.mrf.mxu1  ;;  %v2416_v6 = vpack.c.bf16 %v2191_v25, %v2190_v43  ;;  %v2318_v25 = vmax.f32 %v6794_v23, 0.0 }
 0x280   : > { %v4102_v32 = vadd.f32 %v3697_v15, %v8525_v41  ;;  %v3377_v38 = vadd.f32 %v6692_v8, %v3376_v42  ;;  %v1962_v51 = vpop.f32.mrf.mxu2 }
 0x281   : > { %v6799_v11 = vadd.f32 %v6351_v46, %v1962_v51  ;;  %2705 = vrot.lane.b32.xlu1 %v2416_v6, %s5729_s29 }
 0x282   : > { %v4358_v59 = vpack.c.bf16 %v4102_v32, %v4102_v32  ;;  %v3974_v54 = vadd.f32 %v3377_v38, %v8527_v17  ;;  %5458 = vmatmul.msk.bf16.gmra.mxu1 %vm1096_vm0, %v2690_v3  ;;  %v1645_v43 = vpop.f32.mrf.mxu0  ;;  %v8529_v32 = vld [vmem:[#allocation14_spill] sm:$0xff] }
 0x283   : > { %8526 = vst [vmem:[#allocation13_spill] sm:$0xff] %v6799_v11  ;;  %v2319_v15 = vmax.f32 %v6799_v11, 0.0  ;;  %v6817_v6 = vadd.f32 %v6351_v46, %v1645_v43  ;;  %v6827_v46 = vld [vmem:[%s8414_s2] ss:$0 sm:$0xff]  ;;  %v2692_v11 = vpop.permute.xlu2 %2691 }
 0x284   : > { %4615 = vst.msk [vmem:[%s6226_s16 + $0x270] sm:$0xf] %vm4458_vm1, %v4358_v59  ;;  %v4230_v42 = vpack.c.bf16 %v3974_v54, %v3974_v54 }
 0x285   : > { %5403 = vmatmul.msk.bf16.gmra.mxu2 %vm1096_vm0, %v5669_v20  ;;  %v3698_v41 = vpop.f32.mrf.mxu3  ;;  %v2480_v51 = vpack.c.bf16 %v2319_v15, %v2318_v25  ;;  %5339 = vmatmul.msk.bf16.gmra.mxu0 %vm1096_vm0, %v5605_v47  ;;  %8528 = vst [vmem:[#allocation11_spill] sm:$0xff] %v6817_v6  ;;  %v8530_v47 = vld [vmem:[#allocation12_spill] sm:$0xff] }
 0x286   : > { %4487 = vst.msk [vmem:[%s6226_s16 + $0x70] sm:$0xf] %vm4458_vm1, %v4230_v42  ;;  %v3699_v38 = vadd.f32 %v6692_v8, %v3698_v41  ;;  %v2192_v41 = vmax.f32 %v6817_v6, 0.0 }
 0x287   : > { %2833 = vrot.lane.b32.xlu0 %v2480_v51, %s5729_s29  ;;  %v3378_v3 = vpop.f32.mrf.mxu1 }
 0x288   : > { %v4103_v54 = vadd.f32 %v3699_v38, %v8529_v32  ;;  %v3379_v20 = vadd.f32 %v6692_v8, %v3378_v3  ;;  %v1965_v59 = vpop.f32.mrf.mxu2 }
 0x289   : > { %v2820_v17 = vpop.permute.xlu1 %2819 }
 0x28a   : > { %v4359_v25 = vpack.c.bf16 %v4103_v54, %v4103_v54  ;;  %v3975_v15 = vadd.f32 %v3379_v20, %v8530_v47  ;;  %5523 = vmatmul.msk.bf16.gmra.mxu3 %vm1096_vm0, %v2820_v17  ;;  %v1647_v42 = vpop.f32.mrf.mxu0  ;;  %v6839_v54 = vadd.f32 %v6827_v46, %v1965_v59  ;;  %v8532_v47 = vld [vmem:[#allocation17_spill] sm:$0xff]  ;;  %v8534_v59 = vld [vmem:[#allocation15_spill] sm:$0xff] }
 0x28b   : > { %v6830_v43 = vadd.f32 %v6827_v46, %v1647_v42 }
 0x28c   : > { %4616 = vst.msk [vmem:[%s6226_s16 + $0x274] sm:$0xf] %vm4458_vm1, %v4359_v25  ;;  %v4231_v51 = vpack.c.bf16 %v3975_v15, %v3975_v15 }
 0x28d   : > { %8531 = vst [vmem:[#allocation14_spill] sm:$0xff] %v6830_v43  ;;  %v3701_v38 = vpop.f32.mrf.mxu3  ;;  %v2193_v3 = vmax.f32 %v6830_v43, 0.0  ;;  %v5670_v43 = vld [vmem:[%s5778_s26 + $0x340] sm:$0xff] }
 0x28e   : > { %4488 = vst.msk [vmem:[%s6226_s16 + $0x74] sm:$0xf] %vm4458_vm1, %v4231_v51  ;;  %v3702_v32 = vadd.f32 %v6692_v8, %v3701_v38  ;;  %v5606_v51 = vld [vmem:[%s5778_s26 + $0x140] sm:$0xff] }
 0x28f   : > { %v3381_v20 = vpop.f32.mrf.mxu1  ;;  %v2417_v17 = vpack.c.bf16 %v2193_v3, %v2192_v41  ;;  %v2320_v3 = vmax.f32 %v6839_v54, 0.0 }
 0x290   : > { %v4104_v42 = vadd.f32 %v3702_v32, %v8532_v47  ;;  %v3382_v6 = vadd.f32 %v6692_v8, %v3381_v20  ;;  %v1967_v25 = vpop.f32.mrf.mxu2 }
 0x291   : > { %v6844_v15 = vadd.f32 %v6827_v46, %v1967_v25  ;;  %2707 = vrot.lane.b32.xlu0 %v2417_v17, %s5729_s29 }
 0x292   : > { %v4360_v38 = vpack.c.bf16 %v4104_v42, %v4104_v42  ;;  %v3976_v23 = vadd.f32 %v3382_v6, %v8534_v59  ;;  %5459 = vmatmul.msk.bf16.gmra.mxu1 %vm1096_vm0, %v2692_v11  ;;  %v1650_v41 = vpop.f32.mrf.mxu0  ;;  %v8536_v42 = vld [vmem:[#allocation18_spill] sm:$0xff] }
 0x293   : > { %8533 = vst [vmem:[#allocation12_spill] sm:$0xff] %v6844_v15  ;;  %v2321_v32 = vmax.f32 %v6844_v15, 0.0  ;;  %v6862_v17 = vadd.f32 %v6827_v46, %v1650_v41 }
 0x294   : > { %4617 = vst.msk [vmem:[%s6226_s16 + $0x278] sm:$0xf] %vm4458_vm1, %v4360_v38  ;;  %v4232_v20 = vpack.c.bf16 %v3976_v23, %v3976_v23 }
 0x295   : > { %5404 = vmatmul.msk.bf16.gmra.mxu2 %vm1096_vm0, %v5670_v43  ;;  %v3703_v47 = vpop.f32.mrf.mxu3  ;;  %v2481_v25 = vpack.c.bf16 %v2321_v32, %v2320_v3  ;;  %5340 = vmatmul.msk.bf16.gmra.mxu0 %vm1096_vm0, %v5606_v51  ;;  %8535 = vst [vmem:[#allocation17_spill] sm:$0xff] %v6862_v17  ;;  %v8537_v51 = vld [vmem:[#allocation16_spill] sm:$0xff] }
 0x296   : > { %4489 = vst.msk [vmem:[%s6226_s16 + $0x78] sm:$0xf] %vm4458_vm1, %v4232_v20  ;;  %v3704_v6 = vadd.f32 %v6692_v8, %v3703_v47  ;;  %v2194_v47 = vmax.f32 %v6862_v17, 0.0  ;;  %v2694_v17 = vpop.permute.xlu1 %2693 }
 0x297   : > { %2835 = vrot.lane.b32.xlu2 %v2481_v25, %s5729_s29  ;;  %v3383_v11 = vpop.f32.mrf.mxu1 }
 0x298   : > { %v4105_v23 = vadd.f32 %v3704_v6, %v8536_v42  ;;  %v3384_v43 = vadd.f32 %v6692_v8, %v3383_v11  ;;  %v1970_v38 = vpop.f32.mrf.mxu2 }
 0x299   : > { %v2822_v59 = vpop.permute.xlu0 %2821 }
 0x29a   : > { %v4361_v3 = vpack.c.bf16 %v4105_v23, %v4105_v23  ;;  %v3977_v32 = vadd.f32 %v3384_v43, %v8537_v51  ;;  %5524 = vmatmul.msk.bf16.gmra.mxu3 %vm1096_vm0, %v2822_v59  ;;  %v1652_v20 = vpop.f32.mrf.mxu0  ;;  %v6879_v23 = vadd.f32 %v6827_v46, %v1970_v38  ;;  %v8539_v38 = vld [vmem:[#allocation19_spill] sm:$0xff] }
 0x29b   : > { %v6870_v25 = vadd.f32 %v6827_v46, %v1652_v20 }
 0x29c   : > { %4618 = vst.msk [vmem:[%s6226_s16 + $0x27c] sm:$0xf] %vm4458_vm1, %v4361_v3  ;;  %v4233_v41 = vpack.c.bf16 %v3977_v32, %v3977_v32 }
 0x29d   : > { %8538 = vst [vmem:[#allocation15_spill] sm:$0xff] %v6870_v25  ;;  %v3706_v6 = vpop.f32.mrf.mxu3  ;;  %v2195_v11 = vmax.f32 %v6870_v25, 0.0  ;;  %v5671_v25 = vld [vmem:[%s5778_s26 + $0x348] sm:$0xff] }
 0x29e   : > { %4490 = vst.msk [vmem:[%s6226_s16 + $0x7c] sm:$0xf] %vm4458_vm1, %v4233_v41  ;;  %v3707_v42 = vadd.f32 %v6692_v8, %v3706_v6  ;;  %v5607_v41 = vld [vmem:[%s5778_s26 + $0x148] sm:$0xff] }
 0x29f   : > { %v3386_v43 = vpop.f32.mrf.mxu1  ;;  %v2418_v59 = vpack.c.bf16 %v2195_v11, %v2194_v47 }
 0x2a0   : > { %v4106_v51 = vadd.f32 %v3707_v42, %v6217_v24  ;;  %v3387_v20 = vadd.f32 %v6692_v8, %v3386_v43  ;;  %v1972_v3 = vpop.f32.mrf.mxu2  ;;  %v2322_v24 = vmax.f32 %v6879_v23, 0.0 }
 0x2a1   : > { %v6884_v32 = vadd.f32 %v6827_v46, %v1972_v3  ;;  %2709 = vrot.lane.b32.xlu2 %v2418_v59, %s5729_s29 }
 0x2a2   : > { %v4362_v6 = vpack.c.bf16 %v4106_v51, %v4106_v51  ;;  %v3978_v15 = vadd.f32 %v3387_v20, %v8539_v38  ;;  %5460 = vmatmul.msk.bf16.gmra.mxu1 %vm1096_vm0, %v2694_v17  ;;  %v1655_v47 = vpop.f32.mrf.mxu0 }
 0x2a3   : > { %v2323_v11 = vmax.f32 %v6884_v32, 0.0  ;;  %v6902_v51 = vadd.f32 %v6827_v46, %v1655_v47 }
 0x2a4   : > { %4619 = vst.msk [vmem:[%s6226_s16 + $0x280] sm:$0xf] %vm4458_vm1, %v4362_v6  ;;  %v4234_v42 = vpack.c.bf16 %v3978_v15, %v3978_v15  ;;  %v2824_v6 = vpop.permute.xlu2 %2823 }
 0x2a5   : > { %5405 = vmatmul.msk.bf16.gmra.mxu2 %vm1096_vm0, %v5671_v25  ;;  %v3708_v43 = vpop.f32.mrf.mxu3  ;;  %v2482_v3 = vpack.c.bf16 %v2323_v11, %v2322_v24  ;;  %5341 = vmatmul.msk.bf16.gmra.mxu0 %vm1096_vm0, %v5607_v41  ;;  %v8540_v41 = vld [vmem:[#allocation20_spill] sm:$0xff] }
 0x2a6   : > { %4491 = vst.msk [vmem:[%s6226_s16 + $0x80] sm:$0xf] %vm4458_vm1, %v4234_v42  ;;  %v3709_v59 = vadd.f32 %v6692_v8, %v3708_v43  ;;  %v2196_v42 = vmax.f32 %v6902_v51, 0.0 }
 0x2a7   : > { %2837 = vrot.lane.b32.xlu1 %v2482_v3, %s5729_s29  ;;  %v3388_v17 = vpop.f32.mrf.mxu1 }
 0x2a8   : > { %v4107_v15 = vadd.f32 %v3709_v59, %v6229_v61  ;;  %v3389_v25 = vadd.f32 %v6692_v8, %v3388_v17  ;;  %v1975_v20 = vpop.f32.mrf.mxu2 }
 0x2a9   : > { %v6919_v17 = vadd.f32 %v6827_v46, %v1975_v20 }
 0x2aa   : > { %v4363_v38 = vpack.c.bf16 %v4107_v15, %v4107_v15  ;;  %v3979_v24 = vadd.f32 %v3389_v25, %v8540_v41  ;;  %5525 = vmatmul.msk.bf16.gmra.mxu3 %vm1096_vm0, %v2824_v6  ;;  %v1657_v11 = vpop.f32.mrf.mxu0 }
 0x2ab   : > { %v6910_v43 = vadd.f32 %v6827_v46, %v1657_v11  ;;  %v2696_v11 = vpop.permute.xlu0 %2695 }
 0x2ac   : > { %4620 = vst.msk [vmem:[%s6226_s16 + $0x284] sm:$0xf] %vm4458_vm1, %v4363_v38  ;;  %v4235_v61 = vpack.c.bf16 %v3979_v24, %v3979_v24 }
 0x2ad   : > { %8541 = vst [vmem:[#allocation18_spill] sm:$0xff] %v6910_v43  ;;  %v3711_v47 = vpop.f32.mrf.mxu3  ;;  %v2197_v3 = vmax.f32 %v6910_v43, 0.0  ;;  %v5672_v43 = vld [vmem:[%s5778_s26 + $0x350] sm:$0xff] }
 0x2ae   : > { %4492 = vst.msk [vmem:[%s6226_s16 + $0x84] sm:$0xf] %vm4458_vm1, %v4235_v61  ;;  %v3712_v59 = vadd.f32 %v6692_v8, %v3711_v47  ;;  %v5608_v61 = vld [vmem:[%s5778_s26 + $0x150] sm:$0xff] }
 0x2af   : > { %v3391_v15 = vpop.f32.mrf.mxu1  ;;  %v2419_v25 = vpack.c.bf16 %v2197_v3, %v2196_v42 }
 0x2b0   : > { %v4108_v6 = vadd.f32 %v3712_v59, %v6264_v34  ;;  %v3392_v41 = vadd.f32 %v6692_v8, %v3391_v15  ;;  %v1977_v38 = vpop.f32.mrf.mxu2  ;;  %v2324_v34 = vmax.f32 %v6919_v17, 0.0 }
 0x2b1   : > { %v6924_v24 = vadd.f32 %v6827_v46, %v1977_v38  ;;  %2711 = vrot.lane.b32.xlu1 %v2419_v25, %s5729_s29 }
 0x2b2   : > { %v4364_v47 = vpack.c.bf16 %v4108_v6, %v4108_v6  ;;  %v3980_v20 = vadd.f32 %v3392_v41, %v6247_v2  ;;  %5461 = vmatmul.msk.bf16.gmra.mxu1 %vm1096_vm0, %v2696_v11  ;;  %v1660_v42 = vpop.f32.mrf.mxu0 }
 0x2b3   : > { %v2325_v3 = vmax.f32 %v6924_v24, 0.0  ;;  %v6942_v6 = vadd.f32 %v6827_v46, %v1660_v42 }
 0x2b4   : > { %4621 = vst.msk [vmem:[%s6226_s16 + $0x288] sm:$0xf] %vm4458_vm1, %v4364_v47  ;;  %v4236_v59 = vpack.c.bf16 %v3980_v20, %v3980_v20 }
 0x2b5   : > { %5406 = vmatmul.msk.bf16.gmra.mxu2 %vm1096_vm0, %v5672_v43  ;;  %v3713_v15 = vpop.f32.mrf.mxu3  ;;  %v2483_v38 = vpack.c.bf16 %v2325_v3, %v2324_v34  ;;  %5342 = vmatmul.msk.bf16.gmra.mxu0 %vm1096_vm0, %v5608_v61  ;;  %v2198_v3 = vmax.f32 %v6942_v6, 0.0 }
 0x2b6   : > { %4493 = vst.msk [vmem:[%s6226_s16 + $0x88] sm:$0xf] %vm4458_vm1, %v4236_v59  ;;  %v3714_v2 = vadd.f32 %v6692_v8, %v3713_v15 }
 0x2b7   : > { %2839 = vrot.lane.b32.xlu0 %v2483_v38, %s5729_s29  ;;  %v3393_v25 = vpop.f32.mrf.mxu1 }
 0x2b8   : > { %v4109_v41 = vadd.f32 %v3714_v2, %v6269_v28  ;;  %v3394_v43 = vadd.f32 %v6692_v8, %v3393_v25  ;;  %v1980_v11 = vpop.f32.mrf.mxu2 }
 0x2b9   : > { %v2826_v47 = vpop.permute.xlu1 %2825  ;;  %v6959_v38 = vadd.f32 %v6827_v46, %v1980_v11 }
 0x2ba   : > { %v4365_v20 = vpack.c.bf16 %v4109_v41, %v4109_v41  ;;  %v3981_v61 = vadd.f32 %v3394_v43, %v6255_v18  ;;  %5526 = vmatmul.msk.bf16.gmra.mxu3 %vm1096_vm0, %v2826_v47  ;;  %v1662_v34 = vpop.f32.mrf.mxu0 }
 0x2bb   : > { %v6950_v59 = vadd.f32 %v6827_v46, %v1662_v34  ;;  %v5673_v34 = vld [vmem:[%s5778_s26 + $0x358] sm:$0xff] }
 0x2bc   : > { %4622 = vst.msk [vmem:[%s6226_s16 + $0x28c] sm:$0xf] %vm4458_vm1, %v4365_v20  ;;  %v4237_v28 = vpack.c.bf16 %v3981_v61, %v3981_v61  ;;  %v2698_v20 = vpop.permute.xlu2 %2697 }
 0x2bd   : > { %v3716_v42 = vpop.f32.mrf.mxu3  ;;  %v2199_v15 = vmax.f32 %v6950_v59, 0.0 }
 0x2be   : > { %4494 = vst.msk [vmem:[%s6226_s16 + $0x8c] sm:$0xf] %vm4458_vm1, %v4237_v28  ;;  %v3717_v18 = vadd.f32 %v6692_v8, %v3716_v42  ;;  %v5609_v28 = vld [vmem:[%s5778_s26 + $0x158] sm:$0xff] }
 0x2bf   : > { %v3396_v2 = vpop.f32.mrf.mxu1  ;;  %v2420_v25 = vpack.c.bf16 %v2199_v15, %v2198_v3 }
 0x2c0   : > { %v4110_v41 = vadd.f32 %v3717_v18, %v6304_v56  ;;  %v3397_v43 = vadd.f32 %v6692_v8, %v3396_v2  ;;  %v1982_v47 = vpop.f32.mrf.mxu2  ;;  %v2326_v56 = vmax.f32 %v6959_v38, 0.0 }
 0x2c1   : > { %v6964_v61 = vadd.f32 %v6827_v46, %v1982_v47  ;;  %2713 = vrot.lane.b32.xlu0 %v2420_v25, %s5729_s29 }
 0x2c2   : > { %v4366_v42 = vpack.c.bf16 %v4110_v41, %v4110_v41  ;;  %v3982_v11 = vadd.f32 %v3397_v43, %v6287_v50  ;;  %5462 = vmatmul.msk.bf16.gmra.mxu1 %vm1096_vm0, %v2698_v20  ;;  %v1665_v3 = vpop.f32.mrf.mxu0 }
 0x2c3   : > { %v2327_v15 = vmax.f32 %v6964_v61, 0.0  ;;  %v6982_v41 = vadd.f32 %v6827_v46, %v1665_v3 }
 0x2c4   : > { %4623 = vst.msk [vmem:[%s6226_s16 + $0x290] sm:$0xf] %vm4458_vm1, %v4366_v42  ;;  %v4238_v18 = vpack.c.bf16 %v3982_v11, %v3982_v11 }
 0x2c5   : > { %5407 = vmatmul.msk.bf16.gmra.mxu2 %vm1096_vm0, %v5673_v34  ;;  %v3718_v2 = vpop.f32.mrf.mxu3  ;;  %v2484_v47 = vpack.c.bf16 %v2327_v15, %v2326_v56  ;;  %5343 = vmatmul.msk.bf16.gmra.mxu0 %vm1096_vm0, %v5609_v28  ;;  %v2200_v15 = vmax.f32 %v6982_v41, 0.0 }
 0x2c6   : > { %4495 = vst.msk [vmem:[%s6226_s16 + $0x90] sm:$0xf] %vm4458_vm1, %v4238_v18  ;;  %v3719_v50 = vadd.f32 %v6692_v8, %v3718_v2 }
 0x2c7   : > { %2841 = vrot.lane.b32.xlu2 %v2484_v47, %s5729_s29  ;;  %v3398_v25 = vpop.f32.mrf.mxu1 }
 0x2c8   : > { %v4111_v43 = vadd.f32 %v3719_v50, %v6309_v30  ;;  %v3399_v20 = vadd.f32 %v6692_v8, %v3398_v25  ;;  %v1985_v34 = vpop.f32.mrf.mxu2 }
 0x2c9   : > { %v2828_v42 = vpop.permute.xlu0 %2827  ;;  %v6999_v47 = vadd.f32 %v6827_v46, %v1985_v34 }
 0x2ca   : > { %v4367_v11 = vpack.c.bf16 %v4111_v43, %v4111_v43  ;;  %v3983_v28 = vadd.f32 %v3399_v20, %v6295_v37  ;;  %5527 = vmatmul.msk.bf16.gmra.mxu3 %vm1096_vm0, %v2828_v42  ;;  %v1667_v56 = vpop.f32.mrf.mxu0 }
 0x2cb   : > { %v6990_v18 = vadd.f32 %v6827_v46, %v1667_v56  ;;  %v5674_v56 = vld [vmem:[%s5778_s26 + $0x360] sm:$0xff] }
 0x2cc   : > { %4624 = vst.msk [vmem:[%s6226_s16 + $0x294] sm:$0xf] %vm4458_vm1, %v4367_v11  ;;  %v4239_v30 = vpack.c.bf16 %v3983_v28, %v3983_v28  ;;  %v2700_v11 = vpop.permute.xlu1 %2699 }
 0x2cd   : > { %v3721_v3 = vpop.f32.mrf.mxu3  ;;  %v2201_v2 = vmax.f32 %v6990_v18, 0.0 }
 0x2ce   : > { %4496 = vst.msk [vmem:[%s6226_s16 + $0x94] sm:$0xf] %vm4458_vm1, %v4239_v30  ;;  %v3722_v37 = vadd.f32 %v6692_v8, %v3721_v3  ;;  %v5610_v30 = vld [vmem:[%s5778_s26 + $0x160] sm:$0xff] }
 0x2cf   : > { %v3401_v50 = vpop.f32.mrf.mxu1  ;;  %v2421_v25 = vpack.c.bf16 %v2201_v2, %v2200_v15 }
 0x2d0   : > { %v4112_v43 = vadd.f32 %v3722_v37, %v6344_v39  ;;  %v3402_v20 = vadd.f32 %v6692_v8, %v3401_v50  ;;  %v1987_v42 = vpop.f32.mrf.mxu2  ;;  %v2328_v39 = vmax.f32 %v6999_v47, 0.0 }
 0x2d1   : > { %v7004_v28 = vadd.f32 %v6827_v46, %v1987_v42  ;;  %2715 = vrot.lane.b32.xlu2 %v2421_v25, %s5729_s29 }
 0x2d2   : > { %v4368_v3 = vpack.c.bf16 %v4112_v43, %v4112_v43  ;;  %v3984_v34 = vadd.f32 %v3402_v20, %v6327_v31  ;;  %5463 = vmatmul.msk.bf16.gmra.mxu1 %vm1096_vm0, %v2700_v11  ;;  %v1670_v15 = vpop.f32.mrf.mxu0 }
 0x2d3   : > { %v2329_v2 = vmax.f32 %v7004_v28, 0.0  ;;  %v7022_v43 = vadd.f32 %v6827_v46, %v1670_v15 }
 0x2d4   : > { %4625 = vst.msk [vmem:[%s6226_s16 + $0x298] sm:$0xf] %vm4458_vm1, %v4368_v3  ;;  %v4240_v37 = vpack.c.bf16 %v3984_v34, %v3984_v34  ;;  %v2830_v3 = vpop.permute.xlu2 %2829 }
 0x2d5   : > { %5408 = vmatmul.msk.bf16.gmra.mxu2 %vm1096_vm0, %v5674_v56  ;;  %v3723_v50 = vpop.f32.mrf.mxu3  ;;  %v2485_v42 = vpack.c.bf16 %v2329_v2, %v2328_v39  ;;  %5344 = vmatmul.msk.bf16.gmra.mxu0 %vm1096_vm0, %v5610_v30  ;;  %v2202_v2 = vmax.f32 %v7022_v43, 0.0 }
 0x2d6   : > { %4497 = vst.msk [vmem:[%s6226_s16 + $0x98] sm:$0xf] %vm4458_vm1, %v4240_v37  ;;  %v3724_v31 = vadd.f32 %v6692_v8, %v3723_v50 }
 0x2d7   : > { %2843 = vrot.lane.b32.xlu1 %v2485_v42, %s5729_s29  ;;  %v3403_v25 = vpop.f32.mrf.mxu1 }
 0x2d8   : > { %v4113_v20 = vadd.f32 %v3724_v31, %v6354_v60  ;;  %v3404_v11 = vadd.f32 %v6692_v8, %v3403_v25  ;;  %v1990_v56 = vpop.f32.mrf.mxu2 }
 0x2d9   : > { %v7039_v42 = vadd.f32 %v6827_v46, %v1990_v56 }
 0x2da   : > { %v4369_v34 = vpack.c.bf16 %v4113_v20, %v4113_v20  ;;  %v3985_v30 = vadd.f32 %v3404_v11, %v6335_v53  ;;  %5528 = vmatmul.msk.bf16.gmra.mxu3 %vm1096_vm0, %v2830_v3  ;;  %v1672_v39 = vpop.f32.mrf.mxu0 }
 0x2db   : > { %v7030_v37 = vadd.f32 %v6827_v46, %v1672_v39  ;;  %v5675_v39 = vld [vmem:[%s5778_s26 + $0x368] sm:$0xff] }
 0x2dc   : > { %4626 = vst.msk [vmem:[%s6226_s16 + $0x29c] sm:$0xf] %vm4458_vm1, %v4369_v34  ;;  %v4241_v60 = vpack.c.bf16 %v3985_v30, %v3985_v30  ;;  %v2702_v34 = vpop.permute.xlu0 %2701 }
 0x2dd   : > { %v3726_v15 = vpop.f32.mrf.mxu3  ;;  %v2203_v50 = vmax.f32 %v7030_v37, 0.0 }
 0x2de   : > { %4498 = vst.msk [vmem:[%s6226_s16 + $0x9c] sm:$0xf] %vm4458_vm1, %v4241_v60  ;;  %v3727_v53 = vadd.f32 %v6692_v8, %v3726_v15  ;;  %v5611_v60 = vld [vmem:[%s5778_s26 + $0x168] sm:$0xff] }
 0x2df   : > { %v3406_v31 = vpop.f32.mrf.mxu1  ;;  %v2422_v25 = vpack.c.bf16 %v2203_v50, %v2202_v2 }
 0x2e0   : > { %v4114_v20 = vadd.f32 %v3727_v53, %v6389_v45  ;;  %v3407_v11 = vadd.f32 %v6692_v8, %v3406_v31  ;;  %v1992_v3 = vpop.f32.mrf.mxu2  ;;  %v2330_v45 = vmax.f32 %v7039_v42, 0.0 }
 0x2e1   : > { %v7044_v30 = vadd.f32 %v6827_v46, %v1992_v3  ;;  %2717 = vrot.lane.b32.xlu1 %v2422_v25, %s5729_s29 }
 0x2e2   : > { %v4370_v15 = vpack.c.bf16 %v4114_v20, %v4114_v20  ;;  %v3986_v56 = vadd.f32 %v3407_v11, %v6372_v9  ;;  %5464 = vmatmul.msk.bf16.gmra.mxu1 %vm1096_vm0, %v2702_v34  ;;  %v1675_v2 = vpop.f32.mrf.mxu0 }
 0x2e3   : > { %v2331_v50 = vmax.f32 %v7044_v30, 0.0  ;;  %v7062_v20 = vadd.f32 %v6827_v46, %v1675_v2 }
 0x2e4   : > { %4627 = vst.msk [vmem:[%s6226_s16 + $0x2a0] sm:$0xf] %vm4458_vm1, %v4370_v15  ;;  %v4242_v53 = vpack.c.bf16 %v3986_v56, %v3986_v56 }
 0x2e5   : > { %5409 = vmatmul.msk.bf16.gmra.mxu2 %vm1096_vm0, %v5675_v39  ;;  %v3728_v31 = vpop.f32.mrf.mxu3  ;;  %v2486_v3 = vpack.c.bf16 %v2331_v50, %v2330_v45  ;;  %5345 = vmatmul.msk.bf16.gmra.mxu0 %vm1096_vm0, %v5611_v60  ;;  %v2204_v50 = vmax.f32 %v7062_v20, 0.0 }
 0x2e6   : > { %4499 = vst.msk [vmem:[%s6226_s16 + $0xa0] sm:$0xf] %vm4458_vm1, %v4242_v53  ;;  %v3729_v9 = vadd.f32 %v6692_v8, %v3728_v31 }
 0x2e7   : > { %2845 = vrot.lane.b32.xlu0 %v2486_v3, %s5729_s29  ;;  %v3408_v25 = vpop.f32.mrf.mxu1 }
 0x2e8   : > { %v4115_v11 = vadd.f32 %v3729_v9, %v6394_v44  ;;  %v3409_v34 = vadd.f32 %v6692_v8, %v3408_v25  ;;  %v1995_v39 = vpop.f32.mrf.mxu2 }
 0x2e9   : > { %v2832_v15 = vpop.permute.xlu1 %2831  ;;  %v7079_v3 = vadd.f32 %v6827_v46, %v1995_v39 }
 0x2ea   : > { %v4371_v56 = vpack.c.bf16 %v4115_v11, %v4115_v11  ;;  %v3987_v60 = vadd.f32 %v3409_v34, %v6380_v5  ;;  %5529 = vmatmul.msk.bf16.gmra.mxu3 %vm1096_vm0, %v2832_v15  ;;  %v1677_v45 = vpop.f32.mrf.mxu0 }
 0x2eb   : > { %v7070_v53 = vadd.f32 %v6827_v46, %v1677_v45  ;;  %v5676_v45 = vld [vmem:[%s5778_s26 + $0x370] sm:$0xff] }
 0x2ec   : > { %4628 = vst.msk [vmem:[%s6226_s16 + $0x2a4] sm:$0xf] %vm4458_vm1, %v4371_v56  ;;  %v4243_v44 = vpack.c.bf16 %v3987_v60, %v3987_v60  ;;  %v2704_v56 = vpop.permute.xlu2 %2703 }
 0x2ed   : > { %v3731_v2 = vpop.f32.mrf.mxu3  ;;  %v2205_v31 = vmax.f32 %v7070_v53, 0.0 }
 0x2ee   : > { %4500 = vst.msk [vmem:[%s6226_s16 + $0xa4] sm:$0xf] %vm4458_vm1, %v4243_v44  ;;  %v3732_v5 = vadd.f32 %v6692_v8, %v3731_v2  ;;  %v5612_v44 = vld [vmem:[%s5778_s26 + $0x170] sm:$0xff] }
 0x2ef   : > { %v3411_v9 = vpop.f32.mrf.mxu1  ;;  %v2423_v25 = vpack.c.bf16 %v2205_v31, %v2204_v50 }
 0x2f0   : > { %v4116_v11 = vadd.f32 %v3732_v5, %v6429_v36  ;;  %v3412_v34 = vadd.f32 %v6692_v8, %v3411_v9  ;;  %v1997_v15 = vpop.f32.mrf.mxu2  ;;  %v2332_v36 = vmax.f32 %v7079_v3, 0.0 }
 0x2f1   : > { %v7084_v60 = vadd.f32 %v6827_v46, %v1997_v15  ;;  %2719 = vrot.lane.b32.xlu0 %v2423_v25, %s5729_s29 }
 0x2f2   : > { %v4372_v2 = vpack.c.bf16 %v4116_v11, %v4116_v11  ;;  %v3988_v39 = vadd.f32 %v3412_v34, %v6412_v63  ;;  %5465 = vmatmul.msk.bf16.gmra.mxu1 %vm1096_vm0, %v2704_v56  ;;  %v1680_v50 = vpop.f32.mrf.mxu0 }
 0x2f3   : > { %v2333_v31 = vmax.f32 %v7084_v60, 0.0  ;;  %v7102_v11 = vadd.f32 %v6827_v46, %v1680_v50 }
 0x2f4   : > { %4629 = vst.msk [vmem:[%s6226_s16 + $0x2a8] sm:$0xf] %vm4458_vm1, %v4372_v2  ;;  %v4244_v5 = vpack.c.bf16 %v3988_v39, %v3988_v39 }
 0x2f5   : > { %5410 = vmatmul.msk.bf16.gmra.mxu2 %vm1096_vm0, %v5676_v45  ;;  %v3733_v9 = vpop.f32.mrf.mxu3  ;;  %v2487_v15 = vpack.c.bf16 %v2333_v31, %v2332_v36  ;;  %5346 = vmatmul.msk.bf16.gmra.mxu0 %vm1096_vm0, %v5612_v44  ;;  %v2206_v31 = vmax.f32 %v7102_v11, 0.0 }
 0x2f6   : > { %4501 = vst.msk [vmem:[%s6226_s16 + $0xa8] sm:$0xf] %vm4458_vm1, %v4244_v5  ;;  %v3734_v63 = vadd.f32 %v6692_v8, %v3733_v9 }
 0x2f7   : > { %2847 = vrot.lane.b32.xlu2 %v2487_v15, %s5729_s29  ;;  %v3413_v25 = vpop.f32.mrf.mxu1 }
 0x2f8   : > { %v4117_v34 = vadd.f32 %v3734_v63, %v6434_v19  ;;  %v3414_v56 = vadd.f32 %v6692_v8, %v3413_v25  ;;  %v2000_v45 = vpop.f32.mrf.mxu2 }
 0x2f9   : > { %v2834_v2 = vpop.permute.xlu0 %2833  ;;  %v7119_v15 = vadd.f32 %v6827_v46, %v2000_v45 }
 0x2fa   : > { %v4373_v39 = vpack.c.bf16 %v4117_v34, %v4117_v34  ;;  %v3989_v44 = vadd.f32 %v3414_v56, %v6420_v13  ;;  %5530 = vmatmul.msk.bf16.gmra.mxu3 %vm1096_vm0, %v2834_v2  ;;  %v1682_v36 = vpop.f32.mrf.mxu0 }
 0x2fb   : > { %v7110_v5 = vadd.f32 %v6827_v46, %v1682_v36  ;;  %v5677_v36 = vld [vmem:[%s5778_s26 + $0x378] sm:$0xff] }
 0x2fc   : > { %4630 = vst.msk [vmem:[%s6226_s16 + $0x2ac] sm:$0xf] %vm4458_vm1, %v4373_v39  ;;  %v4245_v19 = vpack.c.bf16 %v3989_v44, %v3989_v44  ;;  %v2706_v39 = vpop.permute.xlu1 %2705 }
 0x2fd   : > { %v3736_v50 = vpop.f32.mrf.mxu3  ;;  %v2207_v9 = vmax.f32 %v7110_v5, 0.0 }
 0x2fe   : > { %4502 = vst.msk [vmem:[%s6226_s16 + $0xac] sm:$0xf] %vm4458_vm1, %v4245_v19  ;;  %v3737_v13 = vadd.f32 %v6692_v8, %v3736_v50  ;;  %v5613_v19 = vld [vmem:[%s5778_s26 + $0x178] sm:$0xff] }
 0x2ff   : > { %v3416_v63 = vpop.f32.mrf.mxu1  ;;  %v2424_v25 = vpack.c.bf16 %v2207_v9, %v2206_v31 }
 0x300   : > { %v4118_v34 = vadd.f32 %v3737_v13, %v6469_v10  ;;  %v3417_v56 = vadd.f32 %v6692_v8, %v3416_v63  ;;  %v2002_v2 = vpop.f32.mrf.mxu2  ;;  %v2334_v10 = vmax.f32 %v7119_v15, 0.0 }
 0x301   : > { %v7124_v44 = vadd.f32 %v6827_v46, %v2002_v2  ;;  %2721 = vrot.lane.b32.xlu2 %v2424_v25, %s5729_s29 }
 0x302   : > { %v4374_v50 = vpack.c.bf16 %v4118_v34, %v4118_v34  ;;  %v3990_v45 = vadd.f32 %v3417_v56, %v6452_v14  ;;  %5466 = vmatmul.msk.bf16.gmra.mxu1 %vm1096_vm0, %v2706_v39  ;;  %v1685_v31 = vpop.f32.mrf.mxu0 }
 0x303   : > { %v2335_v9 = vmax.f32 %v7124_v44, 0.0  ;;  %v7142_v34 = vadd.f32 %v6827_v46, %v1685_v31 }
 0x304   : > { %4631 = vst.msk [vmem:[%s6226_s16 + $0x2b0] sm:$0xf] %vm4458_vm1, %v4374_v50  ;;  %v4246_v13 = vpack.c.bf16 %v3990_v45, %v3990_v45  ;;  %v2836_v50 = vpop.permute.xlu2 %2835 }
 0x305   : > { %5411 = vmatmul.msk.bf16.gmra.mxu2 %vm1096_vm0, %v5677_v36  ;;  %v3738_v63 = vpop.f32.mrf.mxu3  ;;  %v2488_v2 = vpack.c.bf16 %v2335_v9, %v2334_v10  ;;  %5347 = vmatmul.msk.bf16.gmra.mxu0 %vm1096_vm0, %v5613_v19  ;;  %v2208_v9 = vmax.f32 %v7142_v34, 0.0 }
 0x306   : > { %4503 = vst.msk [vmem:[%s6226_s16 + $0xb0] sm:$0xf] %vm4458_vm1, %v4246_v13  ;;  %v3739_v14 = vadd.f32 %v6692_v8, %v3738_v63 }
 0x307   : > { %2849 = vrot.lane.b32.xlu1 %v2488_v2, %s5729_s29  ;;  %v3418_v25 = vpop.f32.mrf.mxu1 }
 0x308   : > { %v4119_v56 = vadd.f32 %v3739_v14, %v6474_v40  ;;  %v3419_v39 = vadd.f32 %v6692_v8, %v3418_v25  ;;  %v2005_v36 = vpop.f32.mrf.mxu2 }
 0x309   : > { %v7159_v2 = vadd.f32 %v6827_v46, %v2005_v36 }
 0x30a   : > { %v4375_v45 = vpack.c.bf16 %v4119_v56, %v4119_v56  ;;  %v3991_v19 = vadd.f32 %v3419_v39, %v6460_v33  ;;  %5531 = vmatmul.msk.bf16.gmra.mxu3 %vm1096_vm0, %v2836_v50  ;;  %v1687_v10 = vpop.f32.mrf.mxu0 }
 0x30b   : > { %v7150_v13 = vadd.f32 %v6827_v46, %v1687_v10  ;;  %v5678_v10 = vld [vmem:[%s5778_s26 + $0x380] sm:$0xff] }
 0x30c   : > { %4632 = vst.msk [vmem:[%s6226_s16 + $0x2b4] sm:$0xf] %vm4458_vm1, %v4375_v45  ;;  %v4247_v40 = vpack.c.bf16 %v3991_v19, %v3991_v19  ;;  %v2708_v45 = vpop.permute.xlu0 %2707 }
 0x30d   : > { %v3741_v31 = vpop.f32.mrf.mxu3  ;;  %v2209_v63 = vmax.f32 %v7150_v13, 0.0 }
 0x30e   : > { %4504 = vst.msk [vmem:[%s6226_s16 + $0xb4] sm:$0xf] %vm4458_vm1, %v4247_v40  ;;  %v3742_v33 = vadd.f32 %v6692_v8, %v3741_v31  ;;  %v5614_v40 = vld [vmem:[%s5778_s26 + $0x180] sm:$0xff] }
 0x30f   : > { %v3421_v14 = vpop.f32.mrf.mxu1  ;;  %v2425_v25 = vpack.c.bf16 %v2209_v63, %v2208_v9 }
 0x310   : > { %v4120_v56 = vadd.f32 %v3742_v33, %v6509_v52  ;;  %v3422_v39 = vadd.f32 %v6692_v8, %v3421_v14  ;;  %v2007_v50 = vpop.f32.mrf.mxu2  ;;  %v2336_v52 = vmax.f32 %v7159_v2, 0.0 }
 0x311   : > { %v7164_v19 = vadd.f32 %v6827_v46, %v2007_v50  ;;  %2723 = vrot.lane.b32.xlu1 %v2425_v25, %s5729_s29 }
 0x312   : > { %v4376_v31 = vpack.c.bf16 %v4120_v56, %v4120_v56  ;;  %v3992_v36 = vadd.f32 %v3422_v39, %v6492_v16  ;;  %5467 = vmatmul.msk.bf16.gmra.mxu1 %vm1096_vm0, %v2708_v45  ;;  %v1690_v9 = vpop.f32.mrf.mxu0  ;;  %v7182_v16 = vld [vmem:[%s8414_s2 + $0x1] ss:$0 sm:$0xff] }
 0x313   : > { %v2337_v8 = vmax.f32 %v7164_v19, 0.0  ;;  %v7187_v39 = vadd.f32 %v6827_v46, %v1690_v9 }
 0x314   : > { %4633 = vst.msk [vmem:[%s6226_s16 + $0x2b8] sm:$0xf] %vm4458_vm1, %v4376_v31  ;;  %v4248_v63 = vpack.c.bf16 %v3992_v36, %v3992_v36 }
 0x315   : > { %5412 = vmatmul.msk.bf16.gmra.mxu2 %vm1096_vm0, %v5678_v10  ;;  %v3743_v33 = vpop.f32.mrf.mxu3  ;;  %v2489_v14 = vpack.c.bf16 %v2337_v8, %v2336_v52  ;;  %5348 = vmatmul.msk.bf16.gmra.mxu0 %vm1096_vm0, %v5614_v40  ;;  %v2210_v8 = vmax.f32 %v7187_v39, 0.0 }
 0x316   : > { %4505 = vst.msk [vmem:[%s6226_s16 + $0xb8] sm:$0xf] %vm4458_vm1, %v4248_v63  ;;  %v3744_v25 = vadd.f32 %v7182_v16, %v3743_v33 }
 0x317   : > { %2851 = vrot.lane.b32.xlu0 %v2489_v14, %s5729_s29  ;;  %v3423_v56 = vpop.f32.mrf.mxu1 }
 0x318   : > { %v4121_v50 = vadd.f32 %v3744_v25, %v6514_v0  ;;  %v3424_v45 = vadd.f32 %v7182_v16, %v3423_v56  ;;  %v2010_v10 = vpop.f32.mrf.mxu2 }
 0x319   : > { %v2838_v40 = vpop.permute.xlu1 %2837  ;;  %v7204_v14 = vadd.f32 %v6827_v46, %v2010_v10 }
 0x31a   : > { %v4377_v31 = vpack.c.bf16 %v4121_v50, %v4121_v50  ;;  %v3993_v36 = vadd.f32 %v3424_v45, %v6500_v55  ;;  %5532 = vmatmul.msk.bf16.gmra.mxu3 %vm1096_vm0, %v2838_v40  ;;  %v1692_v52 = vpop.f32.mrf.mxu0 }
 0x31b   : > { %v7195_v63 = vadd.f32 %v6827_v46, %v1692_v52  ;;  %v5679_v52 = vld [vmem:[%s5778_s26 + $0x388] sm:$0xff] }
 0x31c   : > { %4634 = vst.msk [vmem:[%s6226_s16 + $0x2bc] sm:$0xf] %vm4458_vm1, %v4377_v31  ;;  %v4249_v0 = vpack.c.bf16 %v3993_v36, %v3993_v36  ;;  %v2710_v31 = vpop.permute.xlu2 %2709 }
 0x31d   : > { %v3746_v9 = vpop.f32.mrf.mxu3  ;;  %v2211_v33 = vmax.f32 %v7195_v63, 0.0 }
 0x31e   : > { %4506 = vst.msk [vmem:[%s6226_s16 + $0xbc] sm:$0xf] %vm4458_vm1, %v4249_v0  ;;  %v3747_v55 = vadd.f32 %v7182_v16, %v3746_v9  ;;  %v5615_v0 = vld [vmem:[%s5778_s26 + $0x188] sm:$0xff] }
 0x31f   : > { %v3426_v25 = vpop.f32.mrf.mxu1  ;;  %v2426_v56 = vpack.c.bf16 %v2211_v33, %v2210_v8 }
 0x320   : > { %v4122_v50 = vadd.f32 %v3747_v55, %v6549_v4  ;;  %v3427_v45 = vadd.f32 %v7182_v16, %v3426_v25  ;;  %v2012_v40 = vpop.f32.mrf.mxu2  ;;  %v2338_v4 = vmax.f32 %v7204_v14, 0.0 }
 0x321   : > { %v7209_v36 = vadd.f32 %v6827_v46, %v2012_v40  ;;  %2725 = vrot.lane.b32.xlu0 %v2426_v56, %s5729_s29 }
 0x322   : > { %v4378_v9 = vpack.c.bf16 %v4122_v50, %v4122_v50  ;;  %v3994_v10 = vadd.f32 %v3427_v45, %v6532_v27  ;;  %5468 = vmatmul.msk.bf16.gmra.mxu1 %vm1096_vm0, %v2710_v31  ;;  %v1695_v8 = vpop.f32.mrf.mxu0 }
 0x323   : > { %v2339_v33 = vmax.f32 %v7209_v36, 0.0  ;;  %v7227_v50 = vadd.f32 %v6827_v46, %v1695_v8 }
 0x324   : > { %4635 = vst.msk [vmem:[%s6226_s16 + $0x2c0] sm:$0xf] %vm4458_vm1, %v4378_v9  ;;  %v4250_v55 = vpack.c.bf16 %v3994_v10, %v3994_v10 }
 0x325   : > { %5413 = vmatmul.msk.bf16.gmra.mxu2 %vm1096_vm0, %v5679_v52  ;;  %v3748_v25 = vpop.f32.mrf.mxu3  ;;  %v2490_v40 = vpack.c.bf16 %v2339_v33, %v2338_v4  ;;  %5349 = vmatmul.msk.bf16.gmra.mxu0 %vm1096_vm0, %v5615_v0  ;;  %v2212_v33 = vmax.f32 %v7227_v50, 0.0 }
 0x326   : > { %4507 = vst.msk [vmem:[%s6226_s16 + $0xc0] sm:$0xf] %vm4458_vm1, %v4250_v55  ;;  %v3749_v27 = vadd.f32 %v7182_v16, %v3748_v25 }
 0x327   : > { %2853 = vrot.lane.b32.xlu2 %v2490_v40, %s5729_s29  ;;  %v3428_v56 = vpop.f32.mrf.mxu1 }
 0x328   : > { %v4123_v45 = vadd.f32 %v3749_v27, %v6554_v29  ;;  %v3429_v31 = vadd.f32 %v7182_v16, %v3428_v56  ;;  %v2015_v52 = vpop.f32.mrf.mxu2 }
 0x329   : > { %v2840_v9 = vpop.permute.xlu0 %2839  ;;  %v7244_v40 = vadd.f32 %v6827_v46, %v2015_v52 }
 0x32a   : > { %v4379_v10 = vpack.c.bf16 %v4123_v45, %v4123_v45  ;;  %v3995_v0 = vadd.f32 %v3429_v31, %v6540_v21  ;;  %5533 = vmatmul.msk.bf16.gmra.mxu3 %vm1096_vm0, %v2840_v9  ;;  %v1697_v4 = vpop.f32.mrf.mxu0 }
 0x32b   : > { %v7235_v55 = vadd.f32 %v6827_v46, %v1697_v4  ;;  %v5680_v4 = vld [vmem:[%s5778_s26 + $0x390] sm:$0xff] }
 0x32c   : > { %4636 = vst.msk [vmem:[%s6226_s16 + $0x2c4] sm:$0xf] %vm4458_vm1, %v4379_v10  ;;  %v4251_v29 = vpack.c.bf16 %v3995_v0, %v3995_v0  ;;  %v2712_v10 = vpop.permute.xlu1 %2711 }
 0x32d   : > { %v3751_v8 = vpop.f32.mrf.mxu3  ;;  %v2213_v25 = vmax.f32 %v7235_v55, 0.0 }
 0x32e   : > { %4508 = vst.msk [vmem:[%s6226_s16 + $0xc4] sm:$0xf] %vm4458_vm1, %v4251_v29  ;;  %v3752_v21 = vadd.f32 %v7182_v16, %v3751_v8  ;;  %v5616_v29 = vld [vmem:[%s5778_s26 + $0x190] sm:$0xff] }
 0x32f   : > { %v3431_v27 = vpop.f32.mrf.mxu1  ;;  %v2427_v56 = vpack.c.bf16 %v2213_v25, %v2212_v33 }
 0x330   : > { %v4124_v45 = vadd.f32 %v3752_v21, %v6589_v7  ;;  %v3432_v31 = vadd.f32 %v7182_v16, %v3431_v27  ;;  %v2017_v9 = vpop.f32.mrf.mxu2  ;;  %v2340_v7 = vmax.f32 %v7244_v40, 0.0 }
 0x331   : > { %v7249_v0 = vadd.f32 %v6827_v46, %v2017_v9  ;;  %2727 = vrot.lane.b32.xlu2 %v2427_v56, %s5729_s29 }
 0x332   : > { %v4380_v8 = vpack.c.bf16 %v4124_v45, %v4124_v45  ;;  %v3996_v52 = vadd.f32 %v3432_v31, %v6572_v62  ;;  %5469 = vmatmul.msk.bf16.gmra.mxu1 %vm1096_vm0, %v2712_v10  ;;  %v1700_v33 = vpop.f32.mrf.mxu0 }
 0x333   : > { %v2341_v25 = vmax.f32 %v7249_v0, 0.0  ;;  %v7267_v45 = vadd.f32 %v6827_v46, %v1700_v33 }
 0x334   : > { %4637 = vst.msk [vmem:[%s6226_s16 + $0x2c8] sm:$0xf] %vm4458_vm1, %v4380_v8  ;;  %v4252_v21 = vpack.c.bf16 %v3996_v52, %v3996_v52  ;;  %v2842_v8 = vpop.permute.xlu2 %2841 }
 0x335   : > { %5414 = vmatmul.msk.bf16.gmra.mxu2 %vm1096_vm0, %v5680_v4  ;;  %v3753_v27 = vpop.f32.mrf.mxu3  ;;  %v2491_v9 = vpack.c.bf16 %v2341_v25, %v2340_v7  ;;  %5350 = vmatmul.msk.bf16.gmra.mxu0 %vm1096_vm0, %v5616_v29  ;;  %v2214_v25 = vmax.f32 %v7267_v45, 0.0 }
 0x336   : > { %4509 = vst.msk [vmem:[%s6226_s16 + $0xc8] sm:$0xf] %vm4458_vm1, %v4252_v21  ;;  %v3754_v62 = vadd.f32 %v7182_v16, %v3753_v27 }
 0x337   : > { %2855 = vrot.lane.b32.xlu1 %v2491_v9, %s5729_s29  ;;  %v3433_v56 = vpop.f32.mrf.mxu1 }
 0x338   : > { %v4125_v31 = vadd.f32 %v3754_v62, %v6594_v58  ;;  %v3434_v10 = vadd.f32 %v7182_v16, %v3433_v56  ;;  %v2020_v4 = vpop.f32.mrf.mxu2 }
 0x339   : > { %v7284_v9 = vadd.f32 %v6827_v46, %v2020_v4 }
 0x33a   : > { %v4381_v52 = vpack.c.bf16 %v4125_v31, %v4125_v31  ;;  %v3997_v29 = vadd.f32 %v3434_v10, %v6580_v48  ;;  %5534 = vmatmul.msk.bf16.gmra.mxu3 %vm1096_vm0, %v2842_v8  ;;  %v1702_v7 = vpop.f32.mrf.mxu0 }
 0x33b   : > { %v7275_v21 = vadd.f32 %v6827_v46, %v1702_v7  ;;  %v5681_v7 = vld [vmem:[%s5778_s26 + $0x398] sm:$0xff] }
 0x33c   : > { %4638 = vst.msk [vmem:[%s6226_s16 + $0x2cc] sm:$0xf] %vm4458_vm1, %v4381_v52  ;;  %v4253_v58 = vpack.c.bf16 %v3997_v29, %v3997_v29  ;;  %v2714_v52 = vpop.permute.xlu0 %2713 }
 0x33d   : > { %v3756_v33 = vpop.f32.mrf.mxu3  ;;  %v2215_v27 = vmax.f32 %v7275_v21, 0.0 }
 0x33e   : > { %4510 = vst.msk [vmem:[%s6226_s16 + $0xcc] sm:$0xf] %vm4458_vm1, %v4253_v58  ;;  %v3757_v48 = vadd.f32 %v7182_v16, %v3756_v33  ;;  %v5617_v58 = vld [vmem:[%s5778_s26 + $0x198] sm:$0xff] }
 0x33f   : > { %v3436_v62 = vpop.f32.mrf.mxu1  ;;  %v2428_v56 = vpack.c.bf16 %v2215_v27, %v2214_v25 }
 0x340   : > { %v4126_v31 = vadd.f32 %v3757_v48, %v6629_v26  ;;  %v3437_v10 = vadd.f32 %v7182_v16, %v3436_v62  ;;  %v2022_v8 = vpop.f32.mrf.mxu2  ;;  %v2342_v26 = vmax.f32 %v7284_v9, 0.0 }
 0x341   : > { %v7289_v29 = vadd.f32 %v6827_v46, %v2022_v8  ;;  %2729 = vrot.lane.b32.xlu1 %v2428_v56, %s5729_s29 }
 0x342   : > { %v4382_v33 = vpack.c.bf16 %v4126_v31, %v4126_v31  ;;  %v3998_v4 = vadd.f32 %v3437_v10, %v6612_v35  ;;  %5470 = vmatmul.msk.bf16.gmra.mxu1 %vm1096_vm0, %v2714_v52  ;;  %v1705_v25 = vpop.f32.mrf.mxu0  ;;  %v7309_v31 = vld [vmem:[%s8414_s2] ss:$0 sm:$0xff] }
 0x343   : > { %v2343_v27 = vmax.f32 %v7289_v29, 0.0  ;;  %v7312_v10 = vadd.f32 %v7309_v31, %v1705_v25 }
 0x344   : > { %4639 = vst.msk [vmem:[%s6226_s16 + $0x2d0] sm:$0xf] %vm4458_vm1, %v4382_v33  ;;  %v4254_v48 = vpack.c.bf16 %v3998_v4, %v3998_v4 }
 0x345   : > { %5415 = vmatmul.msk.bf16.gmra.mxu2 %vm1096_vm0, %v5681_v7  ;;  %v3758_v46 = vpop.f32.mrf.mxu3  ;;  %v2492_v62 = vpack.c.bf16 %v2343_v27, %v2342_v26  ;;  %5351 = vmatmul.msk.bf16.gmra.mxu0 %vm1096_vm0, %v5617_v58  ;;  %v2216_v27 = vmax.f32 %v7312_v10, 0.0 }
 0x346   : > { %4511 = vst.msk [vmem:[%s6226_s16 + $0xd0] sm:$0xf] %vm4458_vm1, %v4254_v48  ;;  %v3759_v35 = vadd.f32 %v7182_v16, %v3758_v46 }
 0x347   : > { %2857 = vrot.lane.b32.xlu0 %v2492_v62, %s5729_s29  ;;  %v3438_v56 = vpop.f32.mrf.mxu1 }
 0x348   : > { %v4127_v8 = vadd.f32 %v3759_v35, %v6634_v22  ;;  %v3439_v52 = vadd.f32 %v7182_v16, %v3438_v56  ;;  %v2025_v7 = vpop.f32.mrf.mxu2 }
 0x349   : > { %v2844_v58 = vpop.permute.xlu1 %2843  ;;  %v7329_v62 = vadd.f32 %v7309_v31, %v2025_v7 }
 0x34a   : > { %v4383_v33 = vpack.c.bf16 %v4127_v8, %v4127_v8  ;;  %v3999_v4 = vadd.f32 %v3439_v52, %v6620_v12  ;;  %5535 = vmatmul.msk.bf16.gmra.mxu3 %vm1096_vm0, %v2844_v58  ;;  %v1707_v26 = vpop.f32.mrf.mxu0 }
 0x34b   : > { %v7320_v48 = vadd.f32 %v7309_v31, %v1707_v26  ;;  %v5682_v26 = vld [vmem:[%s5778_s26 + $0x3a0] sm:$0xff] }
 0x34c   : > { %4640 = vst.msk [vmem:[%s6226_s16 + $0x2d4] sm:$0xf] %vm4458_vm1, %v4383_v33  ;;  %v4255_v22 = vpack.c.bf16 %v3999_v4, %v3999_v4  ;;  %v2716_v33 = vpop.permute.xlu2 %2715 }
 0x34d   : > { %8542 = vst [vmem:[#allocation16_spill] sm:$0xff] %v7320_v48  ;;  %v3761_v25 = vpop.f32.mrf.mxu3  ;;  %v2217_v46 = vmax.f32 %v7320_v48, 0.0 }
 0x34e   : > { %4512 = vst.msk [vmem:[%s6226_s16 + $0xd4] sm:$0xf] %vm4458_vm1, %v4255_v22  ;;  %v3762_v12 = vadd.f32 %v7182_v16, %v3761_v25  ;;  %v5618_v22 = vld [vmem:[%s5778_s26 + $0x1a0] sm:$0xff] }
 0x34f   : > { %v3441_v35 = vpop.f32.mrf.mxu1  ;;  %v2429_v56 = vpack.c.bf16 %v2217_v46, %v2216_v27 }
 0x350   : > { %v4128_v8 = vadd.f32 %v3762_v12, %v6669_v49  ;;  %v3442_v52 = vadd.f32 %v7182_v16, %v3441_v35  ;;  %v2027_v58 = vpop.f32.mrf.mxu2  ;;  %v2344_v49 = vmax.f32 %v7329_v62, 0.0 }
 0x351   : > { %v7334_v4 = vadd.f32 %v7309_v31, %v2027_v58  ;;  %2731 = vrot.lane.b32.xlu0 %v2429_v56, %s5729_s29 }
 0x352   : > { %v4384_v25 = vpack.c.bf16 %v4128_v8, %v4128_v8  ;;  %v4000_v7 = vadd.f32 %v3442_v52, %v6652_v57  ;;  %5471 = vmatmul.msk.bf16.gmra.mxu1 %vm1096_vm0, %v2716_v33  ;;  %v1710_v27 = vpop.f32.mrf.mxu0 }
 0x353   : > { %v2345_v46 = vmax.f32 %v7334_v4, 0.0  ;;  %v7352_v8 = vadd.f32 %v7309_v31, %v1710_v27 }
 0x354   : > { %4641 = vst.msk [vmem:[%s6226_s16 + $0x2d8] sm:$0xf] %vm4458_vm1, %v4384_v25  ;;  %v4256_v12 = vpack.c.bf16 %v4000_v7, %v4000_v7 }
 0x355   : > { %5416 = vmatmul.msk.bf16.gmra.mxu2 %vm1096_vm0, %v5682_v26  ;;  %v3763_v35 = vpop.f32.mrf.mxu3  ;;  %v2493_v58 = vpack.c.bf16 %v2345_v46, %v2344_v49  ;;  %5352 = vmatmul.msk.bf16.gmra.mxu0 %vm1096_vm0, %v5618_v22  ;;  %8543 = vst [vmem:[#allocation19_spill] sm:$0xff] %v7352_v8  ;;  %v8544_v22 = vld [vmem:[#allocation21_spill] sm:$0xff] }
 0x356   : > { %4513 = vst.msk [vmem:[%s6226_s16 + $0xd8] sm:$0xf] %vm4458_vm1, %v4256_v12  ;;  %v3764_v57 = vadd.f32 %v7182_v16, %v3763_v35  ;;  %v2218_v12 = vmax.f32 %v7352_v8, 0.0  ;;  %v2718_v8 = vpop.permute.xlu1 %2717 }
 0x357   : > { %2859 = vrot.lane.b32.xlu2 %v2493_v58, %s5729_s29  ;;  %v3443_v56 = vpop.f32.mrf.mxu1 }
 0x358   : > { %v4129_v52 = vadd.f32 %v3764_v57, %v6674_v1  ;;  %v3444_v33 = vadd.f32 %v7182_v16, %v3443_v56  ;;  %v2030_v26 = vpop.f32.mrf.mxu2 }
 0x359   : > { %v2846_v25 = vpop.permute.xlu0 %2845  ;;  %v7369_v56 = vadd.f32 %v7309_v31, %v2030_v26  ;;  %v8549_v26 = vld [vmem:[#allocation22_spill] sm:$0xff] }
 0x35a   : > { %v4385_v7 = vpack.c.bf16 %v4129_v52, %v4129_v52  ;;  %v4001_v49 = vadd.f32 %v3444_v33, %v8544_v22  ;;  %5536 = vmatmul.msk.bf16.gmra.mxu3 %vm1096_vm0, %v2846_v25  ;;  %v1712_v46 = vpop.f32.mrf.mxu0  ;;  %v8547_v25 = vld [vmem:[#allocation23_spill] sm:$0xff] }
 0x35b   : > { %v7360_v35 = vadd.f32 %v7309_v31, %v1712_v46  ;;  %8546 = vst [vmem:[#allocation21_spill] sm:$0xff] %v7369_v56 }
 0x35c   : > { %4642 = vst.msk [vmem:[%s6226_s16 + $0x2dc] sm:$0xf] %vm4458_vm1, %v4385_v7  ;;  %v4257_v1 = vpack.c.bf16 %v4001_v49, %v4001_v49 }
 0x35d   : > { %8545 = vst [vmem:[#allocation20_spill] sm:$0xff] %v7360_v35  ;;  %v3766_v27 = vpop.f32.mrf.mxu3  ;;  %v2219_v58 = vmax.f32 %v7360_v35, 0.0  ;;  %v5683_v35 = vld [vmem:[%s5778_s26 + $0x3a8] sm:$0xff] }
 0x35e   : > { %4514 = vst.msk [vmem:[%s6226_s16 + $0xdc] sm:$0xf] %vm4458_vm1, %v4257_v1  ;;  %v3767_v57 = vadd.f32 %v7182_v16, %v3766_v27  ;;  %v5619_v1 = vld [vmem:[%s5778_s26 + $0x1a8] sm:$0xff] }
 0x35f   : > { %v3446_v52 = vpop.f32.mrf.mxu1  ;;  %v2430_v33 = vpack.c.bf16 %v2219_v58, %v2218_v12  ;;  %v2346_v58 = vmax.f32 %v7369_v56, 0.0 }
 0x360   : > { %v4130_v22 = vadd.f32 %v3767_v57, %v8547_v25  ;;  %v3447_v46 = vadd.f32 %v7182_v16, %v3446_v52  ;;  %v2032_v7 = vpop.f32.mrf.mxu2 }
 0x361   : > { %v7374_v49 = vadd.f32 %v7309_v31, %v2032_v7  ;;  %2733 = vrot.lane.b32.xlu2 %v2430_v33, %s5729_s29 }
 0x362   : > { %v4386_v27 = vpack.c.bf16 %v4130_v22, %v4130_v22  ;;  %v4002_v48 = vadd.f32 %v3447_v46, %v8549_v26  ;;  %5472 = vmatmul.msk.bf16.gmra.mxu1 %vm1096_vm0, %v2718_v8  ;;  %v1715_v12 = vpop.f32.mrf.mxu0  ;;  %v8551_v46 = vld [vmem:[#allocation5_spill] sm:$0xff]  ;;  %v2848_v26 = vpop.permute.xlu2 %2847 }
 0x363   : > { %8548 = vst [vmem:[#allocation23_spill] sm:$0xff] %v7374_v49  ;;  %v2347_v57 = vmax.f32 %v7374_v49, 0.0  ;;  %v7392_v22 = vadd.f32 %v7309_v31, %v1715_v12  ;;  %v2720_v49 = vpop.permute.xlu0 %2719 }
 0x364   : > { %4643 = vst.msk [vmem:[%s6226_s16 + $0x2e0] sm:$0xf] %vm4458_vm1, %v4386_v27  ;;  %v4258_v52 = vpack.c.bf16 %v4002_v48, %v4002_v48 }
 0x365   : > { %5417 = vmatmul.msk.bf16.gmra.mxu2 %vm1096_vm0, %v5683_v35  ;;  %v3768_v25 = vpop.f32.mrf.mxu3  ;;  %v2494_v7 = vpack.c.bf16 %v2347_v57, %v2346_v58  ;;  %5353 = vmatmul.msk.bf16.gmra.mxu0 %vm1096_vm0, %v5619_v1  ;;  %8550 = vst [vmem:[#allocation22_spill] sm:$0xff] %v7392_v22  ;;  %v8552_v1 = vld [vmem:[#allocation2_spill] sm:$0xff] }
 0x366   : > { %4515 = vst.msk [vmem:[%s6226_s16 + $0xe0] sm:$0xf] %vm4458_vm1, %v4258_v52  ;;  %v3769_v33 = vadd.f32 %v7182_v16, %v3768_v25  ;;  %v2220_v25 = vmax.f32 %v7392_v22, 0.0 }
 0x367   : > { %2861 = vrot.lane.b32.xlu1 %v2494_v7, %s5729_s29  ;;  %v3448_v8 = vpop.f32.mrf.mxu1 }
 0x368   : > { %v4131_v48 = vadd.f32 %v3769_v33, %v8551_v46  ;;  %v3449_v35 = vadd.f32 %v7182_v16, %v3448_v8  ;;  %v2035_v27 = vpop.f32.mrf.mxu2 }
 0x36a   : > { %v4387_v58 = vpack.c.bf16 %v4131_v48, %v4131_v48  ;;  %v4003_v57 = vadd.f32 %v3449_v35, %v8552_v1  ;;  %5537 = vmatmul.msk.bf16.gmra.mxu3 %vm1096_vm0, %v2848_v26  ;;  %v1717_v52 = vpop.f32.mrf.mxu0  ;;  %v7409_v48 = vadd.f32 %v7309_v31, %v2035_v27  ;;  %v8555_v1 = vld [vmem:[#allocation4_spill] sm:$0xff]  ;;  %v8557_v27 = vld [vmem:[#allocation3_spill] sm:$0xff] }
 0x36b   : > { %v7400_v7 = vadd.f32 %v7309_v31, %v1717_v52 }
 0x36c   : > { %4644 = vst.msk [vmem:[%s6226_s16 + $0x2e4] sm:$0xf] %vm4458_vm1, %v4387_v58  ;;  %v4259_v12 = vpack.c.bf16 %v4003_v57, %v4003_v57 }
 0x36d   : > { %8553 = vst [vmem:[#allocation5_spill] sm:$0xff] %v7400_v7  ;;  %v3771_v33 = vpop.f32.mrf.mxu3  ;;  %v2221_v8 = vmax.f32 %v7400_v7, 0.0  ;;  %v5684_v7 = vld [vmem:[%s5778_s26 + $0x3b0] sm:$0xff] }
 0x36e   : > { %4516 = vst.msk [vmem:[%s6226_s16 + $0xe4] sm:$0xf] %vm4458_vm1, %v4259_v12  ;;  %v3772_v46 = vadd.f32 %v7182_v16, %v3771_v33  ;;  %v5620_v12 = vld [vmem:[%s5778_s26 + $0x1b0] sm:$0xff] }
 0x36f   : > { %8554 = vst [vmem:[#allocation2_spill] sm:$0xff] %v7409_v48  ;;  %v3451_v35 = vpop.f32.mrf.mxu1  ;;  %v2431_v26 = vpack.c.bf16 %v2221_v8, %v2220_v25  ;;  %v2348_v8 = vmax.f32 %v7409_v48, 0.0 }
 0x370   : > { %v4132_v52 = vadd.f32 %v3772_v46, %v8555_v1  ;;  %v3452_v22 = vadd.f32 %v7182_v16, %v3451_v35  ;;  %v2037_v58 = vpop.f32.mrf.mxu2 }
 0x371   : > { %v7414_v57 = vadd.f32 %v7309_v31, %v2037_v58  ;;  %2735 = vrot.lane.b32.xlu1 %v2431_v26, %s5729_s29 }
 0x372   : > { %v4388_v33 = vpack.c.bf16 %v4132_v52, %v4132_v52  ;;  %v4004_v56 = vadd.f32 %v3452_v22, %v8557_v27  ;;  %5473 = vmatmul.msk.bf16.gmra.mxu1 %vm1096_vm0, %v2720_v49  ;;  %v1720_v25 = vpop.f32.mrf.mxu0  ;;  %v8559_v52 = vld [vmem:[#allocation9_spill] sm:$0xff] }
 0x373   : > { %8556 = vst [vmem:[#allocation4_spill] sm:$0xff] %v7414_v57  ;;  %v2349_v46 = vmax.f32 %v7414_v57, 0.0  ;;  %v7432_v26 = vadd.f32 %v7309_v31, %v1720_v25  ;;  %v2722_v57 = vpop.permute.xlu2 %2721 }
 0x374   : > { %4645 = vst.msk [vmem:[%s6226_s16 + $0x2e8] sm:$0xf] %vm4458_vm1, %v4388_v33  ;;  %v4260_v35 = vpack.c.bf16 %v4004_v56, %v4004_v56 }
 0x375   : > { %5418 = vmatmul.msk.bf16.gmra.mxu2 %vm1096_vm0, %v5684_v7  ;;  %v3773_v1 = vpop.f32.mrf.mxu3  ;;  %v2495_v58 = vpack.c.bf16 %v2349_v46, %v2348_v8  ;;  %5354 = vmatmul.msk.bf16.gmra.mxu0 %vm1096_vm0, %v5620_v12  ;;  %8558 = vst [vmem:[#allocation3_spill] sm:$0xff] %v7432_v26  ;;  %v8560_v12 = vld [vmem:[#allocation6_spill] sm:$0xff] }
 0x376   : > { %4517 = vst.msk [vmem:[%s6226_s16 + $0xe8] sm:$0xf] %vm4458_vm1, %v4260_v35  ;;  %v3774_v22 = vadd.f32 %v7182_v16, %v3773_v1  ;;  %v2222_v1 = vmax.f32 %v7432_v26, 0.0 }
 0x377   : > { %2863 = vrot.lane.b32.xlu0 %v2495_v58, %s5729_s29  ;;  %v3453_v49 = vpop.f32.mrf.mxu1 }
 0x378   : > { %v4133_v56 = vadd.f32 %v3774_v22, %v8559_v52  ;;  %v3454_v7 = vadd.f32 %v7182_v16, %v3453_v49  ;;  %v2040_v33 = vpop.f32.mrf.mxu2 }
 0x379   : > { %v2850_v27 = vpop.permute.xlu1 %2849 }
 0x37a   : > { %v4389_v8 = vpack.c.bf16 %v4133_v56, %v4133_v56  ;;  %v4005_v46 = vadd.f32 %v3454_v7, %v8560_v12  ;;  %5538 = vmatmul.msk.bf16.gmra.mxu3 %vm1096_vm0, %v2850_v27  ;;  %v1722_v35 = vpop.f32.mrf.mxu0  ;;  %v7449_v56 = vadd.f32 %v7309_v31, %v2040_v33  ;;  %v8562_v12 = vld [vmem:[#allocation8_spill] sm:$0xff]  ;;  %v8564_v33 = vld [vmem:[#allocation7_spill] sm:$0xff] }
 0x37b   : > { %v7440_v58 = vadd.f32 %v7309_v31, %v1722_v35 }
 0x37c   : > { %4646 = vst.msk [vmem:[%s6226_s16 + $0x2ec] sm:$0xf] %vm4458_vm1, %v4389_v8  ;;  %v4261_v25 = vpack.c.bf16 %v4005_v46, %v4005_v46 }
 0x37d   : > { %8561 = vst [vmem:[#allocation9_spill] sm:$0xff] %v7440_v58  ;;  %v3776_v22 = vpop.f32.mrf.mxu3  ;;  %v2223_v49 = vmax.f32 %v7440_v58, 0.0  ;;  %v5685_v58 = vld [vmem:[%s5778_s26 + $0x3b8] sm:$0xff] }
 0x37e   : > { %4518 = vst.msk [vmem:[%s6226_s16 + $0xec] sm:$0xf] %vm4458_vm1, %v4261_v25  ;;  %v3777_v52 = vadd.f32 %v7182_v16, %v3776_v22  ;;  %v5621_v25 = vld [vmem:[%s5778_s26 + $0x1b8] sm:$0xff] }
 0x37f   : > { %v3456_v7 = vpop.f32.mrf.mxu1  ;;  %v2432_v27 = vpack.c.bf16 %v2223_v49, %v2222_v1  ;;  %v2350_v49 = vmax.f32 %v7449_v56, 0.0 }
 0x380   : > { %v4134_v35 = vadd.f32 %v3777_v52, %v8562_v12  ;;  %v3457_v26 = vadd.f32 %v7182_v16, %v3456_v7  ;;  %v2042_v8 = vpop.f32.mrf.mxu2 }
 0x381   : > { %v7454_v46 = vadd.f32 %v7309_v31, %v2042_v8  ;;  %2737 = vrot.lane.b32.xlu0 %v2432_v27, %s5729_s29 }
 0x382   : > { %v4390_v22 = vpack.c.bf16 %v4134_v35, %v4134_v35  ;;  %v4006_v48 = vadd.f32 %v3457_v26, %v8564_v33  ;;  %5474 = vmatmul.msk.bf16.gmra.mxu1 %vm1096_vm0, %v2722_v57  ;;  %v1725_v1 = vpop.f32.mrf.mxu0  ;;  %v8566_v35 = vld [vmem:[#allocation13_spill] sm:$0xff] }
 0x383   : > { %8563 = vst [vmem:[#allocation6_spill] sm:$0xff] %v7454_v46  ;;  %v2351_v52 = vmax.f32 %v7454_v46, 0.0  ;;  %v7472_v27 = vadd.f32 %v7309_v31, %v1725_v1 }
 0x384   : > { %4647 = vst.msk [vmem:[%s6226_s16 + $0x2f0] sm:$0xf] %vm4458_vm1, %v4390_v22  ;;  %v4262_v7 = vpack.c.bf16 %v4006_v48, %v4006_v48 }
 0x385   : > { %5419 = vmatmul.msk.bf16.gmra.mxu2 %vm1096_vm0, %v5685_v58  ;;  %v3778_v12 = vpop.f32.mrf.mxu3  ;;  %v2496_v8 = vpack.c.bf16 %v2351_v52, %v2350_v49  ;;  %5355 = vmatmul.msk.bf16.gmra.mxu0 %vm1096_vm0, %v5621_v25  ;;  %8565 = vst [vmem:[#allocation8_spill] sm:$0xff] %v7472_v27  ;;  %v8567_v25 = vld [vmem:[#allocation10_spill] sm:$0xff] }
 0x386   : > { %4519 = vst.msk [vmem:[%s6226_s16 + $0xf0] sm:$0xf] %vm4458_vm1, %v4262_v7  ;;  %v3779_v26 = vadd.f32 %v7182_v16, %v3778_v12  ;;  %v2224_v12 = vmax.f32 %v7472_v27, 0.0  ;;  %v2724_v27 = vpop.permute.xlu1 %2723 }
 0x387   : > { %2865 = vrot.lane.b32.xlu2 %v2496_v8, %s5729_s29  ;;  %v3458_v57 = vpop.f32.mrf.mxu1 }
 0x388   : > { %v4135_v48 = vadd.f32 %v3779_v26, %v8566_v35  ;;  %v3459_v58 = vadd.f32 %v7182_v16, %v3458_v57  ;;  %v2045_v22 = vpop.f32.mrf.mxu2 }
 0x389   : > { %v2852_v33 = vpop.permute.xlu0 %2851 }
 0x38a   : > { %v4391_v49 = vpack.c.bf16 %v4135_v48, %v4135_v48  ;;  %v4007_v52 = vadd.f32 %v3459_v58, %v8567_v25  ;;  %5539 = vmatmul.msk.bf16.gmra.mxu3 %vm1096_vm0, %v2852_v33  ;;  %v1727_v7 = vpop.f32.mrf.mxu0  ;;  %v7489_v48 = vadd.f32 %v7309_v31, %v2045_v22  ;;  %v8570_v22 = vld [vmem:[#allocation11_spill] sm:$0xff] }
 0x38b   : > { %v7480_v8 = vadd.f32 %v7309_v31, %v1727_v7 }
 0x38c   : > { %4648 = vst.msk [vmem:[%s6226_s16 + $0x2f4] sm:$0xf] %vm4458_vm1, %v4391_v49  ;;  %v4263_v1 = vpack.c.bf16 %v4007_v52, %v4007_v52 }
 0x38d   : > { %8568 = vst [vmem:[#allocation7_spill] sm:$0xff] %v7480_v8  ;;  %v3781_v26 = vpop.f32.mrf.mxu3  ;;  %v2225_v57 = vmax.f32 %v7480_v8, 0.0  ;;  %v5686_v8 = vld [vmem:[%s5778_s26 + $0x3c0] sm:$0xff] }
 0x38e   : > { %4520 = vst.msk [vmem:[%s6226_s16 + $0xf4] sm:$0xf] %vm4458_vm1, %v4263_v1  ;;  %v3782_v35 = vadd.f32 %v7182_v16, %v3781_v26  ;;  %v5622_v1 = vld [vmem:[%s5778_s26 + $0x1c0] sm:$0xff] }
 0x38f   : > { %v3461_v58 = vpop.f32.mrf.mxu1  ;;  %v2433_v33 = vpack.c.bf16 %v2225_v57, %v2224_v12 }
 0x390   : > { %v4136_v25 = vadd.f32 %v3782_v35, %v6839_v54  ;;  %v3462_v7 = vadd.f32 %v7182_v16, %v3461_v58  ;;  %v2047_v49 = vpop.f32.mrf.mxu2  ;;  %v2352_v54 = vmax.f32 %v7489_v48, 0.0 }
 0x391   : > { %v7494_v52 = vadd.f32 %v7309_v31, %v2047_v49  ;;  %2739 = vrot.lane.b32.xlu2 %v2433_v33, %s5729_s29 }
 0x392   : > { %v4392_v26 = vpack.c.bf16 %v4136_v25, %v4136_v25  ;;  %v4008_v46 = vadd.f32 %v3462_v7, %v8570_v22  ;;  %5475 = vmatmul.msk.bf16.gmra.mxu1 %vm1096_vm0, %v2724_v27  ;;  %v1730_v12 = vpop.f32.mrf.mxu0  ;;  %v8572_v7 = vld [vmem:[#allocation12_spill] sm:$0xff]  ;;  %v2854_v22 = vpop.permute.xlu2 %2853 }
 0x393   : > { %8569 = vst [vmem:[#allocation13_spill] sm:$0xff] %v7494_v52  ;;  %v2353_v57 = vmax.f32 %v7494_v52, 0.0  ;;  %v7512_v25 = vadd.f32 %v7309_v31, %v1730_v12 }
 0x394   : > { %4649 = vst.msk [vmem:[%s6226_s16 + $0x2f8] sm:$0xf] %vm4458_vm1, %v4392_v26  ;;  %v4264_v35 = vpack.c.bf16 %v4008_v46, %v4008_v46 }
 0x395   : > { %5420 = vmatmul.msk.bf16.gmra.mxu2 %vm1096_vm0, %v5686_v8  ;;  %v3783_v58 = vpop.f32.mrf.mxu3  ;;  %v2497_v49 = vpack.c.bf16 %v2353_v57, %v2352_v54  ;;  %5356 = vmatmul.msk.bf16.gmra.mxu0 %vm1096_vm0, %v5622_v1  ;;  %8571 = vst [vmem:[#allocation10_spill] sm:$0xff] %v7512_v25  ;;  %v8573_v1 = vld [vmem:[#allocation14_spill] sm:$0xff] }
 0x396   : > { %4521 = vst.msk [vmem:[%s6226_s16 + $0xf8] sm:$0xf] %vm4458_vm1, %v4264_v35  ;;  %v3784_v33 = vadd.f32 %v7182_v16, %v3783_v58  ;;  %v2226_v58 = vmax.f32 %v7512_v25, 0.0  ;;  %v2726_v25 = vpop.permute.xlu0 %2725 }
 0x397   : > { %2867 = vrot.lane.b32.xlu1 %v2497_v49, %s5729_s29  ;;  %v3463_v27 = vpop.f32.mrf.mxu1 }
 0x398   : > { %v4137_v46 = vadd.f32 %v3784_v33, %v8572_v7  ;;  %v3464_v8 = vadd.f32 %v7182_v16, %v3463_v27  ;;  %v2050_v26 = vpop.f32.mrf.mxu2 }
 0x39a   : > { %v4393_v54 = vpack.c.bf16 %v4137_v46, %v4137_v46  ;;  %v4009_v57 = vadd.f32 %v3464_v8, %v8573_v1  ;;  %5540 = vmatmul.msk.bf16.gmra.mxu3 %vm1096_vm0, %v2854_v22  ;;  %v1732_v35 = vpop.f32.mrf.mxu0  ;;  %v7529_v46 = vadd.f32 %v7309_v31, %v2050_v26  ;;  %v8575_v26 = vld [vmem:[#allocation17_spill] sm:$0xff] }
 0x39b   : > { %v7520_v49 = vadd.f32 %v7309_v31, %v1732_v35 }
 0x39c   : > { %4650 = vst.msk [vmem:[%s6226_s16 + $0x2fc] sm:$0xf] %vm4458_vm1, %v4393_v54  ;;  %v4265_v12 = vpack.c.bf16 %v4009_v57, %v4009_v57 }
 0x39d   : > { %8574 = vst [vmem:[#allocation11_spill] sm:$0xff] %v7520_v49  ;;  %v3786_v33 = vpop.f32.mrf.mxu3  ;;  %v2227_v27 = vmax.f32 %v7520_v49, 0.0  ;;  %v5687_v49 = vld [vmem:[%s5778_s26 + $0x3c8] sm:$0xff] }
 0x39e   : > { %4522 = vst.msk [vmem:[%s6226_s16 + $0xfc] sm:$0xf] %vm4458_vm1, %v4265_v12  ;;  %v3787_v7 = vadd.f32 %v7182_v16, %v3786_v33  ;;  %v5623_v12 = vld [vmem:[%s5778_s26 + $0x1c8] sm:$0xff] }
 0x39f   : > { %v3466_v8 = vpop.f32.mrf.mxu1  ;;  %v2434_v22 = vpack.c.bf16 %v2227_v27, %v2226_v58 }
 0x3a0   : > { %v4138_v1 = vadd.f32 %v3787_v7, %v6879_v23  ;;  %v3467_v35 = vadd.f32 %v7182_v16, %v3466_v8  ;;  %v2052_v54 = vpop.f32.mrf.mxu2  ;;  %v2354_v23 = vmax.f32 %v7529_v46, 0.0 }
 0x3a1   : > { %v7534_v57 = vadd.f32 %v7309_v31, %v2052_v54  ;;  %2741 = vrot.lane.b32.xlu1 %v2434_v22, %s5729_s29 }
 0x3a2   : > { %v4394_v33 = vpack.c.bf16 %v4138_v1, %v4138_v1  ;;  %v4010_v52 = vadd.f32 %v3467_v35, %v8575_v26  ;;  %5476 = vmatmul.msk.bf16.gmra.mxu1 %vm1096_vm0, %v2726_v25  ;;  %v1735_v58 = vpop.f32.mrf.mxu0 }
 0x3a3   : > { %v2355_v27 = vmax.f32 %v7534_v57, 0.0  ;;  %v7552_v1 = vadd.f32 %v7309_v31, %v1735_v58 }
 0x3a4   : > { %4651 = vst.msk [vmem:[%s6226_s16 + $0x300] sm:$0xf] %vm4458_vm1, %v4394_v33  ;;  %v4266_v7 = vpack.c.bf16 %v4010_v52, %v4010_v52 }
 0x3a5   : > { %5421 = vmatmul.msk.bf16.gmra.mxu2 %vm1096_vm0, %v5687_v49  ;;  %v3788_v8 = vpop.f32.mrf.mxu3  ;;  %v2498_v54 = vpack.c.bf16 %v2355_v27, %v2354_v23  ;;  %5357 = vmatmul.msk.bf16.gmra.mxu0 %vm1096_vm0, %v5623_v12  ;;  %v8576_v12 = vld [vmem:[#allocation15_spill] sm:$0xff] }
 0x3a6   : > { %4523 = vst.msk [vmem:[%s6226_s16 + $0x100] sm:$0xf] %vm4458_vm1, %v4266_v7  ;;  %v3789_v22 = vadd.f32 %v7182_v16, %v3788_v8  ;;  %v2228_v7 = vmax.f32 %v7552_v1, 0.0 }
 0x3a7   : > { %2869 = vrot.lane.b32.xlu0 %v2498_v54, %s5729_s29  ;;  %v3468_v25 = vpop.f32.mrf.mxu1 }
 0x3a8   : > { %v4139_v52 = vadd.f32 %v3789_v22, %v6884_v32  ;;  %v3469_v49 = vadd.f32 %v7182_v16, %v3468_v25  ;;  %v2055_v35 = vpop.f32.mrf.mxu2 }
 0x3a9   : > { %v2856_v33 = vpop.permute.xlu1 %2855  ;;  %v7569_v25 = vadd.f32 %v7309_v31, %v2055_v35 }
 0x3aa   : > { %v4395_v26 = vpack.c.bf16 %v4139_v52, %v4139_v52  ;;  %v4011_v23 = vadd.f32 %v3469_v49, %v8576_v12  ;;  %5541 = vmatmul.msk.bf16.gmra.mxu3 %vm1096_vm0, %v2856_v33  ;;  %v1737_v27 = vpop.f32.mrf.mxu0 }
 0x3ab   : > { %v7560_v8 = vadd.f32 %v7309_v31, %v1737_v27  ;;  %v2728_v27 = vpop.permute.xlu2 %2727 }
 0x3ac   : > { %4652 = vst.msk [vmem:[%s6226_s16 + $0x304] sm:$0xf] %vm4458_vm1, %v4395_v26  ;;  %v4267_v32 = vpack.c.bf16 %v4011_v23, %v4011_v23 }
 0x3ad   : > { %8577 = vst [vmem:[#allocation12_spill] sm:$0xff] %v7560_v8  ;;  %v3791_v58 = vpop.f32.mrf.mxu3  ;;  %v2229_v54 = vmax.f32 %v7560_v8, 0.0  ;;  %v5688_v8 = vld [vmem:[%s5778_s26 + $0x3d0] sm:$0xff] }
 0x3ae   : > { %4524 = vst.msk [vmem:[%s6226_s16 + $0x104] sm:$0xf] %vm4458_vm1, %v4267_v32  ;;  %v3792_v22 = vadd.f32 %v7182_v16, %v3791_v58  ;;  %v5624_v32 = vld [vmem:[%s5778_s26 + $0x1d0] sm:$0xff] }
 0x3af   : > { %v3471_v52 = vpop.f32.mrf.mxu1  ;;  %v2435_v49 = vpack.c.bf16 %v2229_v54, %v2228_v7 }
 0x3b0   : > { %v4140_v33 = vadd.f32 %v3792_v22, %v6919_v17  ;;  %v3472_v12 = vadd.f32 %v7182_v16, %v3471_v52  ;;  %v2057_v26 = vpop.f32.mrf.mxu2  ;;  %v2356_v17 = vmax.f32 %v7569_v25, 0.0 }
 0x3b1   : > { %v7574_v23 = vadd.f32 %v7309_v31, %v2057_v26  ;;  %2743 = vrot.lane.b32.xlu0 %v2435_v49, %s5729_s29 }
 0x3b2   : > { %v4396_v58 = vpack.c.bf16 %v4140_v33, %v4140_v33  ;;  %v4012_v35 = vadd.f32 %v3472_v12, %v6902_v51  ;;  %5477 = vmatmul.msk.bf16.gmra.mxu1 %vm1096_vm0, %v2728_v27  ;;  %v1740_v7 = vpop.f32.mrf.mxu0 }
 0x3b3   : > { %v2357_v54 = vmax.f32 %v7574_v23, 0.0  ;;  %v7592_v33 = vadd.f32 %v7309_v31, %v1740_v7 }
 0x3b4   : > { %4653 = vst.msk [vmem:[%s6226_s16 + $0x308] sm:$0xf] %vm4458_vm1, %v4396_v58  ;;  %v4268_v22 = vpack.c.bf16 %v4012_v35, %v4012_v35 }
 0x3b5   : > { %5422 = vmatmul.msk.bf16.gmra.mxu2 %vm1096_vm0, %v5688_v8  ;;  %v3793_v52 = vpop.f32.mrf.mxu3  ;;  %v2499_v26 = vpack.c.bf16 %v2357_v54, %v2356_v17  ;;  %5358 = vmatmul.msk.bf16.gmra.mxu0 %vm1096_vm0, %v5624_v32  ;;  %v8578_v32 = vld [vmem:[#allocation18_spill] sm:$0xff] }
 0x3b6   : > { %4525 = vst.msk [vmem:[%s6226_s16 + $0x108] sm:$0xf] %vm4458_vm1, %v4268_v22  ;;  %v3794_v51 = vadd.f32 %v7182_v16, %v3793_v52  ;;  %v2230_v22 = vmax.f32 %v7592_v33, 0.0 }
 0x3b7   : > { %2871 = vrot.lane.b32.xlu2 %v2499_v26, %s5729_s29  ;;  %v3473_v49 = vpop.f32.mrf.mxu1 }
 0x3b8   : > { %v4141_v12 = vadd.f32 %v3794_v51, %v6924_v24  ;;  %v3474_v8 = vadd.f32 %v7182_v16, %v3473_v49  ;;  %v2060_v27 = vpop.f32.mrf.mxu2 }
 0x3b9   : > { %v2858_v58 = vpop.permute.xlu0 %2857  ;;  %v7609_v49 = vadd.f32 %v7309_v31, %v2060_v27 }
 0x3ba   : > { %v4397_v35 = vpack.c.bf16 %v4141_v12, %v4141_v12  ;;  %v4013_v17 = vadd.f32 %v3474_v8, %v8578_v32  ;;  %5542 = vmatmul.msk.bf16.gmra.mxu3 %vm1096_vm0, %v2858_v58  ;;  %v1742_v54 = vpop.f32.mrf.mxu0 }
 0x3bb   : > { %v7600_v52 = vadd.f32 %v7309_v31, %v1742_v54  ;;  %v2730_v54 = vpop.permute.xlu1 %2729 }
 0x3bc   : > { %4654 = vst.msk [vmem:[%s6226_s16 + $0x30c] sm:$0xf] %vm4458_vm1, %v4397_v35  ;;  %v4269_v24 = vpack.c.bf16 %v4013_v17, %v4013_v17 }
 0x3bd   : > { %8579 = vst [vmem:[#allocation14_spill] sm:$0xff] %v7600_v52  ;;  %v3796_v7 = vpop.f32.mrf.mxu3  ;;  %v2231_v26 = vmax.f32 %v7600_v52, 0.0  ;;  %v5689_v52 = vld [vmem:[%s5778_s26 + $0x3d8] sm:$0xff] }
 0x3be   : > { %4526 = vst.msk [vmem:[%s6226_s16 + $0x10c] sm:$0xf] %vm4458_vm1, %v4269_v24  ;;  %v3797_v51 = vadd.f32 %v7182_v16, %v3796_v7  ;;  %v5625_v24 = vld [vmem:[%s5778_s26 + $0x1d8] sm:$0xff] }
 0x3bf   : > { %v3476_v12 = vpop.f32.mrf.mxu1  ;;  %v2436_v8 = vpack.c.bf16 %v2231_v26, %v2230_v22 }
 0x3c0   : > { %v4142_v58 = vadd.f32 %v3797_v51, %v6959_v38  ;;  %v3477_v32 = vadd.f32 %v7182_v16, %v3476_v12  ;;  %v2062_v35 = vpop.f32.mrf.mxu2  ;;  %v2358_v38 = vmax.f32 %v7609_v49, 0.0 }
 0x3c1   : > { %v7614_v17 = vadd.f32 %v7309_v31, %v2062_v35  ;;  %2745 = vrot.lane.b32.xlu2 %v2436_v8, %s5729_s29 }
 0x3c2   : > { %v4398_v7 = vpack.c.bf16 %v4142_v58, %v4142_v58  ;;  %v4014_v27 = vadd.f32 %v3477_v32, %v6942_v6  ;;  %5478 = vmatmul.msk.bf16.gmra.mxu1 %vm1096_vm0, %v2730_v54  ;;  %v1745_v22 = vpop.f32.mrf.mxu0 }
 0x3c3   : > { %v2359_v26 = vmax.f32 %v7614_v17, 0.0  ;;  %v7632_v58 = vadd.f32 %v7309_v31, %v1745_v22 }
 0x3c4   : > { %4655 = vst.msk [vmem:[%s6226_s16 + $0x310] sm:$0xf] %vm4458_vm1, %v4398_v7  ;;  %v4270_v51 = vpack.c.bf16 %v4014_v27, %v4014_v27  ;;  %v2860_v7 = vpop.permute.xlu2 %2859 }
 0x3c5   : > { %5423 = vmatmul.msk.bf16.gmra.mxu2 %vm1096_vm0, %v5689_v52  ;;  %v3798_v12 = vpop.f32.mrf.mxu3  ;;  %v2500_v35 = vpack.c.bf16 %v2359_v26, %v2358_v38  ;;  %5359 = vmatmul.msk.bf16.gmra.mxu0 %vm1096_vm0, %v5625_v24  ;;  %v2232_v26 = vmax.f32 %v7632_v58, 0.0 }
 0x3c6   : > { %4527 = vst.msk [vmem:[%s6226_s16 + $0x110] sm:$0xf] %vm4458_vm1, %v4270_v51  ;;  %v3799_v6 = vadd.f32 %v7182_v16, %v3798_v12 }
 0x3c7   : > { %2873 = vrot.lane.b32.xlu1 %v2500_v35, %s5729_s29  ;;  %v3478_v8 = vpop.f32.mrf.mxu1 }
 0x3c8   : > { %v4143_v32 = vadd.f32 %v3799_v6, %v6964_v61  ;;  %v3479_v52 = vadd.f32 %v7182_v16, %v3478_v8  ;;  %v2065_v54 = vpop.f32.mrf.mxu2 }
 0x3c9   : > { %v7649_v35 = vadd.f32 %v7309_v31, %v2065_v54 }
 0x3ca   : > { %v4399_v27 = vpack.c.bf16 %v4143_v32, %v4143_v32  ;;  %v4015_v24 = vadd.f32 %v3479_v52, %v6950_v59  ;;  %5543 = vmatmul.msk.bf16.gmra.mxu3 %vm1096_vm0, %v2860_v7  ;;  %v1747_v38 = vpop.f32.mrf.mxu0 }
 0x3cb   : > { %v7640_v51 = vadd.f32 %v7309_v31, %v1747_v38  ;;  %v5690_v38 = vld [vmem:[%s5778_s26 + $0x3e0] sm:$0xff] }
 0x3cc   : > { %4656 = vst.msk [vmem:[%s6226_s16 + $0x314] sm:$0xf] %vm4458_vm1, %v4399_v27  ;;  %v4271_v61 = vpack.c.bf16 %v4015_v24, %v4015_v24  ;;  %v2732_v27 = vpop.permute.xlu0 %2731 }
 0x3cd   : > { %v3801_v22 = vpop.f32.mrf.mxu3  ;;  %v2233_v12 = vmax.f32 %v7640_v51, 0.0 }
 0x3ce   : > { %4528 = vst.msk [vmem:[%s6226_s16 + $0x114] sm:$0xf] %vm4458_vm1, %v4271_v61  ;;  %v3802_v59 = vadd.f32 %v7182_v16, %v3801_v22  ;;  %v5626_v61 = vld [vmem:[%s5778_s26 + $0x1e0] sm:$0xff] }
 0x3cf   : > { %v3481_v6 = vpop.f32.mrf.mxu1  ;;  %v2437_v8 = vpack.c.bf16 %v2233_v12, %v2232_v26 }
 0x3d0   : > { %v4144_v32 = vadd.f32 %v3802_v59, %v6999_v47  ;;  %v3482_v52 = vadd.f32 %v7182_v16, %v3481_v6  ;;  %v2067_v7 = vpop.f32.mrf.mxu2  ;;  %v2360_v47 = vmax.f32 %v7649_v35, 0.0 }
 0x3d1   : > { %v7654_v24 = vadd.f32 %v7309_v31, %v2067_v7  ;;  %2747 = vrot.lane.b32.xlu1 %v2437_v8, %s5729_s29 }
 0x3d2   : > { %v4400_v22 = vpack.c.bf16 %v4144_v32, %v4144_v32  ;;  %v4016_v54 = vadd.f32 %v3482_v52, %v6982_v41  ;;  %5479 = vmatmul.msk.bf16.gmra.mxu1 %vm1096_vm0, %v2732_v27  ;;  %v1750_v26 = vpop.f32.mrf.mxu0  ;;  %v7672_v41 = vld [vmem:[%s8414_s2 + $0x1] ss:$0 sm:$0xff] }
 0x3d3   : > { %v2361_v16 = vmax.f32 %v7654_v24, 0.0  ;;  %v7677_v52 = vadd.f32 %v7309_v31, %v1750_v26 }
 0x3d4   : > { %4657 = vst.msk [vmem:[%s6226_s16 + $0x318] sm:$0xf] %vm4458_vm1, %v4400_v22  ;;  %v4272_v12 = vpack.c.bf16 %v4016_v54, %v4016_v54 }
 0x3d5   : > { %5424 = vmatmul.msk.bf16.gmra.mxu2 %vm1096_vm0, %v5690_v38  ;;  %v3803_v59 = vpop.f32.mrf.mxu3  ;;  %v2501_v6 = vpack.c.bf16 %v2361_v16, %v2360_v47  ;;  %5360 = vmatmul.msk.bf16.gmra.mxu0 %vm1096_vm0, %v5626_v61  ;;  %v2234_v16 = vmax.f32 %v7677_v52, 0.0 }
 0x3d6   : > { %4529 = vst.msk [vmem:[%s6226_s16 + $0x118] sm:$0xf] %vm4458_vm1, %v4272_v12  ;;  %v3804_v8 = vadd.f32 %v7672_v41, %v3803_v59 }
 0x3d7   : > { %2875 = vrot.lane.b32.xlu0 %v2501_v6, %s5729_s29  ;;  %v3483_v32 = vpop.f32.mrf.mxu1 }
 0x3d8   : > { %v4145_v7 = vadd.f32 %v3804_v8, %v7004_v28  ;;  %v3484_v27 = vadd.f32 %v7672_v41, %v3483_v32  ;;  %v2070_v38 = vpop.f32.mrf.mxu2 }
 0x3d9   : > { %v2862_v61 = vpop.permute.xlu1 %2861  ;;  %v7694_v6 = vadd.f32 %v7309_v31, %v2070_v38 }
 0x3da   : > { %v4401_v22 = vpack.c.bf16 %v4145_v7, %v4145_v7  ;;  %v4017_v54 = vadd.f32 %v3484_v27, %v6990_v18  ;;  %5544 = vmatmul.msk.bf16.gmra.mxu3 %vm1096_vm0, %v2862_v61  ;;  %v1752_v47 = vpop.f32.mrf.mxu0 }
 0x3db   : > { %v7685_v12 = vadd.f32 %v7309_v31, %v1752_v47  ;;  %v5691_v47 = vld [vmem:[%s5778_s26 + $0x3e8] sm:$0xff] }
 0x3dc   : > { %4658 = vst.msk [vmem:[%s6226_s16 + $0x31c] sm:$0xf] %vm4458_vm1, %v4401_v22  ;;  %v4273_v28 = vpack.c.bf16 %v4017_v54, %v4017_v54  ;;  %v2734_v22 = vpop.permute.xlu2 %2733 }
 0x3dd   : > { %v3806_v26 = vpop.f32.mrf.mxu3  ;;  %v2235_v59 = vmax.f32 %v7685_v12, 0.0 }
 0x3de   : > { %4530 = vst.msk [vmem:[%s6226_s16 + $0x11c] sm:$0xf] %vm4458_vm1, %v4273_v28  ;;  %v3807_v18 = vadd.f32 %v7672_v41, %v3806_v26  ;;  %v5627_v28 = vld [vmem:[%s5778_s26 + $0x1e8] sm:$0xff] }
 0x3df   : > { %v3486_v8 = vpop.f32.mrf.mxu1  ;;  %v2438_v32 = vpack.c.bf16 %v2235_v59, %v2234_v16 }
 0x3e0   : > { %v4146_v7 = vadd.f32 %v3807_v18, %v7039_v42  ;;  %v3487_v27 = vadd.f32 %v7672_v41, %v3486_v8  ;;  %v2072_v61 = vpop.f32.mrf.mxu2  ;;  %v2362_v42 = vmax.f32 %v7694_v6, 0.0 }
 0x3e1   : > { %v7699_v54 = vadd.f32 %v7309_v31, %v2072_v61  ;;  %2749 = vrot.lane.b32.xlu0 %v2438_v32, %s5729_s29 }
 0x3e2   : > { %v4402_v26 = vpack.c.bf16 %v4146_v7, %v4146_v7  ;;  %v4018_v38 = vadd.f32 %v3487_v27, %v7022_v43  ;;  %5480 = vmatmul.msk.bf16.gmra.mxu1 %vm1096_vm0, %v2734_v22  ;;  %v1755_v16 = vpop.f32.mrf.mxu0 }
 0x3e3   : > { %v2363_v59 = vmax.f32 %v7699_v54, 0.0  ;;  %v7717_v7 = vadd.f32 %v7309_v31, %v1755_v16 }
 0x3e4   : > { %4659 = vst.msk [vmem:[%s6226_s16 + $0x320] sm:$0xf] %vm4458_vm1, %v4402_v26  ;;  %v4274_v18 = vpack.c.bf16 %v4018_v38, %v4018_v38 }
 0x3e5   : > { %5425 = vmatmul.msk.bf16.gmra.mxu2 %vm1096_vm0, %v5691_v47  ;;  %v3808_v8 = vpop.f32.mrf.mxu3  ;;  %v2502_v61 = vpack.c.bf16 %v2363_v59, %v2362_v42  ;;  %5361 = vmatmul.msk.bf16.gmra.mxu0 %vm1096_vm0, %v5627_v28  ;;  %v2236_v59 = vmax.f32 %v7717_v7, 0.0 }
 0x3e6   : > { %4531 = vst.msk [vmem:[%s6226_s16 + $0x120] sm:$0xf] %vm4458_vm1, %v4274_v18  ;;  %v3809_v43 = vadd.f32 %v7672_v41, %v3808_v8 }
 0x3e7   : > { %2877 = vrot.lane.b32.xlu2 %v2502_v61, %s5729_s29  ;;  %v3488_v32 = vpop.f32.mrf.mxu1 }
 0x3e8   : > { %v4147_v27 = vadd.f32 %v3809_v43, %v7044_v30  ;;  %v3489_v22 = vadd.f32 %v7672_v41, %v3488_v32  ;;  %v2075_v47 = vpop.f32.mrf.mxu2 }
 0x3e9   : > { %v2864_v26 = vpop.permute.xlu0 %2863  ;;  %v7734_v61 = vadd.f32 %v7309_v31, %v2075_v47 }
 0x3ea   : > { %v4403_v38 = vpack.c.bf16 %v4147_v27, %v4147_v27  ;;  %v4019_v28 = vadd.f32 %v3489_v22, %v7030_v37  ;;  %5545 = vmatmul.msk.bf16.gmra.mxu3 %vm1096_vm0, %v2864_v26  ;;  %v1757_v42 = vpop.f32.mrf.mxu0 }
 0x3eb   : > { %v7725_v18 = vadd.f32 %v7309_v31, %v1757_v42  ;;  %v5692_v42 = vld [vmem:[%s5778_s26 + $0x3f0] sm:$0xff] }
 0x3ec   : > { %4660 = vst.msk [vmem:[%s6226_s16 + $0x324] sm:$0xf] %vm4458_vm1, %v4403_v38  ;;  %v4275_v30 = vpack.c.bf16 %v4019_v28, %v4019_v28  ;;  %v2736_v38 = vpop.permute.xlu1 %2735 }
 0x3ed   : > { %v3811_v16 = vpop.f32.mrf.mxu3  ;;  %v2237_v8 = vmax.f32 %v7725_v18, 0.0 }
 0x3ee   : > { %4532 = vst.msk [vmem:[%s6226_s16 + $0x124] sm:$0xf] %vm4458_vm1, %v4275_v30  ;;  %v3812_v37 = vadd.f32 %v7672_v41, %v3811_v16  ;;  %v5628_v30 = vld [vmem:[%s5778_s26 + $0x1f0] sm:$0xff] }
 0x3ef   : > { %v3491_v43 = vpop.f32.mrf.mxu1  ;;  %v2439_v32 = vpack.c.bf16 %v2237_v8, %v2236_v59 }
 0x3f0   : > { %v4148_v27 = vadd.f32 %v3812_v37, %v7079_v3  ;;  %v3492_v22 = vadd.f32 %v7672_v41, %v3491_v43  ;;  %v2077_v26 = vpop.f32.mrf.mxu2  ;;  %v2364_v3 = vmax.f32 %v7734_v61, 0.0 }
 0x3f1   : > { %v7739_v28 = vadd.f32 %v7309_v31, %v2077_v26  ;;  %2751 = vrot.lane.b32.xlu2 %v2439_v32, %s5729_s29 }
 0x3f2   : > { %v4404_v16 = vpack.c.bf16 %v4148_v27, %v4148_v27  ;;  %v4020_v47 = vadd.f32 %v3492_v22, %v7062_v20  ;;  %5481 = vmatmul.msk.bf16.gmra.mxu1 %vm1096_vm0, %v2736_v38  ;;  %v1760_v59 = vpop.f32.mrf.mxu0 }
 0x3f3   : > { %v2365_v8 = vmax.f32 %v7739_v28, 0.0  ;;  %v7757_v27 = vadd.f32 %v7309_v31, %v1760_v59 }
 0x3f4   : > { %4661 = vst.msk [vmem:[%s6226_s16 + $0x328] sm:$0xf] %vm4458_vm1, %v4404_v16  ;;  %v4276_v37 = vpack.c.bf16 %v4020_v47, %v4020_v47  ;;  %v2866_v16 = vpop.permute.xlu2 %2865 }
 0x3f5   : > { %5426 = vmatmul.msk.bf16.gmra.mxu2 %vm1096_vm0, %v5692_v42  ;;  %v3813_v43 = vpop.f32.mrf.mxu3  ;;  %v2503_v26 = vpack.c.bf16 %v2365_v8, %v2364_v3  ;;  %5362 = vmatmul.msk.bf16.gmra.mxu0 %vm1096_vm0, %v5628_v30  ;;  %v2238_v8 = vmax.f32 %v7757_v27, 0.0 }
 0x3f6   : > { %4533 = vst.msk [vmem:[%s6226_s16 + $0x128] sm:$0xf] %vm4458_vm1, %v4276_v37  ;;  %v3814_v20 = vadd.f32 %v7672_v41, %v3813_v43 }
 0x3f7   : > { %2879 = vrot.lane.b32.xlu1 %v2503_v26, %s5729_s29  ;;  %v3493_v32 = vpop.f32.mrf.mxu1 }
 0x3f8   : > { %v4149_v22 = vadd.f32 %v3814_v20, %v7084_v60  ;;  %v3494_v38 = vadd.f32 %v7672_v41, %v3493_v32  ;;  %v2080_v42 = vpop.f32.mrf.mxu2 }
 0x3f9   : > { %v7774_v26 = vadd.f32 %v7309_v31, %v2080_v42 }
 0x3fa   : > { %v4405_v47 = vpack.c.bf16 %v4149_v22, %v4149_v22  ;;  %v4021_v30 = vadd.f32 %v3494_v38, %v7070_v53  ;;  %5546 = vmatmul.msk.bf16.gmra.mxu3 %vm1096_vm0, %v2866_v16  ;;  %v1762_v3 = vpop.f32.mrf.mxu0 }
 0x3fb   : > { %v7765_v37 = vadd.f32 %v7309_v31, %v1762_v3  ;;  %v5693_v3 = vld [vmem:[%s5778_s26 + $0x3f8] sm:$0xff] }
 0x3fc   : > { %4662 = vst.msk [vmem:[%s6226_s16 + $0x32c] sm:$0xf] %vm4458_vm1, %v4405_v47  ;;  %v4277_v60 = vpack.c.bf16 %v4021_v30, %v4021_v30  ;;  %v2738_v47 = vpop.permute.xlu0 %2737 }
 0x3fd   : > { %v3816_v59 = vpop.f32.mrf.mxu3  ;;  %v2239_v43 = vmax.f32 %v7765_v37, 0.0 }
 0x3fe   : > { %4534 = vst.msk [vmem:[%s6226_s16 + $0x12c] sm:$0xf] %vm4458_vm1, %v4277_v60  ;;  %v3817_v53 = vadd.f32 %v7672_v41, %v3816_v59  ;;  %v5629_v60 = vld [vmem:[%s5778_s26 + $0x1f8] sm:$0xff] }
 0x3ff   : > { %v3496_v20 = vpop.f32.mrf.mxu1  ;;  %v2440_v32 = vpack.c.bf16 %v2239_v43, %v2238_v8 }
 0x400   : > { %v4150_v22 = vadd.f32 %v3817_v53, %v7119_v15  ;;  %v3497_v38 = vadd.f32 %v7672_v41, %v3496_v20  ;;  %v2082_v16 = vpop.f32.mrf.mxu2  ;;  %v2366_v15 = vmax.f32 %v7774_v26, 0.0 }
 0x401   : > { %v7779_v30 = vadd.f32 %v7309_v31, %v2082_v16  ;;  %2753 = vrot.lane.b32.xlu1 %v2440_v32, %s5729_s29 }
 0x402   : > { %v4406_v59 = vpack.c.bf16 %v4150_v22, %v4150_v22  ;;  %v4022_v42 = vadd.f32 %v3497_v38, %v7102_v11  ;;  %5482 = vmatmul.msk.bf16.gmra.mxu1 %vm1096_vm0, %v2738_v47  ;;  %v1765_v8 = vpop.f32.mrf.mxu0  ;;  %v7799_v22 = vld [vmem:[%s8414_s2] ss:$0 sm:$0xff] }
 0x403   : > { %v2367_v43 = vmax.f32 %v7779_v30, 0.0  ;;  %v7802_v38 = vadd.f32 %v7799_v22, %v1765_v8 }
 0x404   : > { %4663 = vst.msk [vmem:[%s6226_s16 + $0x330] sm:$0xf] %vm4458_vm1, %v4406_v59  ;;  %v4278_v53 = vpack.c.bf16 %v4022_v42, %v4022_v42 }
 0x405   : > { %5427 = vmatmul.msk.bf16.gmra.mxu2 %vm1096_vm0, %v5693_v3  ;;  %v3818_v31 = vpop.f32.mrf.mxu3  ;;  %v2504_v20 = vpack.c.bf16 %v2367_v43, %v2366_v15  ;;  %5363 = vmatmul.msk.bf16.gmra.mxu0 %vm1096_vm0, %v5629_v60  ;;  %v2240_v43 = vmax.f32 %v7802_v38, 0.0 }
 0x406   : > { %4535 = vst.msk [vmem:[%s6226_s16 + $0x130] sm:$0xf] %vm4458_vm1, %v4278_v53  ;;  %v3819_v11 = vadd.f32 %v7672_v41, %v3818_v31 }
 0x407   : > { %2881 = vrot.lane.b32.xlu0 %v2504_v20, %s5729_s29  ;;  %v3498_v32 = vpop.f32.mrf.mxu1 }
 0x408   : > { %v4151_v16 = vadd.f32 %v3819_v11, %v7124_v44  ;;  %v3499_v47 = vadd.f32 %v7672_v41, %v3498_v32  ;;  %v2085_v3 = vpop.f32.mrf.mxu2 }
 0x409   : > { %v2868_v60 = vpop.permute.xlu1 %2867 }
 0x40a   : > { %v4407_v59 = vpack.c.bf16 %v4151_v16, %v4151_v16  ;;  %v4023_v42 = vadd.f32 %v3499_v47, %v7110_v5  ;;  %5547 = vmatmul.msk.bf16.gmra.mxu3 %vm1096_vm0, %v2868_v60  ;;  %v1767_v15 = vpop.f32.mrf.mxu0  ;;  %v7819_v5 = vadd.f32 %v7799_v22, %v2085_v3 }
 0x40b   : > { %v7810_v53 = vadd.f32 %v7799_v22, %v1767_v15 }
 0x40c   : > { %4664 = vst.msk [vmem:[%s6226_s16 + $0x334] sm:$0xf] %vm4458_vm1, %v4407_v59  ;;  %v4279_v8 = vpack.c.bf16 %v4023_v42, %v4023_v42  ;;  %v2740_v59 = vpop.permute.xlu2 %2739 }
 0x40d   : > { %v3821_v31 = vpop.f32.mrf.mxu3  ;;  %v2241_v44 = vmax.f32 %v7810_v53, 0.0 }
 0x40e   : > { %4536 = vst.msk [vmem:[%s6226_s16 + $0x134] sm:$0xf] %vm4458_vm1, %v4279_v8  ;;  %v3822_v20 = vadd.f32 %v7672_v41, %v3821_v31 }
 0x40f   : > { %v3501_v11 = vpop.f32.mrf.mxu1  ;;  %v2441_v32 = vpack.c.bf16 %v2241_v44, %v2240_v43  ;;  %v2368_v43 = vmax.f32 %v7819_v5, 0.0 }
 0x410   : > { %v4152_v16 = vadd.f32 %v3822_v20, %v7159_v2  ;;  %v3502_v47 = vadd.f32 %v7672_v41, %v3501_v11  ;;  %v2087_v60 = vpop.f32.mrf.mxu2 }
 0x411   : > { %v7824_v42 = vadd.f32 %v7799_v22, %v2087_v60  ;;  %2755 = vrot.lane.b32.xlu0 %v2441_v32, %s5729_s29 }
 0x412   : > { %v4408_v15 = vpack.c.bf16 %v4152_v16, %v4152_v16  ;;  %v4024_v8 = vadd.f32 %v3502_v47, %v7142_v34  ;;  %5483 = vmatmul.msk.bf16.gmra.mxu1 %vm1096_vm0, %v2740_v59  ;;  %v1770_v3 = vpop.f32.mrf.mxu0 }
 0x413   : > { %v2369_v2 = vmax.f32 %v7824_v42, 0.0  ;;  %v7838_v32 = vadd.f32 %v7799_v22, %v1770_v3 }
 0x414   : > { %4665 = vst.msk [vmem:[%s6226_s16 + $0x338] sm:$0xf] %vm4458_vm1, %v4408_v15  ;;  %v4280_v31 = vpack.c.bf16 %v4024_v8, %v4024_v8 }
 0x415   : > { %v3823_v44 = vpop.f32.mrf.mxu3  ;;  %v2505_v20 = vpack.c.bf16 %v2369_v2, %v2368_v43  ;;  %v2242_v2 = vmax.f32 %v7838_v32, 0.0 }
 0x416   : > { %4537 = vst.msk [vmem:[%s6226_s16 + $0x138] sm:$0xf] %vm4458_vm1, %v4280_v31  ;;  %v3824_v11 = vadd.f32 %v7672_v41, %v3823_v44 }
 0x417   : > { %2883 = vrot.lane.b32.xlu2 %v2505_v20, %s5729_s29  ;;  %v3503_v34 = vpop.f32.mrf.mxu1 }
 0x418   : > { %v4153_v16 = vadd.f32 %v3824_v11, %v7164_v19  ;;  %v3504_v47 = vadd.f32 %v7672_v41, %v3503_v34  ;;  %v2090_v60 = vpop.f32.mrf.mxu2 }
 0x419   : > { %v2870_v59 = vpop.permute.xlu0 %2869 }
 0x41a   : > { %v4409_v15 = vpack.c.bf16 %v4153_v16, %v4153_v16  ;;  %v4025_v8 = vadd.f32 %v3504_v47, %v7150_v13  ;;  %5548 = vmatmul.msk.bf16.gmra.mxu3 %vm1096_vm0, %v2870_v59  ;;  %v1772_v43 = vpop.f32.mrf.mxu0  ;;  %v7855_v13 = vadd.f32 %v7799_v22, %v2090_v60 }
 0x41b   : > { %v7846_v31 = vadd.f32 %v7799_v22, %v1772_v43 }
 0x41c   : > { %4666 = vst.msk [vmem:[%s6226_s16 + $0x33c] sm:$0xf] %vm4458_vm1, %v4409_v15  ;;  %v4281_v3 = vpack.c.bf16 %v4025_v8, %v4025_v8  ;;  %v2742_v15 = vpop.permute.xlu1 %2741 }
 0x41d   : > { %v3826_v44 = vpop.f32.mrf.mxu3  ;;  %v2243_v19 = vmax.f32 %v7846_v31, 0.0 }
 0x41e   : > { %4538 = vst.msk [vmem:[%s6226_s16 + $0x13c] sm:$0xf] %vm4458_vm1, %v4281_v3  ;;  %v3827_v20 = vadd.f32 %v7672_v41, %v3826_v44 }
 0x41f   : > { %v3506_v11 = vpop.f32.mrf.mxu1  ;;  %v2442_v34 = vpack.c.bf16 %v2243_v19, %v2242_v2  ;;  %v2370_v2 = vmax.f32 %v7855_v13, 0.0 }
 0x420   : > { %v4154_v16 = vadd.f32 %v3827_v20, %v7204_v14  ;;  %v3507_v47 = vadd.f32 %v7672_v41, %v3506_v11  ;;  %v2092_v59 = vpop.f32.mrf.mxu2 }
 0x421   : > { %v7860_v8 = vadd.f32 %v7799_v22, %v2092_v59  ;;  %2757 = vrot.lane.b32.xlu2 %v2442_v34, %s5729_s29 }
 0x422   : > { %v4410_v43 = vpack.c.bf16 %v4154_v16, %v4154_v16  ;;  %v4026_v3 = vadd.f32 %v3507_v47, %v7187_v39  ;;  %5484 = vmatmul.msk.bf16.gmra.mxu1 %vm1096_vm0, %v2742_v15  ;;  %v1775_v60 = vpop.f32.mrf.mxu0  ;;  %v2872_v15 = vpop.permute.xlu2 %2871 }
 0x423   : > { %v2371_v14 = vmax.f32 %v7860_v8, 0.0  ;;  %v7874_v34 = vadd.f32 %v7799_v22, %v1775_v60 }
 0x424   : > { %4667 = vst.msk [vmem:[%s6226_s16 + $0x340] sm:$0xf] %vm4458_vm1, %v4410_v43  ;;  %v4282_v44 = vpack.c.bf16 %v4026_v3, %v4026_v3 }
 0x425   : > { %v3828_v19 = vpop.f32.mrf.mxu3  ;;  %v2506_v20 = vpack.c.bf16 %v2371_v14, %v2370_v2  ;;  %v2244_v14 = vmax.f32 %v7874_v34, 0.0 }
 0x426   : > { %4539 = vst.msk [vmem:[%s6226_s16 + $0x140] sm:$0xf] %vm4458_vm1, %v4282_v44  ;;  %v3829_v11 = vadd.f32 %v7672_v41, %v3828_v19 }
 0x427   : > { %2885 = vrot.lane.b32.xlu1 %v2506_v20, %s5729_s29  ;;  %v3508_v39 = vpop.f32.mrf.mxu1 }
 0x428   : > { %v4155_v16 = vadd.f32 %v3829_v11, %v7209_v36  ;;  %v3509_v47 = vadd.f32 %v7672_v41, %v3508_v39  ;;  %v2095_v59 = vpop.f32.mrf.mxu2 }
 0x42a   : > { %v4411_v43 = vpack.c.bf16 %v4155_v16, %v4155_v16  ;;  %v4027_v3 = vadd.f32 %v3509_v47, %v7195_v63  ;;  %5549 = vmatmul.msk.bf16.gmra.mxu3 %vm1096_vm0, %v2872_v15  ;;  %v1777_v2 = vpop.f32.mrf.mxu0  ;;  %v7891_v63 = vadd.f32 %v7799_v22, %v2095_v59 }
 0x42b   : > { %v7882_v44 = vadd.f32 %v7799_v22, %v1777_v2 }
 0x42c   : > { %4668 = vst.msk [vmem:[%s6226_s16 + $0x344] sm:$0xf] %vm4458_vm1, %v4411_v43  ;;  %v4283_v60 = vpack.c.bf16 %v4027_v3, %v4027_v3  ;;  %v2744_v43 = vpop.permute.xlu0 %2743 }
 0x42d   : > { %v3831_v19 = vpop.f32.mrf.mxu3  ;;  %v2245_v36 = vmax.f32 %v7882_v44, 0.0 }
 0x42e   : > { %4540 = vst.msk [vmem:[%s6226_s16 + $0x144] sm:$0xf] %vm4458_vm1, %v4283_v60  ;;  %v3832_v20 = vadd.f32 %v7672_v41, %v3831_v19 }
 0x42f   : > { %v3511_v11 = vpop.f32.mrf.mxu1  ;;  %v2443_v39 = vpack.c.bf16 %v2245_v36, %v2244_v14  ;;  %v2372_v14 = vmax.f32 %v7891_v63, 0.0 }
 0x430   : > { %v4156_v16 = vadd.f32 %v3832_v20, %v7244_v40  ;;  %v3512_v47 = vadd.f32 %v7672_v41, %v3511_v11  ;;  %v2097_v15 = vpop.f32.mrf.mxu2 }
 0x431   : > { %v7896_v3 = vadd.f32 %v7799_v22, %v2097_v15  ;;  %2759 = vrot.lane.b32.xlu1 %v2443_v39, %s5729_s29 }
 0x432   : > { %v4412_v2 = vpack.c.bf16 %v4156_v16, %v4156_v16  ;;  %v4028_v60 = vadd.f32 %v3512_v47, %v7227_v50  ;;  %5485 = vmatmul.msk.bf16.gmra.mxu1 %vm1096_vm0, %v2744_v43  ;;  %v1780_v59 = vpop.f32.mrf.mxu0 }
 0x433   : > { %v2373_v40 = vmax.f32 %v7896_v3, 0.0  ;;  %v7910_v39 = vadd.f32 %v7799_v22, %v1780_v59 }
 0x434   : > { %4669 = vst.msk [vmem:[%s6226_s16 + $0x348] sm:$0xf] %vm4458_vm1, %v4412_v2  ;;  %v4284_v19 = vpack.c.bf16 %v4028_v60, %v4028_v60 }
 0x435   : > { %v3833_v36 = vpop.f32.mrf.mxu3  ;;  %v2507_v20 = vpack.c.bf16 %v2373_v40, %v2372_v14  ;;  %v2246_v40 = vmax.f32 %v7910_v39, 0.0 }
 0x436   : > { %4541 = vst.msk [vmem:[%s6226_s16 + $0x148] sm:$0xf] %vm4458_vm1, %v4284_v19  ;;  %v3834_v11 = vadd.f32 %v7672_v41, %v3833_v36 }
 0x437   : > { %2887 = vrot.lane.b32.xlu0 %v2507_v20, %s5729_s29  ;;  %v3513_v50 = vpop.f32.mrf.mxu1 }
 0x438   : > { %v4157_v16 = vadd.f32 %v3834_v11, %v7249_v0  ;;  %v3514_v47 = vadd.f32 %v7672_v41, %v3513_v50  ;;  %v2100_v15 = vpop.f32.mrf.mxu2 }
 0x439   : > { %v2874_v43 = vpop.permute.xlu1 %2873 }
 0x43a   : > { %v4413_v2 = vpack.c.bf16 %v4157_v16, %v4157_v16  ;;  %v4029_v60 = vadd.f32 %v3514_v47, %v7235_v55  ;;  %5550 = vmatmul.msk.bf16.gmra.mxu3 %vm1096_vm0, %v2874_v43  ;;  %v1782_v14 = vpop.f32.mrf.mxu0  ;;  %v7927_v55 = vadd.f32 %v7799_v22, %v2100_v15 }
 0x43b   : > { %v7918_v19 = vadd.f32 %v7799_v22, %v1782_v14 }
 0x43c   : > { %4670 = vst.msk [vmem:[%s6226_s16 + $0x34c] sm:$0xf] %vm4458_vm1, %v4413_v2  ;;  %v4285_v59 = vpack.c.bf16 %v4029_v60, %v4029_v60  ;;  %v2746_v2 = vpop.permute.xlu2 %2745 }
 0x43d   : > { %v3836_v36 = vpop.f32.mrf.mxu3  ;;  %v2247_v0 = vmax.f32 %v7918_v19, 0.0 }
 0x43e   : > { %4542 = vst.msk [vmem:[%s6226_s16 + $0x14c] sm:$0xf] %vm4458_vm1, %v4285_v59  ;;  %v3837_v20 = vadd.f32 %v7672_v41, %v3836_v36 }
 0x43f   : > { %v3516_v11 = vpop.f32.mrf.mxu1  ;;  %v2444_v50 = vpack.c.bf16 %v2247_v0, %v2246_v40  ;;  %v2374_v40 = vmax.f32 %v7927_v55, 0.0 }
 0x440   : > { %v4158_v16 = vadd.f32 %v3837_v20, %v7284_v9  ;;  %v3517_v47 = vadd.f32 %v7672_v41, %v3516_v11  ;;  %v2102_v43 = vpop.f32.mrf.mxu2 }
 0x441   : > { %v7932_v60 = vadd.f32 %v7799_v22, %v2102_v43  ;;  %2761 = vrot.lane.b32.xlu0 %v2444_v50, %s5729_s29 }
 0x442   : > { %v4414_v14 = vpack.c.bf16 %v4158_v16, %v4158_v16  ;;  %v4030_v59 = vadd.f32 %v3517_v47, %v7267_v45  ;;  %5486 = vmatmul.msk.bf16.gmra.mxu1 %vm1096_vm0, %v2746_v2  ;;  %v1785_v15 = vpop.f32.mrf.mxu0 }
 0x443   : > { %v2375_v9 = vmax.f32 %v7932_v60, 0.0  ;;  %v7946_v50 = vadd.f32 %v7799_v22, %v1785_v15 }
 0x444   : > { %4671 = vst.msk [vmem:[%s6226_s16 + $0x350] sm:$0xf] %vm4458_vm1, %v4414_v14  ;;  %v4286_v36 = vpack.c.bf16 %v4030_v59, %v4030_v59 }
 0x445   : > { %v3838_v0 = vpop.f32.mrf.mxu3  ;;  %v2508_v20 = vpack.c.bf16 %v2375_v9, %v2374_v40  ;;  %v2248_v9 = vmax.f32 %v7946_v50, 0.0 }
 0x446   : > { %4543 = vst.msk [vmem:[%s6226_s16 + $0x150] sm:$0xf] %vm4458_vm1, %v4286_v36  ;;  %v3839_v11 = vadd.f32 %v7672_v41, %v3838_v0 }
 0x447   : > { %2889 = vrot.lane.b32.xlu2 %v2508_v20, %s5729_s29  ;;  %v3518_v45 = vpop.f32.mrf.mxu1 }
 0x448   : > { %v4159_v16 = vadd.f32 %v3839_v11, %v7289_v29  ;;  %v3519_v47 = vadd.f32 %v7672_v41, %v3518_v45  ;;  %v2105_v43 = vpop.f32.mrf.mxu2 }
 0x449   : > { %v2876_v2 = vpop.permute.xlu0 %2875 }
 0x44a   : > { %v4415_v14 = vpack.c.bf16 %v4159_v16, %v4159_v16  ;;  %v4031_v59 = vadd.f32 %v3519_v47, %v7275_v21  ;;  %5551 = vmatmul.msk.bf16.gmra.mxu3 %vm1096_vm0, %v2876_v2  ;;  %v1787_v40 = vpop.f32.mrf.mxu0  ;;  %v7963_v21 = vadd.f32 %v7799_v22, %v2105_v43 }
 0x44b   : > { %v7954_v36 = vadd.f32 %v7799_v22, %v1787_v40 }
 0x44c   : > { %4672 = vst.msk [vmem:[%s6226_s16 + $0x354] sm:$0xf] %vm4458_vm1, %v4415_v14  ;;  %v4287_v15 = vpack.c.bf16 %v4031_v59, %v4031_v59  ;;  %v2748_v14 = vpop.permute.xlu1 %2747 }
 0x44d   : > { %v3841_v0 = vpop.f32.mrf.mxu3  ;;  %v2249_v29 = vmax.f32 %v7954_v36, 0.0 }
 0x44e   : > { %4544 = vst.msk [vmem:[%s6226_s16 + $0x154] sm:$0xf] %vm4458_vm1, %v4287_v15  ;;  %v3842_v20 = vadd.f32 %v7672_v41, %v3841_v0 }
 0x44f   : > { %v3521_v11 = vpop.f32.mrf.mxu1  ;;  %v2445_v45 = vpack.c.bf16 %v2249_v29, %v2248_v9  ;;  %v2376_v9 = vmax.f32 %v7963_v21, 0.0 }
 0x450   : > { %v4160_v16 = vadd.f32 %v3842_v20, %v7329_v62  ;;  %v3522_v47 = vadd.f32 %v7672_v41, %v3521_v11  ;;  %v2107_v2 = vpop.f32.mrf.mxu2 }
 0x451   : > { %v7968_v59 = vadd.f32 %v7799_v22, %v2107_v2  ;;  %2763 = vrot.lane.b32.xlu2 %v2445_v45, %s5729_s29 }
 0x452   : > { %v4416_v40 = vpack.c.bf16 %v4160_v16, %v4160_v16  ;;  %v4032_v15 = vadd.f32 %v3522_v47, %v7312_v10  ;;  %5487 = vmatmul.msk.bf16.gmra.mxu1 %vm1096_vm0, %v2748_v14  ;;  %v1790_v43 = vpop.f32.mrf.mxu0  ;;  %v2878_v14 = vpop.permute.xlu2 %2877 }
 0x453   : > { %v2377_v62 = vmax.f32 %v7968_v59, 0.0  ;;  %v7982_v45 = vadd.f32 %v7799_v22, %v1790_v43 }
 0x454   : > { %4673 = vst.msk [vmem:[%s6226_s16 + $0x358] sm:$0xf] %vm4458_vm1, %v4416_v40  ;;  %v4288_v0 = vpack.c.bf16 %v4032_v15, %v4032_v15  ;;  %v8581_v15 = vld [vmem:[#allocation16_spill] sm:$0xff] }
 0x455   : > { %v3843_v29 = vpop.f32.mrf.mxu3  ;;  %v2509_v20 = vpack.c.bf16 %v2377_v62, %v2376_v9  ;;  %8580 = vst [vmem:[#allocation17_spill] sm:$0xff] %v7982_v45 }
 0x456   : > { %4545 = vst.msk [vmem:[%s6226_s16 + $0x158] sm:$0xf] %vm4458_vm1, %v4288_v0  ;;  %v3844_v11 = vadd.f32 %v7672_v41, %v3843_v29  ;;  %v2250_v0 = vmax.f32 %v7982_v45, 0.0 }
 0x457   : > { %2891 = vrot.lane.b32.xlu1 %v2509_v20, %s5729_s29  ;;  %v3523_v10 = vpop.f32.mrf.mxu1 }
 0x458   : > { %v4161_v16 = vadd.f32 %v3844_v11, %v7334_v4  ;;  %v3524_v47 = vadd.f32 %v7672_v41, %v3523_v10  ;;  %v2110_v2 = vpop.f32.mrf.mxu2 }
 0x459   : > { %v7999_v10 = vadd.f32 %v7799_v22, %v2110_v2 }
 0x45a   : > { %v4417_v40 = vpack.c.bf16 %v4161_v16, %v4161_v16  ;;  %v4033_v9 = vadd.f32 %v3524_v47, %v8581_v15  ;;  %5552 = vmatmul.msk.bf16.gmra.mxu3 %vm1096_vm0, %v2878_v14  ;;  %v1792_v62 = vpop.f32.mrf.mxu0  ;;  %v8584_v14 = vld [vmem:[#allocation21_spill] sm:$0xff] }
 0x45b   : > { %v7990_v29 = vadd.f32 %v7799_v22, %v1792_v62  ;;  %8583 = vst [vmem:[#allocation18_spill] sm:$0xff] %v7999_v10 }
 0x45c   : > { %4674 = vst.msk [vmem:[%s6226_s16 + $0x35c] sm:$0xf] %vm4458_vm1, %v4417_v40  ;;  %v4289_v43 = vpack.c.bf16 %v4033_v9, %v4033_v9  ;;  %v2750_v9 = vpop.permute.xlu0 %2749 }
 0x45d   : > { %8582 = vst [vmem:[#allocation15_spill] sm:$0xff] %v7990_v29  ;;  %v3846_v20 = vpop.f32.mrf.mxu3  ;;  %v2251_v4 = vmax.f32 %v7990_v29, 0.0 }
 0x45e   : > { %4546 = vst.msk [vmem:[%s6226_s16 + $0x15c] sm:$0xf] %vm4458_vm1, %v4289_v43  ;;  %v3847_v11 = vadd.f32 %v7672_v41, %v3846_v20  ;;  %v8586_v20 = vld [vmem:[#allocation19_spill] sm:$0xff] }
 0x45f   : > { %v3526_v16 = vpop.f32.mrf.mxu1  ;;  %v2446_v47 = vpack.c.bf16 %v2251_v4, %v2250_v0  ;;  %v2378_v0 = vmax.f32 %v7999_v10, 0.0 }
 0x460   : > { %v4162_v15 = vadd.f32 %v3847_v11, %v8584_v14  ;;  %v3527_v62 = vadd.f32 %v7672_v41, %v3526_v16  ;;  %v2112_v40 = vpop.f32.mrf.mxu2 }
 0x461   : > { %v8004_v45 = vadd.f32 %v7799_v22, %v2112_v40  ;;  %2765 = vrot.lane.b32.xlu1 %v2446_v47, %s5729_s29  ;;  %v8588_v40 = vld [vmem:[#allocation23_spill] sm:$0xff] }
 0x462   : > { %v4418_v43 = vpack.c.bf16 %v4162_v15, %v4162_v15  ;;  %v4034_v29 = vadd.f32 %v3527_v62, %v8586_v20  ;;  %5488 = vmatmul.msk.bf16.gmra.mxu1 %vm1096_vm0, %v2750_v9  ;;  %v1795_v2 = vpop.f32.mrf.mxu0 }
 0x463   : > { %8585 = vst [vmem:[#allocation16_spill] sm:$0xff] %v8004_v45  ;;  %v2379_v4 = vmax.f32 %v8004_v45, 0.0  ;;  %v8018_v62 = vadd.f32 %v7799_v22, %v1795_v2 }
 0x464   : > { %4675 = vst.msk [vmem:[%s6226_s16 + $0x360] sm:$0xf] %vm4458_vm1, %v4418_v43  ;;  %v4290_v11 = vpack.c.bf16 %v4034_v29, %v4034_v29 }
 0x465   : > { %v3848_v16 = vpop.f32.mrf.mxu3  ;;  %v2510_v14 = vpack.c.bf16 %v2379_v4, %v2378_v0  ;;  %8587 = vst [vmem:[#allocation21_spill] sm:$0xff] %v8018_v62  ;;  %v8589_v0 = vld [vmem:[#allocation20_spill] sm:$0xff] }
 0x466   : > { %4547 = vst.msk [vmem:[%s6226_s16 + $0x160] sm:$0xf] %vm4458_vm1, %v4290_v11  ;;  %v3849_v47 = vadd.f32 %v7672_v41, %v3848_v16  ;;  %v2252_v16 = vmax.f32 %v8018_v62, 0.0 }
 0x467   : > { %2893 = vrot.lane.b32.xlu0 %v2510_v14, %s5729_s29  ;;  %v3528_v15 = vpop.f32.mrf.mxu1 }
 0x468   : > { %v4163_v9 = vadd.f32 %v3849_v47, %v8588_v40  ;;  %v3529_v20 = vadd.f32 %v7672_v41, %v3528_v15  ;;  %v2115_v43 = vpop.f32.mrf.mxu2 }
 0x469   : > { %v2880_v29 = vpop.permute.xlu1 %2879  ;;  %v8035_v40 = vadd.f32 %v7799_v22, %v2115_v43 }
 0x46a   : > { %v4419_v45 = vpack.c.bf16 %v4163_v9, %v4163_v9  ;;  %v4035_v4 = vadd.f32 %v3529_v20, %v8589_v0  ;;  %5553 = vmatmul.msk.bf16.gmra.mxu3 %vm1096_vm0, %v2880_v29  ;;  %v1797_v11 = vpop.f32.mrf.mxu0  ;;  %v8592_v29 = vld [vmem:[#allocation2_spill] sm:$0xff] }
 0x46b   : > { %v8026_v14 = vadd.f32 %v7799_v22, %v1797_v11  ;;  %8591 = vst [vmem:[#allocation23_spill] sm:$0xff] %v8035_v40 }
 0x46c   : > { %4676 = vst.msk [vmem:[%s6226_s16 + $0x364] sm:$0xf] %vm4458_vm1, %v4419_v45  ;;  %v4291_v2 = vpack.c.bf16 %v4035_v4, %v4035_v4  ;;  %v2752_v4 = vpop.permute.xlu2 %2751 }
 0x46d   : > { %8590 = vst [vmem:[#allocation19_spill] sm:$0xff] %v8026_v14  ;;  %v3851_v10 = vpop.f32.mrf.mxu3  ;;  %v2253_v47 = vmax.f32 %v8026_v14, 0.0 }
 0x46e   : > { %4548 = vst.msk [vmem:[%s6226_s16 + $0x164] sm:$0xf] %vm4458_vm1, %v4291_v2  ;;  %v3852_v15 = vadd.f32 %v7672_v41, %v3851_v10  ;;  %v8594_v10 = vld [vmem:[#allocation22_spill] sm:$0xff] }
 0x46f   : > { %v3531_v9 = vpop.f32.mrf.mxu1  ;;  %v2447_v20 = vpack.c.bf16 %v2253_v47, %v2252_v16  ;;  %v2380_v16 = vmax.f32 %v8035_v40, 0.0 }
 0x470   : > { %v4164_v0 = vadd.f32 %v3852_v15, %v8592_v29  ;;  %v3532_v11 = vadd.f32 %v7672_v41, %v3531_v9  ;;  %v2117_v45 = vpop.f32.mrf.mxu2 }
 0x471   : > { %v8040_v62 = vadd.f32 %v7799_v22, %v2117_v45  ;;  %2767 = vrot.lane.b32.xlu0 %v2447_v20, %s5729_s29  ;;  %v8596_v45 = vld [vmem:[#allocation4_spill] sm:$0xff] }
 0x472   : > { %v4420_v2 = vpack.c.bf16 %v4164_v0, %v4164_v0  ;;  %v4036_v14 = vadd.f32 %v3532_v11, %v8594_v10  ;;  %5489 = vmatmul.msk.bf16.gmra.mxu1 %vm1096_vm0, %v2752_v4  ;;  %v1800_v43 = vpop.f32.mrf.mxu0 }
 0x473   : > { %8593 = vst [vmem:[#allocation20_spill] sm:$0xff] %v8040_v62  ;;  %v2381_v47 = vmax.f32 %v8040_v62, 0.0  ;;  %v8054_v11 = vadd.f32 %v7799_v22, %v1800_v43 }
 0x474   : > { %4677 = vst.msk [vmem:[%s6226_s16 + $0x368] sm:$0xf] %vm4458_vm1, %v4420_v2  ;;  %v4292_v15 = vpack.c.bf16 %v4036_v14, %v4036_v14 }
 0x475   : > { %v3853_v9 = vpop.f32.mrf.mxu3  ;;  %v2511_v29 = vpack.c.bf16 %v2381_v47, %v2380_v16  ;;  %8595 = vst [vmem:[#allocation2_spill] sm:$0xff] %v8054_v11  ;;  %v8597_v16 = vld [vmem:[#allocation5_spill] sm:$0xff] }
 0x476   : > { %4549 = vst.msk [vmem:[%s6226_s16 + $0x168] sm:$0xf] %vm4458_vm1, %v4292_v15  ;;  %v3854_v20 = vadd.f32 %v7672_v41, %v3853_v9  ;;  %v2254_v9 = vmax.f32 %v8054_v11, 0.0 }
 0x477   : > { %2895 = vrot.lane.b32.xlu2 %v2511_v29, %s5729_s29  ;;  %v3533_v0 = vpop.f32.mrf.mxu1 }
 0x478   : > { %v4165_v4 = vadd.f32 %v3854_v20, %v8596_v45  ;;  %v3534_v10 = vadd.f32 %v7672_v41, %v3533_v0  ;;  %v2120_v2 = vpop.f32.mrf.mxu2 }
 0x479   : > { %v2882_v14 = vpop.permute.xlu0 %2881  ;;  %v8071_v45 = vadd.f32 %v7799_v22, %v2120_v2 }
 0x47a   : > { %v4421_v62 = vpack.c.bf16 %v4165_v4, %v4165_v4  ;;  %v4037_v47 = vadd.f32 %v3534_v10, %v8597_v16  ;;  %5554 = vmatmul.msk.bf16.gmra.mxu3 %vm1096_vm0, %v2882_v14  ;;  %v1802_v15 = vpop.f32.mrf.mxu0 }
 0x47b   : > { %v8062_v29 = vadd.f32 %v7799_v22, %v1802_v15 }
 0x47c   : > { %4678 = vst.msk [vmem:[%s6226_s16 + $0x36c] sm:$0xf] %vm4458_vm1, %v4421_v62  ;;  %v4293_v43 = vpack.c.bf16 %v4037_v47, %v4037_v47  ;;  %v2754_v47 = vpop.permute.xlu1 %2753 }
 0x47d   : > { %8598 = vst [vmem:[#allocation22_spill] sm:$0xff] %v8062_v29  ;;  %v3856_v40 = vpop.f32.mrf.mxu3  ;;  %v2255_v20 = vmax.f32 %v8062_v29, 0.0 }
 0x47e   : > { %4550 = vst.msk [vmem:[%s6226_s16 + $0x16c] sm:$0xf] %vm4458_vm1, %v4293_v43  ;;  %v3857_v0 = vadd.f32 %v7672_v41, %v3856_v40  ;;  %v8600_v40 = vld [vmem:[#allocation3_spill] sm:$0xff] }
 0x47f   : > { %v3536_v4 = vpop.f32.mrf.mxu1  ;;  %v2448_v10 = vpack.c.bf16 %v2255_v20, %v2254_v9  ;;  %v2382_v9 = vmax.f32 %v8071_v45, 0.0 }
 0x480   : > { %v4166_v14 = vadd.f32 %v3857_v0, %v7449_v56  ;;  %v3537_v16 = vadd.f32 %v7672_v41, %v3536_v4  ;;  %v2122_v62 = vpop.f32.mrf.mxu2 }
 0x481   : > { %v8076_v15 = vadd.f32 %v7799_v22, %v2122_v62  ;;  %2769 = vrot.lane.b32.xlu2 %v2448_v10, %s5729_s29  ;;  %v8601_v62 = vld [vmem:[#allocation6_spill] sm:$0xff] }
 0x482   : > { %v4422_v43 = vpack.c.bf16 %v4166_v14, %v4166_v14  ;;  %v4038_v29 = vadd.f32 %v3537_v16, %v8600_v40  ;;  %5490 = vmatmul.msk.bf16.gmra.mxu1 %vm1096_vm0, %v2754_v47  ;;  %v1805_v2 = vpop.f32.mrf.mxu0 }
 0x483   : > { %8599 = vst [vmem:[#allocation4_spill] sm:$0xff] %v8076_v15  ;;  %v2383_v56 = vmax.f32 %v8076_v15, 0.0  ;;  %v8090_v16 = vadd.f32 %v7799_v22, %v1805_v2 }
 0x484   : > { %4679 = vst.msk [vmem:[%s6226_s16 + $0x370] sm:$0xf] %vm4458_vm1, %v4422_v43  ;;  %v4294_v20 = vpack.c.bf16 %v4038_v29, %v4038_v29  ;;  %v2884_v29 = vpop.permute.xlu2 %2883 }
 0x485   : > { %v3858_v0 = vpop.f32.mrf.mxu3  ;;  %v2512_v4 = vpack.c.bf16 %v2383_v56, %v2382_v9  ;;  %v8602_v9 = vld [vmem:[#allocation9_spill] sm:$0xff] }
 0x486   : > { %4551 = vst.msk [vmem:[%s6226_s16 + $0x170] sm:$0xf] %vm4458_vm1, %v4294_v20  ;;  %v3859_v10 = vadd.f32 %v7672_v41, %v3858_v0  ;;  %v2256_v0 = vmax.f32 %v8090_v16, 0.0 }
 0x487   : > { %2897 = vrot.lane.b32.xlu1 %v2512_v4, %s5729_s29  ;;  %v3538_v14 = vpop.f32.mrf.mxu1 }
 0x488   : > { %v4167_v47 = vadd.f32 %v3859_v10, %v8601_v62  ;;  %v3539_v40 = vadd.f32 %v7672_v41, %v3538_v14  ;;  %v2125_v43 = vpop.f32.mrf.mxu2 }
 0x489   : > { %v8107_v62 = vadd.f32 %v7799_v22, %v2125_v43 }
 0x48a   : > { %v4423_v15 = vpack.c.bf16 %v4167_v47, %v4167_v47  ;;  %v4039_v56 = vadd.f32 %v3539_v40, %v8602_v9  ;;  %5555 = vmatmul.msk.bf16.gmra.mxu3 %vm1096_vm0, %v2884_v29  ;;  %v1807_v20 = vpop.f32.mrf.mxu0 }
 0x48b   : > { %v8098_v4 = vadd.f32 %v7799_v22, %v1807_v20  ;;  %v2384_v43 = vmax.f32 %v8107_v62, 0.0 }
 0x48c   : > { %4680 = vst.msk [vmem:[%s6226_s16 + $0x374] sm:$0xf] %vm4458_vm1, %v4423_v15  ;;  %v4295_v2 = vpack.c.bf16 %v4039_v56, %v4039_v56  ;;  %v2756_v56 = vpop.permute.xlu0 %2755 }
 0x48d   : > { %8603 = vst [vmem:[#allocation5_spill] sm:$0xff] %v8098_v4  ;;  %v3861_v11 = vpop.f32.mrf.mxu3  ;;  %v2257_v10 = vmax.f32 %v8098_v4, 0.0  ;;  %v8604_v4 = vld [vmem:[#allocation8_spill] sm:$0xff] }
 0x48e   : > { %4552 = vst.msk [vmem:[%s6226_s16 + $0x174] sm:$0xf] %vm4458_vm1, %v4295_v2  ;;  %v3862_v14 = vadd.f32 %v7672_v41, %v3861_v11 }
 0x48f   : > { %v3541_v47 = vpop.f32.mrf.mxu1  ;;  %v2449_v40 = vpack.c.bf16 %v2257_v10, %v2256_v0 }
 0x490   : > { %v4168_v29 = vadd.f32 %v3862_v14, %v7489_v48  ;;  %v3542_v9 = vadd.f32 %v7672_v41, %v3541_v47  ;;  %v2127_v15 = vpop.f32.mrf.mxu2  ;;  %v8605_v47 = vld [vmem:[#allocation13_spill] sm:$0xff] }
 0x491   : > { %v8112_v20 = vadd.f32 %v7799_v22, %v2127_v15  ;;  %2771 = vrot.lane.b32.xlu1 %v2449_v40, %s5729_s29 }
 0x492   : > { %v4424_v2 = vpack.c.bf16 %v4168_v29, %v4168_v29  ;;  %v4040_v11 = vadd.f32 %v3542_v9, %v8604_v4  ;;  %5491 = vmatmul.msk.bf16.gmra.mxu1 %vm1096_vm0, %v2756_v56  ;;  %v8606_v56 = vld [vmem:[#allocation7_spill] sm:$0xff] }
 0x493   : > { %v2385_v0 = vmax.f32 %v8112_v20, 0.0 }
 0x494   : > { %4681 = vst.msk [vmem:[%s6226_s16 + $0x378] sm:$0xf] %vm4458_vm1, %v4424_v2  ;;  %v4296_v48 = vpack.c.bf16 %v4040_v11, %v4040_v11 }
 0x495   : > { %v3863_v10 = vpop.f32.mrf.mxu3  ;;  %v2513_v14 = vpack.c.bf16 %v2385_v0, %v2384_v43 }
 0x496   : > { %4553 = vst.msk [vmem:[%s6226_s16 + $0x178] sm:$0xf] %vm4458_vm1, %v4296_v48  ;;  %v3864_v22 = vadd.f32 %v7672_v41, %v3863_v10 }
 0x497   : > { %2899 = vrot.lane.b32.xlu0 %v2513_v14, %s5729_s29  ;;  %v3543_v4 = vpop.f32.mrf.mxu1 }
 0x498   : > { %v4169_v40 = vadd.f32 %v3864_v22, %v8605_v47  ;;  %v3544_v29 = vadd.f32 %v7672_v41, %v3543_v4  ;;  %v2758_v22 = vpop.permute.xlu2 %2757  ;;  %v8607_v47 = vld [vmem:[#allocation10_spill] sm:$0xff] }
 0x499   : > { %v2886_v9 = vpop.permute.xlu1 %2885 }
 0x49a   : > { %v4425_v15 = vpack.c.bf16 %v4169_v40, %v4169_v40  ;;  %v4041_v2 = vadd.f32 %v3544_v29, %v8606_v56  ;;  %5556 = vmatmul.msk.bf16.gmra.mxu3 %vm1096_vm0, %v2886_v9 }
 0x49c   : > { %4682 = vst.msk [vmem:[%s6226_s16 + $0x37c] sm:$0xf] %vm4458_vm1, %v4425_v15  ;;  %v4297_v11 = vpack.c.bf16 %v4041_v2, %v4041_v2 }
 0x49d   : > { %v3866_v43 = vpop.f32.mrf.mxu3 }
 0x49e   : > { %4554 = vst.msk [vmem:[%s6226_s16 + $0x17c] sm:$0xf] %vm4458_vm1, %v4297_v11  ;;  %v3867_v0 = vadd.f32 %v7672_v41, %v3866_v43 }
 0x49f   : > { %v3546_v48 = vpop.f32.mrf.mxu1 }
 0x4a0   : > { %v4170_v10 = vadd.f32 %v3867_v0, %v7529_v46  ;;  %v3547_v14 = vadd.f32 %v7672_v41, %v3546_v48  ;;  %v8145_v46 = vld [vmem:[%s8414_s2 + $0x1] ss:$0 sm:$0xff]  ;;  %v8608_v0 = vld [vmem:[#allocation11_spill] sm:$0xff] }
 0x4a2   : > { %v4426_v4 = vpack.c.bf16 %v4170_v10, %v4170_v10  ;;  %v4042_v40 = vadd.f32 %v3547_v14, %v8607_v47  ;;  %5492 = vmatmul.msk.bf16.gmra.mxu1 %vm1096_vm0, %v2758_v22 }
 0x4a4   : > { %4683 = vst.msk [vmem:[%s6226_s16 + $0x380] sm:$0xf] %vm4458_vm1, %v4426_v4  ;;  %v4298_v29 = vpack.c.bf16 %v4042_v40, %v4042_v40  ;;  %v2760_v40 = vpop.permute.xlu1 %2759 }
 0x4a5   : > { %v3868_v9 = vpop.f32.mrf.mxu3 }
 0x4a6   : > { %4555 = vst.msk [vmem:[%s6226_s16 + $0x180] sm:$0xf] %vm4458_vm1, %v4298_v29  ;;  %v3869_v41 = vadd.f32 %v8145_v46, %v3868_v9 }
 0x4a7   : > { %v3548_v15 = vpop.f32.mrf.mxu1 }
 0x4a8   : > { %v4171_v56 = vadd.f32 %v3869_v41, %v7534_v57  ;;  %v3549_v2 = vadd.f32 %v8145_v46, %v3548_v15 }
 0x4a9   : > { %v2888_v11 = vpop.permute.xlu0 %2887 }
 0x4aa   : > { %v4427_v43 = vpack.c.bf16 %v4171_v56, %v4171_v56  ;;  %v4043_v48 = vadd.f32 %v3549_v2, %v8608_v0  ;;  %5557 = vmatmul.msk.bf16.gmra.mxu3 %vm1096_vm0, %v2888_v11 }
 0x4ac   : > { %4684 = vst.msk [vmem:[%s6226_s16 + $0x384] sm:$0xf] %vm4458_vm1, %v4427_v43  ;;  %v4299_v10 = vpack.c.bf16 %v4043_v48, %v4043_v48  ;;  %v2890_v43 = vpop.permute.xlu2 %2889 }
 0x4ad   : > { %v3871_v14 = vpop.f32.mrf.mxu3 }
 0x4ae   : > { %4556 = vst.msk [vmem:[%s6226_s16 + $0x184] sm:$0xf] %vm4458_vm1, %v4299_v10  ;;  %v3872_v22 = vadd.f32 %v8145_v46, %v3871_v14 }
 0x4af   : > { %v3551_v4 = vpop.f32.mrf.mxu1 }
 0x4b0   : > { %v4172_v57 = vadd.f32 %v3872_v22, %v7569_v25  ;;  %v3552_v47 = vadd.f32 %v8145_v46, %v3551_v4 }
 0x4b2   : > { %v4428_v29 = vpack.c.bf16 %v4172_v57, %v4172_v57  ;;  %v4044_v9 = vadd.f32 %v3552_v47, %v7552_v1  ;;  %5493 = vmatmul.msk.bf16.gmra.mxu1 %vm1096_vm0, %v2760_v40  ;;  %v8609_v1 = vld [vmem:[#allocation12_spill] sm:$0xff] }
 0x4b3   : > { %v2762_v47 = vpop.permute.xlu0 %2761 }
 0x4b4   : > { %4685 = vst.msk [vmem:[%s6226_s16 + $0x388] sm:$0xf] %vm4458_vm1, %v4428_v29  ;;  %v4300_v41 = vpack.c.bf16 %v4044_v9, %v4044_v9 }
 0x4b5   : > { %v3873_v15 = vpop.f32.mrf.mxu3 }
 0x4b6   : > { %4557 = vst.msk [vmem:[%s6226_s16 + $0x188] sm:$0xf] %vm4458_vm1, %v4300_v41  ;;  %v3874_v56 = vadd.f32 %v8145_v46, %v3873_v15 }
 0x4b7   : > { %v3553_v2 = vpop.f32.mrf.mxu1 }
 0x4b8   : > { %v4173_v25 = vadd.f32 %v3874_v56, %v7574_v23  ;;  %v3554_v11 = vadd.f32 %v8145_v46, %v3553_v2 }
 0x4ba   : > { %v4429_v0 = vpack.c.bf16 %v4173_v25, %v4173_v25  ;;  %v4045_v48 = vadd.f32 %v3554_v11, %v8609_v1  ;;  %5558 = vmatmul.msk.bf16.gmra.mxu3 %vm1096_vm0, %v2890_v43 }
 0x4bc   : > { %4686 = vst.msk [vmem:[%s6226_s16 + $0x38c] sm:$0xf] %vm4458_vm1, %v4429_v0  ;;  %v4301_v10 = vpack.c.bf16 %v4045_v48, %v4045_v48 }
 0x4bd   : > { %v3876_v14 = vpop.f32.mrf.mxu3 }
 0x4be   : > { %4558 = vst.msk [vmem:[%s6226_s16 + $0x18c] sm:$0xf] %vm4458_vm1, %v4301_v10  ;;  %v3877_v22 = vadd.f32 %v8145_v46, %v3876_v14 }
 0x4bf   : > { %v3556_v4 = vpop.f32.mrf.mxu1 }
 0x4c0   : > { %v4174_v23 = vadd.f32 %v3877_v22, %v7609_v49  ;;  %v3557_v57 = vadd.f32 %v8145_v46, %v3556_v4  ;;  %v2764_v22 = vpop.permute.xlu2 %2763 }
 0x4c2   : > { %v4430_v40 = vpack.c.bf16 %v4174_v23, %v4174_v23  ;;  %v4046_v29 = vadd.f32 %v3557_v57, %v7592_v33  ;;  %5494 = vmatmul.msk.bf16.gmra.mxu1 %vm1096_vm0, %v2762_v47  ;;  %v8610_v33 = vld [vmem:[#allocation14_spill] sm:$0xff] }
 0x4c4   : > { %4687 = vst.msk [vmem:[%s6226_s16 + $0x390] sm:$0xf] %vm4458_vm1, %v4430_v40  ;;  %v4302_v9 = vpack.c.bf16 %v4046_v29, %v4046_v29 }
 0x4c5   : > { %v3878_v41 = vpop.f32.mrf.mxu3 }
 0x4c6   : > { %4559 = vst.msk [vmem:[%s6226_s16 + $0x190] sm:$0xf] %vm4458_vm1, %v4302_v9  ;;  %v3879_v15 = vadd.f32 %v8145_v46, %v3878_v41 }
 0x4c7   : > { %v3558_v56 = vpop.f32.mrf.mxu1 }
 0x4c8   : > { %v4175_v49 = vadd.f32 %v3879_v15, %v7614_v17  ;;  %v3559_v2 = vadd.f32 %v8145_v46, %v3558_v56 }
 0x4c9   : > { %v2892_v25 = vpop.permute.xlu1 %2891 }
 0x4ca   : > { %v4431_v11 = vpack.c.bf16 %v4175_v49, %v4175_v49  ;;  %v4047_v43 = vadd.f32 %v3559_v2, %v8610_v33  ;;  %5559 = vmatmul.msk.bf16.gmra.mxu3 %vm1096_vm0, %v2892_v25 }
 0x4cc   : > { %4688 = vst.msk [vmem:[%s6226_s16 + $0x394] sm:$0xf] %vm4458_vm1, %v4431_v11  ;;  %v4303_v0 = vpack.c.bf16 %v4047_v43, %v4047_v43 }
 0x4cd   : > { %v3881_v1 = vpop.f32.mrf.mxu3 }
 0x4ce   : > { %4560 = vst.msk [vmem:[%s6226_s16 + $0x194] sm:$0xf] %vm4458_vm1, %v4303_v0  ;;  %v3882_v48 = vadd.f32 %v8145_v46, %v3881_v1 }
 0x4cf   : > { %v3561_v10 = vpop.f32.mrf.mxu1 }
 0x4d0   : > { %v4176_v17 = vadd.f32 %v3882_v48, %v7649_v35  ;;  %v3562_v14 = vadd.f32 %v8145_v46, %v3561_v10 }
 0x4d2   : > { %v4432_v4 = vpack.c.bf16 %v4176_v17, %v4176_v17  ;;  %v4048_v23 = vadd.f32 %v3562_v14, %v7632_v58  ;;  %5495 = vmatmul.msk.bf16.gmra.mxu1 %vm1096_vm0, %v2764_v22  ;;  %v2896_v14 = vpop.permute.xlu2 %2895 }
 0x4d3   : > { %v2766_v33 = vpop.permute.xlu1 %2765 }
 0x4d4   : > { %4689 = vst.msk [vmem:[%s6226_s16 + $0x398] sm:$0xf] %vm4458_vm1, %v4432_v4  ;;  %v4304_v57 = vpack.c.bf16 %v4048_v23, %v4048_v23 }
 0x4d5   : > { %v3883_v47 = vpop.f32.mrf.mxu3 }
 0x4d6   : > { %4561 = vst.msk [vmem:[%s6226_s16 + $0x198] sm:$0xf] %vm4458_vm1, %v4304_v57  ;;  %v3884_v40 = vadd.f32 %v8145_v46, %v3883_v47 }
 0x4d7   : > { %v3563_v29 = vpop.f32.mrf.mxu1 }
 0x4d8   : > { %v4177_v35 = vadd.f32 %v3884_v40, %v7654_v24  ;;  %v3564_v9 = vadd.f32 %v8145_v46, %v3563_v29 }
 0x4d9   : > { %v2894_v41 = vpop.permute.xlu0 %2893 }
 0x4da   : > { %v4433_v15 = vpack.c.bf16 %v4177_v35, %v4177_v35  ;;  %v4049_v58 = vadd.f32 %v3564_v9, %v7640_v51  ;;  %5560 = vmatmul.msk.bf16.gmra.mxu3 %vm1096_vm0, %v2894_v41 }
 0x4dc   : > { %4690 = vst.msk [vmem:[%s6226_s16 + $0x39c] sm:$0xf] %vm4458_vm1, %v4433_v15  ;;  %v4305_v56 = vpack.c.bf16 %v4049_v58, %v4049_v58 }
 0x4dd   : > { %v3886_v49 = vpop.f32.mrf.mxu3 }
 0x4de   : > { %4562 = vst.msk [vmem:[%s6226_s16 + $0x19c] sm:$0xf] %vm4458_vm1, %v4305_v56  ;;  %v3887_v2 = vadd.f32 %v8145_v46, %v3886_v49 }
 0x4df   : > { %v3566_v25 = vpop.f32.mrf.mxu1 }
 0x4e0   : > { %v4178_v24 = vadd.f32 %v3887_v2, %v7694_v6  ;;  %v3567_v11 = vadd.f32 %v8145_v46, %v3566_v25 }
 0x4e2   : > { %v4434_v43 = vpack.c.bf16 %v4178_v24, %v4178_v24  ;;  %v4050_v51 = vadd.f32 %v3567_v11, %v7677_v52  ;;  %5496 = vmatmul.msk.bf16.gmra.mxu1 %vm1096_vm0, %v2766_v33 }
 0x4e3   : > { %v2768_v29 = vpop.permute.xlu0 %2767 }
 0x4e4   : > { %4691 = vst.msk [vmem:[%s6226_s16 + $0x3a0] sm:$0xf] %vm4458_vm1, %v4434_v43  ;;  %v4306_v0 = vpack.c.bf16 %v4050_v51, %v4050_v51  ;;  %v2770_v51 = vpop.permute.xlu2 %2769 }
 0x4e5   : > { %v3888_v1 = vpop.f32.mrf.mxu3 }
 0x4e6   : > { %4563 = vst.msk [vmem:[%s6226_s16 + $0x1a0] sm:$0xf] %vm4458_vm1, %v4306_v0  ;;  %v3889_v48 = vadd.f32 %v8145_v46, %v3888_v1 }
 0x4e7   : > { %v3568_v10 = vpop.f32.mrf.mxu1 }
 0x4e8   : > { %v4179_v6 = vadd.f32 %v3889_v48, %v7699_v54  ;;  %v3569_v17 = vadd.f32 %v8145_v46, %v3568_v10 }
 0x4ea   : > { %v4435_v22 = vpack.c.bf16 %v4179_v6, %v4179_v6  ;;  %v4051_v52 = vadd.f32 %v3569_v17, %v7685_v12  ;;  %5561 = vmatmul.msk.bf16.gmra.mxu3 %vm1096_vm0, %v2896_v14 }
 0x4ec   : > { %4692 = vst.msk [vmem:[%s6226_s16 + $0x3a4] sm:$0xf] %vm4458_vm1, %v4435_v22  ;;  %v4307_v4 = vpack.c.bf16 %v4051_v52, %v4051_v52 }
 0x4ed   : > { %v3891_v23 = vpop.f32.mrf.mxu3 }
 0x4ee   : > { %4564 = vst.msk [vmem:[%s6226_s16 + $0x1a4] sm:$0xf] %vm4458_vm1, %v4307_v4  ;;  %v3892_v57 = vadd.f32 %v8145_v46, %v3891_v23 }
 0x4ef   : > { %v3571_v47 = vpop.f32.mrf.mxu1 }
 0x4f0   : > { %v4180_v54 = vadd.f32 %v3892_v57, %v7734_v61  ;;  %v3572_v40 = vadd.f32 %v8145_v46, %v3571_v47 }
 0x4f2   : > { %v4436_v35 = vpack.c.bf16 %v4180_v54, %v4180_v54  ;;  %v4052_v12 = vadd.f32 %v3572_v40, %v7717_v7  ;;  %5497 = vmatmul.msk.bf16.gmra.mxu1 %vm1096_vm0, %v2768_v29 }
 0x4f4   : > { %4693 = vst.msk [vmem:[%s6226_s16 + $0x3a8] sm:$0xf] %vm4458_vm1, %v4436_v35  ;;  %v4308_v9 = vpack.c.bf16 %v4052_v12, %v4052_v12 }
 0x4f5   : > { %v3893_v41 = vpop.f32.mrf.mxu3 }
 0x4f6   : > { %4565 = vst.msk [vmem:[%s6226_s16 + $0x1a8] sm:$0xf] %vm4458_vm1, %v4308_v9  ;;  %v3894_v15 = vadd.f32 %v8145_v46, %v3893_v41 }
 0x4f7   : > { %v3573_v58 = vpop.f32.mrf.mxu1 }
 0x4f8   : > { %v4181_v61 = vadd.f32 %v3894_v15, %v7739_v28  ;;  %v3574_v56 = vadd.f32 %v8145_v46, %v3573_v58 }
 0x4f9   : > { %v2898_v49 = vpop.permute.xlu1 %2897 }
 0x4fa   : > { %v4437_v2 = vpack.c.bf16 %v4181_v61, %v4181_v61  ;;  %v4053_v7 = vadd.f32 %v3574_v56, %v7725_v18  ;;  %5562 = vmatmul.msk.bf16.gmra.mxu3 %vm1096_vm0, %v2898_v49 }
 0x4fc   : > { %4694 = vst.msk [vmem:[%s6226_s16 + $0x3ac] sm:$0xf] %vm4458_vm1, %v4437_v2  ;;  %v4309_v25 = vpack.c.bf16 %v4053_v7, %v4053_v7 }
 0x4fd   : > { %v3896_v24 = vpop.f32.mrf.mxu3 }
 0x4fe   : > { %4566 = vst.msk [vmem:[%s6226_s16 + $0x1ac] sm:$0xf] %vm4458_vm1, %v4309_v25  ;;  %v3897_v11 = vadd.f32 %v8145_v46, %v3896_v24 }
 0x4ff   : > { %v3576_v33 = vpop.f32.mrf.mxu1 }
 0x500   : > { %v4182_v28 = vadd.f32 %v3897_v11, %v7774_v26  ;;  %v3577_v43 = vadd.f32 %v8145_v46, %v3576_v33 }
 0x502   : > { %v4438_v0 = vpack.c.bf16 %v4182_v28, %v4182_v28  ;;  %v4054_v18 = vadd.f32 %v3577_v43, %v7757_v27  ;;  %5498 = vmatmul.msk.bf16.gmra.mxu1 %vm1096_vm0, %v2770_v51 }
 0x503   : > { %v2772_v54 = vpop.permute.xlu1 %2771 }
 0x504   : > { %4695 = vst.msk [vmem:[%s6226_s16 + $0x3b0] sm:$0xf] %vm4458_vm1, %v4438_v0  ;;  %v4310_v1 = vpack.c.bf16 %v4054_v18, %v4054_v18 }
 0x505   : > { %v3898_v48 = vpop.f32.mrf.mxu3 }
 0x506   : > { %4567 = vst.msk [vmem:[%s6226_s16 + $0x1b0] sm:$0xf] %vm4458_vm1, %v4310_v1  ;;  %v3899_v10 = vadd.f32 %v8145_v46, %v3898_v48 }
 0x507   : > { %v3578_v6 = vpop.f32.mrf.mxu1 }
 0x508   : > { %v4183_v26 = vadd.f32 %v3899_v10, %v7779_v30  ;;  %v3579_v17 = vadd.f32 %v8145_v46, %v3578_v6 }
 0x509   : > { %v2900_v14 = vpop.permute.xlu0 %2899 }
 0x50a   : > { %v4439_v22 = vpack.c.bf16 %v4183_v26, %v4183_v26  ;;  %v4055_v27 = vadd.f32 %v3579_v17, %v7765_v37  ;;  %5563 = vmatmul.msk.bf16.gmra.mxu3 %vm1096_vm0, %v2900_v14 }
 0x50c   : > { %4696 = vst.msk [vmem:[%s6226_s16 + $0x3b4] sm:$0xf] %vm4458_vm1, %v4439_v22  ;;  %v4311_v52 = vpack.c.bf16 %v4055_v27, %v4055_v27 }
 0x50d   : > { %v3901_v4 = vpop.f32.mrf.mxu3 }
 0x50e   : > { %4568 = vst.msk [vmem:[%s6226_s16 + $0x1b4] sm:$0xf] %vm4458_vm1, %v4311_v52  ;;  %v3902_v23 = vadd.f32 %v8145_v46, %v3901_v4 }
 0x50f   : > { %v3581_v57 = vpop.f32.mrf.mxu1 }
 0x510   : > { %v4184_v30 = vadd.f32 %v3902_v23, %v7819_v5  ;;  %v3582_v47 = vadd.f32 %v8145_v46, %v3581_v57 }
 0x512   : > { %v4440_v40 = vpack.c.bf16 %v4184_v30, %v4184_v30  ;;  %v4056_v37 = vadd.f32 %v3582_v47, %v7802_v38  ;;  %5499 = vmatmul.msk.bf16.gmra.mxu1 %vm1096_vm0, %v2772_v54 }
 0x514   : > { %4697 = vst.msk [vmem:[%s6226_s16 + $0x3b8] sm:$0xf] %vm4458_vm1, %v4440_v40  ;;  %v4312_v29 = vpack.c.bf16 %v4056_v37, %v4056_v37 }
 0x515   : > { %v3903_v35 = vpop.f32.mrf.mxu3 }
 0x516   : > { %4569 = vst.msk [vmem:[%s6226_s16 + $0x1b8] sm:$0xf] %vm4458_vm1, %v4312_v29  ;;  %v3904_v12 = vadd.f32 %v8145_v46, %v3903_v35 }
 0x517   : > { %v3583_v5 = vpop.f32.mrf.mxu1 }
 0x518   : > { %v4185_v9 = vadd.f32 %v3904_v12, %v7824_v42  ;;  %v3584_v41 = vadd.f32 %v8145_v46, %v3583_v5 }
 0x51a   : > { %v4441_v15 = vpack.c.bf16 %v4185_v9, %v4185_v9  ;;  %v4057_v38 = vadd.f32 %v3584_v41, %v7810_v53 }
 0x51c   : > { %4698 = vst.msk [vmem:[%s6226_s16 + $0x3bc] sm:$0xf] %vm4458_vm1, %v4441_v15  ;;  %v4313_v58 = vpack.c.bf16 %v4057_v38, %v4057_v38 }
 0x51d   : > { %v3906_v61 = vpop.f32.mrf.mxu3 }
 0x51e   : > { %4570 = vst.msk [vmem:[%s6226_s16 + $0x1bc] sm:$0xf] %vm4458_vm1, %v4313_v58  ;;  %v3907_v56 = vadd.f32 %v8145_v46, %v3906_v61 }
 0x51f   : > { %v3586_v49 = vpop.f32.mrf.mxu1 }
 0x520   : > { %v4186_v2 = vadd.f32 %v3907_v56, %v7855_v13  ;;  %v3587_v42 = vadd.f32 %v8145_v46, %v3586_v49 }
 0x522   : > { %v4442_v7 = vpack.c.bf16 %v4186_v2, %v4186_v2  ;;  %v4058_v25 = vadd.f32 %v3587_v42, %v7838_v32 }
 0x524   : > { %4699 = vst.msk [vmem:[%s6226_s16 + $0x3c0] sm:$0xf] %vm4458_vm1, %v4442_v7  ;;  %v4314_v53 = vpack.c.bf16 %v4058_v25, %v4058_v25 }
 0x525   : > { %v3908_v24 = vpop.f32.mrf.mxu3 }
 0x526   : > { %4571 = vst.msk [vmem:[%s6226_s16 + $0x1c0] sm:$0xf] %vm4458_vm1, %v4314_v53  ;;  %v3909_v11 = vadd.f32 %v8145_v46, %v3908_v24 }
 0x527   : > { %v3588_v33 = vpop.f32.mrf.mxu1 }
 0x528   : > { %v4187_v28 = vadd.f32 %v3909_v11, %v7860_v8  ;;  %v3589_v13 = vadd.f32 %v8145_v46, %v3588_v33  ;;  %v8611_v33 = vld [vmem:[#allocation18_spill] sm:$0xff] }
 0x52a   : > { %v4443_v43 = vpack.c.bf16 %v4187_v28, %v4187_v28  ;;  %v4059_v51 = vadd.f32 %v3589_v13, %v7846_v31 }
 0x52c   : > { %4700 = vst.msk [vmem:[%s6226_s16 + $0x3c4] sm:$0xf] %vm4458_vm1, %v4443_v43  ;;  %v4315_v32 = vpack.c.bf16 %v4059_v51, %v4059_v51  ;;  %v8612_v43 = vld [vmem:[#allocation17_spill] sm:$0xff] }
 0x52d   : > { %v3911_v0 = vpop.f32.mrf.mxu3 }
 0x52e   : > { %4572 = vst.msk [vmem:[%s6226_s16 + $0x1c4] sm:$0xf] %vm4458_vm1, %v4315_v32  ;;  %v3912_v18 = vadd.f32 %v8145_v46, %v3911_v0 }
 0x52f   : > { %v3591_v1 = vpop.f32.mrf.mxu1 }
 0x530   : > { %v4188_v48 = vadd.f32 %v3912_v18, %v7891_v63  ;;  %v3592_v8 = vadd.f32 %v8145_v46, %v3591_v1  ;;  %v8613_v1 = vld [vmem:[#allocation16_spill] sm:$0xff] }
 0x532   : > { %v4444_v10 = vpack.c.bf16 %v4188_v48, %v4188_v48  ;;  %v4060_v6 = vadd.f32 %v3592_v8, %v7874_v34 }
 0x534   : > { %4701 = vst.msk [vmem:[%s6226_s16 + $0x3c8] sm:$0xf] %vm4458_vm1, %v4444_v10  ;;  %v4316_v31 = vpack.c.bf16 %v4060_v6, %v4060_v6  ;;  %v8614_v6 = vld [vmem:[#allocation15_spill] sm:$0xff] }
 0x535   : > { %v3913_v26 = vpop.f32.mrf.mxu3 }
 0x536   : > { %4573 = vst.msk [vmem:[%s6226_s16 + $0x1c8] sm:$0xf] %vm4458_vm1, %v4316_v31  ;;  %v3914_v17 = vadd.f32 %v8145_v46, %v3913_v26 }
 0x537   : > { %v3593_v14 = vpop.f32.mrf.mxu1 }
 0x538   : > { %v4189_v22 = vadd.f32 %v3914_v17, %v7896_v3  ;;  %v3594_v63 = vadd.f32 %v8145_v46, %v3593_v14 }
 0x53a   : > { %v4445_v27 = vpack.c.bf16 %v4189_v22, %v4189_v22  ;;  %v4061_v52 = vadd.f32 %v3594_v63, %v7882_v44  ;;  %v8615_v63 = vld [vmem:[#allocation23_spill] sm:$0xff] }
 0x53c   : > { %4702 = vst.msk [vmem:[%s6226_s16 + $0x3cc] sm:$0xf] %vm4458_vm1, %v4445_v27  ;;  %v4317_v34 = vpack.c.bf16 %v4061_v52, %v4061_v52 }
 0x53d   : > { %v3916_v4 = vpop.f32.mrf.mxu3 }
 0x53e   : > { %4574 = vst.msk [vmem:[%s6226_s16 + $0x1cc] sm:$0xf] %vm4458_vm1, %v4317_v34  ;;  %v3917_v23 = vadd.f32 %v8145_v46, %v3916_v4  ;;  %v8616_v4 = vld [vmem:[#allocation21_spill] sm:$0xff] }
 0x53f   : > { %v3596_v57 = vpop.f32.mrf.mxu1 }
 0x540   : > { %v4190_v30 = vadd.f32 %v3917_v23, %v7927_v55  ;;  %v3597_v3 = vadd.f32 %v8145_v46, %v3596_v57 }
 0x542   : > { %v4446_v47 = vpack.c.bf16 %v4190_v30, %v4190_v30  ;;  %v4062_v54 = vadd.f32 %v3597_v3, %v7910_v39 }
 0x544   : > { %4703 = vst.msk [vmem:[%s6226_s16 + $0x3d0] sm:$0xf] %vm4458_vm1, %v4446_v47  ;;  %v4318_v44 = vpack.c.bf16 %v4062_v54, %v4062_v54  ;;  %v8617_v54 = vld [vmem:[#allocation20_spill] sm:$0xff] }
 0x545   : > { %v3918_v40 = vpop.f32.mrf.mxu3 }
 0x546   : > { %4575 = vst.msk [vmem:[%s6226_s16 + $0x1d0] sm:$0xf] %vm4458_vm1, %v4318_v44  ;;  %v3919_v37 = vadd.f32 %v8145_v46, %v3918_v40 }
 0x547   : > { %v3598_v29 = vpop.f32.mrf.mxu1 }
 0x548   : > { %v4191_v35 = vadd.f32 %v3919_v37, %v7932_v60  ;;  %v3599_v55 = vadd.f32 %v8145_v46, %v3598_v29  ;;  %v8618_v29 = vld [vmem:[#allocation19_spill] sm:$0xff] }
 0x54a   : > { %v4447_v12 = vpack.c.bf16 %v4191_v35, %v4191_v35  ;;  %v4063_v5 = vadd.f32 %v3599_v55, %v7918_v19 }
 0x54c   : > { %4704 = vst.msk [vmem:[%s6226_s16 + $0x3d4] sm:$0xf] %vm4458_vm1, %v4447_v12  ;;  %v4319_v39 = vpack.c.bf16 %v4063_v5, %v4063_v5 }
 0x54d   : > { %v3921_v9 = vpop.f32.mrf.mxu3 }
 0x54e   : > { %4576 = vst.msk [vmem:[%s6226_s16 + $0x1d4] sm:$0xf] %vm4458_vm1, %v4319_v39  ;;  %v3922_v41 = vadd.f32 %v8145_v46, %v3921_v9 }
 0x54f   : > { %v3601_v15 = vpop.f32.mrf.mxu1 }
 0x550   : > { %v4192_v38 = vadd.f32 %v3922_v41, %v7963_v21  ;;  %v3602_v60 = vadd.f32 %v8145_v46, %v3601_v15 }
 0x552   : > { %v4448_v58 = vpack.c.bf16 %v4192_v38, %v4192_v38  ;;  %v4064_v61 = vadd.f32 %v3602_v60, %v7946_v50  ;;  %v8619_v38 = vld [vmem:[#allocation2_spill] sm:$0xff] }
 0x554   : > { %4705 = vst.msk [vmem:[%s6226_s16 + $0x3d8] sm:$0xf] %vm4458_vm1, %v4448_v58  ;;  %v4320_v19 = vpack.c.bf16 %v4064_v61, %v4064_v61 }
 0x555   : > { %v3923_v56 = vpop.f32.mrf.mxu3 }
 0x556   : > { %4577 = vst.msk [vmem:[%s6226_s16 + $0x1d8] sm:$0xf] %vm4458_vm1, %v4320_v19  ;;  %v3924_v49 = vadd.f32 %v8145_v46, %v3923_v56 }
 0x557   : > { %v3603_v2 = vpop.f32.mrf.mxu1 }
 0x558   : > { %v4193_v42 = vadd.f32 %v3924_v49, %v7968_v59  ;;  %v3604_v21 = vadd.f32 %v8145_v46, %v3603_v2  ;;  %v8620_v49 = vld [vmem:[#allocation4_spill] sm:$0xff] }
 0x55a   : > { %v4449_v7 = vpack.c.bf16 %v4193_v42, %v4193_v42  ;;  %v4065_v25 = vadd.f32 %v3604_v21, %v7954_v36  ;;  %v8621_v21 = vld [vmem:[#allocation22_spill] sm:$0xff] }
 0x55c   : > { %4706 = vst.msk [vmem:[%s6226_s16 + $0x3dc] sm:$0xf] %vm4458_vm1, %v4449_v7  ;;  %v4321_v50 = vpack.c.bf16 %v4065_v25, %v4065_v25 }
 0x55d   : > { %v3926_v53 = vpop.f32.mrf.mxu3 }
 0x55e   : > { %4578 = vst.msk [vmem:[%s6226_s16 + $0x1dc] sm:$0xf] %vm4458_vm1, %v4321_v50  ;;  %v3927_v24 = vadd.f32 %v8145_v46, %v3926_v53 }
 0x55f   : > { %v3606_v11 = vpop.f32.mrf.mxu1 }
 0x560   : > { %v4194_v28 = vadd.f32 %v3927_v24, %v8611_v33  ;;  %v3607_v59 = vadd.f32 %v8145_v46, %v3606_v11 }
 0x562   : > { %v4450_v13 = vpack.c.bf16 %v4194_v28, %v4194_v28  ;;  %v4066_v51 = vadd.f32 %v3607_v59, %v8612_v43 }
 0x564   : > { %4707 = vst.msk [vmem:[%s6226_s16 + $0x3e0] sm:$0xf] %vm4458_vm1, %v4450_v13  ;;  %v4322_v36 = vpack.c.bf16 %v4066_v51, %v4066_v51 }
 0x565   : > { %v3928_v32 = vpop.f32.mrf.mxu3 }
 0x566   : > { %4579 = vst.msk [vmem:[%s6226_s16 + $0x1e0] sm:$0xf] %vm4458_vm1, %v4322_v36  ;;  %v3929_v0 = vadd.f32 %v8145_v46, %v3928_v32 }
 0x567   : > { %v3608_v18 = vpop.f32.mrf.mxu1 }
 0x568   : > { %v4195_v48 = vadd.f32 %v3929_v0, %v8613_v1  ;;  %v3609_v8 = vadd.f32 %v8145_v46, %v3608_v18  ;;  %v8622_v18 = vld [vmem:[#allocation5_spill] sm:$0xff] }
 0x56a   : > { %v4451_v10 = vpack.c.bf16 %v4195_v48, %v4195_v48  ;;  %v4067_v31 = vadd.f32 %v3609_v8, %v8614_v6 }
 0x56c   : > { %4708 = vst.msk [vmem:[%s6226_s16 + $0x3e4] sm:$0xf] %vm4458_vm1, %v4451_v10  ;;  %v4323_v26 = vpack.c.bf16 %v4067_v31, %v4067_v31 }
 0x56d   : > { %v3931_v17 = vpop.f32.mrf.mxu3 }
 0x56e   : > { %4580 = vst.msk [vmem:[%s6226_s16 + $0x1e4] sm:$0xf] %vm4458_vm1, %v4323_v26  ;;  %v3932_v14 = vadd.f32 %v8145_v46, %v3931_v17 }
 0x56f   : > { %v3611_v22 = vpop.f32.mrf.mxu1 }
 0x570   : > { %v4196_v27 = vadd.f32 %v3932_v14, %v8615_v63  ;;  %v3612_v52 = vadd.f32 %v8145_v46, %v3611_v22 }
 0x572   : > { %v4452_v34 = vpack.c.bf16 %v4196_v27, %v4196_v27  ;;  %v4068_v23 = vadd.f32 %v3612_v52, %v8616_v4 }
 0x574   : > { %4709 = vst.msk [vmem:[%s6226_s16 + $0x3e8] sm:$0xf] %vm4458_vm1, %v4452_v34  ;;  %v4324_v57 = vpack.c.bf16 %v4068_v23, %v4068_v23 }
 0x575   : > { %v3933_v30 = vpop.f32.mrf.mxu3 }
 0x576   : > { %4581 = vst.msk [vmem:[%s6226_s16 + $0x1e8] sm:$0xf] %vm4458_vm1, %v4324_v57  ;;  %v3934_v3 = vadd.f32 %v8145_v46, %v3933_v30 }
 0x577   : > { %v3613_v47 = vpop.f32.mrf.mxu1 }
 0x578   : > { %v4197_v44 = vadd.f32 %v3934_v3, %v8617_v54  ;;  %v3614_v40 = vadd.f32 %v8145_v46, %v3613_v47 }
 0x57a   : > { %v4453_v37 = vpack.c.bf16 %v4197_v44, %v4197_v44  ;;  %v4069_v35 = vadd.f32 %v3614_v40, %v8618_v29 }
 0x57c   : > { %4710 = vst.msk [vmem:[%s6226_s16 + $0x3ec] sm:$0xf] %vm4458_vm1, %v4453_v37  ;;  %v4325_v55 = vpack.c.bf16 %v4069_v35, %v4069_v35 }
 0x57d   : > { %v3936_v12 = vpop.f32.mrf.mxu3 }
 0x57e   : > { %4582 = vst.msk [vmem:[%s6226_s16 + $0x1ec] sm:$0xf] %vm4458_vm1, %v4325_v55  ;;  %v3937_v5 = vadd.f32 %v8145_v46, %v3936_v12 }
 0x57f   : > { %v3616_v39 = vpop.f32.mrf.mxu1 }
 0x580   : > { %v4198_v9 = vadd.f32 %v3937_v5, %v8071_v45  ;;  %v3617_v41 = vadd.f32 %v8145_v46, %v3616_v39 }
 0x582   : > { %v4454_v15 = vpack.c.bf16 %v4198_v9, %v4198_v9  ;;  %v4070_v60 = vadd.f32 %v3617_v41, %v8619_v38 }
 0x584   : > { %4711 = vst.msk [vmem:[%s6226_s16 + $0x3f0] sm:$0xf] %vm4458_vm1, %v4454_v15  ;;  %v4326_v58 = vpack.c.bf16 %v4070_v60, %v4070_v60 }
 0x585   : > { %v3938_v61 = vpop.f32.mrf.mxu3 }
 0x586   : > { %4583 = vst.msk [vmem:[%s6226_s16 + $0x1f0] sm:$0xf] %vm4458_vm1, %v4326_v58  ;;  %v3939_v19 = vadd.f32 %v8145_v46, %v3938_v61 }
 0x587   : > { %v3618_v56 = vpop.f32.mrf.mxu1 }
 0x588   : > { %v4199_v2 = vadd.f32 %v3939_v19, %v8620_v49  ;;  %v3619_v45 = vadd.f32 %v8145_v46, %v3618_v56 }
 0x58a   : > { %v4455_v42 = vpack.c.bf16 %v4199_v2, %v4199_v2  ;;  %v4071_v7 = vadd.f32 %v3619_v45, %v8621_v21 }
 0x58c   : > { %4712 = vst.msk [vmem:[%s6226_s16 + $0x3f4] sm:$0xf] %vm4458_vm1, %v4455_v42  ;;  %v4327_v25 = vpack.c.bf16 %v4071_v7, %v4071_v7 }
 0x58d   : > { %v3941_v50 = vpop.f32.mrf.mxu3 }
 0x58e   : > { %4584 = vst.msk [vmem:[%s6226_s16 + $0x1f4] sm:$0xf] %vm4458_vm1, %v4327_v25  ;;  %v3942_v53 = vadd.f32 %v8145_v46, %v3941_v50 }
 0x58f   : > { %v3621_v24 = vpop.f32.mrf.mxu1 }
 0x590   : > { %v4200_v11 = vadd.f32 %v3942_v53, %v8107_v62  ;;  %v3622_v33 = vadd.f32 %v8145_v46, %v3621_v24 }
 0x592   : > { %v4456_v28 = vpack.c.bf16 %v4200_v11, %v4200_v11  ;;  %v4072_v59 = vadd.f32 %v3622_v33, %v8090_v16 }
 0x594   : > { %4713 = vst.msk [vmem:[%s6226_s16 + $0x3f8] sm:$0xf] %vm4458_vm1, %v4456_v28  ;;  %v4328_v13 = vpack.c.bf16 %v4072_v59, %v4072_v59 }
 0x595   : > { %v3943_v43 = vpop.f32.mrf.mxu3 }
 0x596   : > { %4585 = vst.msk [vmem:[%s6226_s16 + $0x1f8] sm:$0xf] %vm4458_vm1, %v4328_v13  ;;  %v3944_v51 = vadd.f32 %v8145_v46, %v3943_v43 }
 0x597   : > { %v3623_v36 = vpop.f32.mrf.mxu1 }
 0x598   : > { %v4201_v32 = vadd.f32 %v3944_v51, %v8112_v20  ;;  %v3624_v0 = vadd.f32 %v8145_v46, %v3623_v36 }
 0x59a   : > { %v4457_v62 = vpack.c.bf16 %v4201_v32, %v4201_v32  ;;  %v4073_v1 = vadd.f32 %v3624_v0, %v8622_v18 }
 0x59c   : > { %4714 = vst.msk [vmem:[%s6226_s16 + $0x3fc] sm:$0xf] %vm4458_vm1, %v4457_v62  ;;  %v4329_v48 = vpack.c.bf16 %v4073_v1, %v4073_v1 }
 0x59e   : > { %4586 = vst.msk [vmem:[%s6226_s16 + $0x1fc] sm:$0xf] %vm4458_vm1, %v4329_v48 }
 0x59f PF: > { %s13_s12 = sadd.s32 1, %s5727_s12  }
 0x5a0   : > { %p10_p4 = scmp.ge.s32.totalorder %s13_s12, 4  }
 0x5a2   :  { %12 = sbr.rel (!%p10_p4) target bundleno = 1 (0x1), region = 62 }

</bundles_post_ra>
